<compile_context>
chip_gen: v7x
topology: tpu7x:2x2x1
jax: 0.10.0
libtpu: 0.0.40
codegen_flags: <defaults>
</compile_context>

<pallas_src>
import functools

import jax
import jax.numpy as jnp
from jax import lax
from jax.experimental import pallas as pl
from jax.experimental.pallas import tpu as pltpu

EPS = 1e-5
LANE = 128


# ---------------------------------------------------------------------------
# small helpers
# ---------------------------------------------------------------------------
def _round_up(n, m):
    return -(-n // m) * m


def _pad_channels(a, cp):
    c = a.shape[-1]
    if c == cp:
        return a
    pad = [(0, 0)] * (a.ndim - 1) + [(0, cp - c)]
    return jnp.pad(a, pad)


@functools.lru_cache(maxsize=None)
def _vmem_limit_bytes():
    """Generation-aware scoped-VMEM budget: ~3/4 of physical VMEM.
    v7x (64 MiB physical) -> 48 MiB; v5e/v6e (128 MiB) -> 96 MiB. Safe fallback 48 MiB."""
    phys = 64 * 1024 * 1024
    try:
        info = pltpu.get_tpu_info()
        phys = int(getattr(info, "vmem_capacity_bytes", phys))
    except Exception:
        pass
    return min(int(phys) * 3 // 4, 100 * 1024 * 1024)


def _params(semantics):
    return pltpu.CompilerParams(dimension_semantics=semantics,
                                vmem_limit_bytes=_vmem_limit_bytes())


def _pick_th(ho, wo, ci, co, stride, target_m=2048):
    """Largest divisor of ho with M = th*wo <= target_m (>=8 rows) that fits VMEM."""
    budget = _vmem_limit_bytes() // 2
    for th in (256, 128, 64, 32, 16, 8, 4, 2, 1):
        if ho % th:
            continue
        if th * wo > target_m and th > 8:
            continue
        if stride == 1:
            in_bytes = (th + 2) * (wo + 2) * ci * 2
        else:
            in_bytes = th * 6 * (wo + 1) * ci * 2
        out_bytes = th * wo * co * 2
        w_bytes = 9 * ci * co * 2
        est = 2 * (in_bytes + out_bytes + w_bytes)   # double-buffered blocks
        est += 2 * in_bytes + 2 * out_bytes          # f32 prologue tile + f32 accumulator
        if est <= budget:
            return th
    return 1


def _pick_tm(m, cap=2048):
    """Row-tile for the elementwise / 1x1-matmul kernels (rows are padded to a multiple)."""
    if m >= cap:
        return cap
    return _round_up(m, 8)


# ---------------------------------------------------------------------------
# Pallas kernels
# ---------------------------------------------------------------------------
def _conv3x3_kernel(*refs, stride, th, wo, wq, nb, fuse):
    """Pass A: optional fused BN+ReLU of the previous layer on the haloed tile, then 9
    accumulating bf16 MXU matmuls (taps are static in-kernel slices), per-block stats."""
    if fuse:
        a_ref, s_ref, t_ref, w_ref, y_ref, st_ref = refs
    else:
        a_ref, w_ref, y_ref, st_ref = refs

    if fuse:
        # Previous layer's folded BatchNorm + ReLU, applied to the raw conv output tile.
        # Zero-padded image-border positions must stay zero, so they are masked back.
        a = a_ref[0].astype(jnp.float32)
        blk = pl.program_id(0) % nb
        row = lax.broadcasted_iota(jnp.int32, a.shape, 0)
        col = lax.broadcasted_iota(jnp.int32, a.shape, 1)
        valid = (col >= 1) & (col <= wo)
        valid &= (row >= 1) | (blk != 0)           # top halo row is pad only on first block
        valid &= (row <= th) | (blk != nb - 1)     # bottom halo row is pad only on last block
        a = jnp.where(valid, jnp.maximum(a * s_ref[...] + t_ref[...], 0.0), 0.0)
        a = a.astype(jnp.bfloat16)
    else:
        a = a_ref[0]

    acc = None
    for dy in range(3):
        for dx in range(3):
            if stride == 1:
                lhs = a[dy:dy + th, dx:dx + wo, :]                 # (th, wo, Ci) bf16
            else:   # stride 2: axis-1 layout index = (dy*2 + w_parity)*wq + wq_idx
                base = (dy * 2 + (dx % 2)) * wq + dx // 2
                lhs = a[:, base:base + wo, :]                      # (th, wo, Ci) bf16
            part = jnp.dot(lhs.reshape(th * wo, lhs.shape[-1]), w_ref[dy, dx],
                           preferred_element_type=jnp.float32)     # (th*wo, Co) f32
            acc = part if acc is None else acc + part

    st_ref[0, 0:1, :] = jnp.sum(acc, axis=0, keepdims=True)        # per-block sum
    st_ref[0, 1:2, :] = jnp.sum(acc * acc, axis=0, keepdims=True)  # per-block sum of squares
    y_ref[0] = acc.astype(y_ref.dtype)


def _matmul_stats_kernel(x_ref, w_ref, y_ref, st_ref):
    """Pass A for the 1x1 (stride-decimated) residual conv: tiled matmul + per-block stats."""
    y = jnp.dot(x_ref[...], w_ref[...], preferred_element_type=jnp.float32)
    st_ref[0, 0:1, :] = jnp.sum(y, axis=0, keepdims=True)
    st_ref[0, 1:2, :] = jnp.sum(y * y, axis=0, keepdims=True)
    y_ref[...] = y.astype(y_ref.dtype)


def _bn_relu_add_kernel(y_ref, s_ref, t_ref, r_ref, rs_ref, rt_ref, o_ref):
    """Final pass: BN+ReLU of conv3 output, BN of the residual, residual add (bf16 out)."""
    main = jnp.maximum(y_ref[...].astype(jnp.float32) * s_ref[...] + t_ref[...], 0.0)
    res = r_ref[...].astype(jnp.float32) * rs_ref[...] + rt_ref[...]
    o_ref[...] = (main + res).astype(o_ref.dtype)


# ---------------------------------------------------------------------------
# XLA-side layout plumbing (no 9x im2col)
# ---------------------------------------------------------------------------
def _halo_blocks_s1(a, th):
    """(N,H,W,C) -> (N*nb, th+2, W+2, C): per-block haloed rows for a stride-1 3x3 conv."""
    n, h, w, c = a.shape
    ap = jnp.pad(a, ((0, 0), (1, 1), (1, 1), (0, 0)))
    nb = h // th
    blk = jnp.stack([ap[:, i * th:i * th + th + 2] for i in range(nb)], axis=1)
    return blk.reshape(n * nb, th + 2, w + 2, c), nb


def _taps_s2(a, th):
    """(N,H,W,C) -> (N*nb, th, 6*Wq, C): stride-2 3x3 conv taps with H pre-gathered
    (3 taps) and W split into even/odd phases; axis-2 index = (dy*2 + parity)*Wq + wq."""
    n, h, w, c = a.shape
    ho, wo = h // 2, w // 2
    wq = wo + 1
    ap = jnp.pad(a, ((0, 0), (1, 1), (1, 1), (0, 0)))
    x_pe = jnp.stack([ap[:, :, 0::2, :], ap[:, :, 1::2, :]], axis=2)           # (n,h+2,2,wq,c)
    taps = jnp.stack([x_pe[:, dy:dy + 2 * ho:2] for dy in range(3)], axis=2)   # (n,ho,3,2,wq,c)
    nb = ho // th
    return taps.reshape(n * nb, th, 6 * wq, c), nb, wq


def _prep_w3x3(w, cip, cop):
    co, ci = w.shape[:2]
    wt = jnp.transpose(w, (2, 3, 1, 0))                    # (3, 3, Ci, Co)
    wt = jnp.pad(wt, ((0, 0), (0, 0), (0, cip - ci), (0, cop - co)))
    return wt.astype(jnp.bfloat16)


def _prep_w1x1(w, cip, cop):
    co, ci = w.shape[:2]
    wt = jnp.pad(w[:, :, 0, 0].T, ((0, cip - ci), (0, cop - co)))
    return wt.astype(jnp.bfloat16)


def _fold_bn(stats, count, gamma, beta, cp):
    """Fold batch-stat BatchNorm into per-channel scale/shift (f32). stats: (2, cp)."""
    mean = stats[0] / count
    var = jnp.maximum(stats[1] / count - mean * mean, 0.0)
    g = _pad_channels(gamma.astype(jnp.float32), cp)
    b = _pad_channels(beta.astype(jnp.float32), cp)
    scale = g * lax.rsqrt(var + EPS)
    shift = b - mean * scale
    return scale.reshape(1, cp), shift.reshape(1, cp)


# ---------------------------------------------------------------------------
# pallas_call wrappers
# ---------------------------------------------------------------------------
def _conv3x3_bn_stats(act_bf, w3, stride, gamma, beta, prev_scale=None, prev_shift=None):
    n, h, w, cip = act_bf.shape
    cop = w3.shape[-1]
    fuse = prev_scale is not None
    if stride == 1:
        ho, wo = h, w
        th = _pick_th(ho, wo, cip, cop, 1)
        a, nb = _halo_blocks_s1(act_bf, th)
        a_block = (1, th + 2, w + 2, cip)
        wq = 0
    else:
        assert not fuse, "BN fusion only implemented for the stride-1 layers"
        ho, wo = h // 2, w // 2
        th = _pick_th(ho, wo, cip, cop, 2)
        a, nb, wq = _taps_s2(act_bf, th)
        a_block = (1, th, 6 * wq, cip)
    nblk = n * nb

    kern = functools.partial(_conv3x3_kernel, stride=stride, th=th, wo=wo, wq=wq,
                             nb=nb, fuse=fuse)
    in_specs = [pl.BlockSpec(a_block, lambda i: (i, 0, 0, 0))]
    inputs = [a]
    if fuse:
        in_specs += [pl.BlockSpec((1, cip), lambda i: (0, 0)),
                     pl.BlockSpec((1, cip), lambda i: (0, 0))]
        inputs += [prev_scale, prev_shift]
    in_specs += [pl.BlockSpec(w3.shape, lambda i: (0, 0, 0, 0))]
    inputs += [w3]

    y_raw, stats = pl.pallas_call(
        kern,
        grid=(nblk,),
        in_specs=in_specs,
        out_specs=[pl.BlockSpec((1, th * wo, cop), lambda i: (i, 0, 0)),
                   pl.BlockSpec((1, 2, cop), lambda i: (i, 0, 0))],
        out_shape=[jax.ShapeDtypeStruct((nblk, th * wo, cop), jnp.bfloat16),
                   jax.ShapeDtypeStruct((nblk, 2, cop), jnp.float32)],
        compiler_params=_params(("parallel",)),     # per-block stats -> megacore-friendly
    )(*inputs)

    scale, shift = _fold_bn(stats.sum(axis=0), n * ho * wo, gamma, beta, cop)
    return y_raw.reshape(n, ho, wo, cop), scale, shift


def _conv1x1_bn_stats(x2d_bf, w2d, gamma, beta):
    m, cip = x2d_bf.shape
    cop = w2d.shape[-1]
    tm = _pick_tm(m)
    mp = _round_up(m, tm)
    xin = jnp.pad(x2d_bf, ((0, mp - m), (0, 0))) if mp != m else x2d_bf
    y_raw, stats = pl.pallas_call(
        _matmul_stats_kernel,
        grid=(mp // tm,),
        in_specs=[pl.BlockSpec((tm, cip), lambda i: (i, 0)),
                  pl.BlockSpec((cip, cop), lambda i: (0, 0))],
        out_specs=[pl.BlockSpec((tm, cop), lambda i: (i, 0)),
                   pl.BlockSpec((1, 2, cop), lambda i: (i, 0, 0))],
        out_shape=[jax.ShapeDtypeStruct((mp, cop), jnp.bfloat16),
                   jax.ShapeDtypeStruct((mp // tm, 2, cop), jnp.float32)],
        compiler_params=_params(("parallel",)),
    )(xin, w2d)
    # Zero-padded rows contribute 0 to sum / sumsq; count uses the true m.
    scale, shift = _fold_bn(stats.sum(axis=0), m, gamma, beta, cop)
    return y_raw[:m], scale, shift


def _bn_relu_add_apply(y_raw2d, scale, shift, res2d, rscale, rshift):
    m, cop = y_raw2d.shape
    tm = _pick_tm(m)
    mp = _round_up(m, tm)
    if mp != m:
        y_raw2d = jnp.pad(y_raw2d, ((0, mp - m), (0, 0)))
        res2d = jnp.pad(res2d, ((0, mp - m), (0, 0)))
    out = pl.pallas_call(
        _bn_relu_add_kernel,
        grid=(mp // tm,),
        in_specs=[pl.BlockSpec((tm, cop), lambda i: (i, 0)),
                  pl.BlockSpec((1, cop), lambda i: (0, 0)),
                  pl.BlockSpec((1, cop), lambda i: (0, 0)),
                  pl.BlockSpec((tm, cop), lambda i: (i, 0)),
                  pl.BlockSpec((1, cop), lambda i: (0, 0)),
                  pl.BlockSpec((1, cop), lambda i: (0, 0))],
        out_specs=pl.BlockSpec((tm, cop), lambda i: (i, 0)),
        out_shape=jax.ShapeDtypeStruct((mp, cop), jnp.bfloat16),   # bf16 write: half traffic
        compiler_params=_params(("parallel",)),
    )(y_raw2d, scale, shift, res2d, rscale, rshift)
    return out[:m]


# ---------------------------------------------------------------------------
# DownBlock forward (PyTorch-style NCHW f32 in / out)
# ---------------------------------------------------------------------------
def down_block_forward(x_nchw, params, stride):
    x = jnp.transpose(x_nchw, (0, 2, 3, 1)).astype(jnp.float32)   # NCHW -> NHWC
    n, h, w, cin = x.shape
    w1, g1, b1 = params["conv1"]
    w2, g2, b2 = params["conv2"]
    w3, g3, b3 = params["conv3"]
    cout = w1.shape[0]
    cip = _round_up(cin, LANE)
    cop = _round_up(cout, LANE)

    x_pad = _pad_channels(x, cip)
    x_bf = x_pad.astype(jnp.bfloat16)

    # --- main path: conv1 (stride s) -> raw y + stats; BN1+ReLU fused into conv2;
    #     conv2 -> raw y + stats; BN2+ReLU fused into conv3; conv3 -> raw y + stats.
    y1, s1, t1 = _conv3x3_bn_stats(x_bf, _prep_w3x3(w1, cip, cop), stride, g1, b1)
    _, ho, wo, _ = y1.shape
    m = n * ho * wo

    y2, s2, t2 = _conv3x3_bn_stats(y1, _prep_w3x3(w2, cop, cop), 1, g2, b2,
                                   prev_scale=s1, prev_shift=t1)
    y3, s3, t3 = _conv3x3_bn_stats(y2, _prep_w3x3(w3, cop, cop), 1, g3, b3,
                                   prev_scale=s2, prev_shift=t2)

    # --- residual path (1x1 conv stride s + BN); conv bias cancels under BN and is skipped ---
    if params["down"] is not None:
        dw, _db, dg, dbt = params["down"]
        xs = x_bf[:, ::stride, ::stride, :].reshape(m, cip)
        res, rs, rt = _conv1x1_bn_stats(xs, _prep_w1x1(dw, cip, cop), dg, dbt)
    else:
        # identity residual (stride == 1 and cin == cout -> cip == cop)
        res = x_pad.reshape(m, cop)
        rs = jnp.ones((1, cop), jnp.float32)
        rt = jnp.zeros((1, cop), jnp.float32)

    out = _bn_relu_add_apply(y3.reshape(m, cop), s3, t3, res, rs, rt)
    out = out.reshape(n, ho, wo, cop)[:, :, :, :cout].astype(jnp.float32)
    return jnp.transpose(out, (0, 3, 1, 2))                       # back to NCHW


# ---------------------------------------------------------------------------
# Pure-JAX f32 reference (matches the PyTorch module, incl. the 1x1 conv bias)
# ---------------------------------------------------------------------------
def _conv_ref(x, w, stride, pad, bias=None):
    y = lax.conv_general_dilated(x, w, (stride, stride), [(pad, pad)] * 2,
                                 dimension_numbers=("NCHW", "OIHW", "NCHW"),
                                 precision=lax.Precision.HIGHEST)
    if bias is not None:
        y = y + bias[None, :, None, None]
    return y


def _bn_ref(y, gamma, beta):
    mean = y.mean(axis=(0, 2, 3), keepdims=True)
    var = ((y - mean) ** 2).mean(axis=(0, 2, 3), keepdims=True)
    return (y - mean) * lax.rsqrt(var + EPS) * gamma[None, :, None, None] + beta[None, :, None, None]


def down_block_ref(x, params, stride):
    if params["down"] is not None:
        dw, db, dg, dbt = params["down"]
        res = _bn_ref(_conv_ref(x, dw, stride, 0, db), dg, dbt)
    else:
        res = x
    w1, g1, b1 = params["conv1"]
    h = jnp.maximum(_bn_ref(_conv_ref(x, w1, stride, 1), g1, b1), 0.0)
    w2, g2, b2 = params["conv2"]
    h = jnp.maximum(_bn_ref(_conv_ref(h, w2, 1, 1), g2, b2), 0.0)
    w3, g3, b3 = params["conv3"]
    h = jnp.maximum(_bn_ref(_conv_ref(h, w3, 1, 1), g3, b3), 0.0)
    return h + res


# ---------------------------------------------------------------------------
def make_params(key, n_input, n_output, stride):
    ks = jax.random.split(key, 12)
    scale3 = 1.0 / jnp.sqrt(9.0 * n_input)
    scale3b = 1.0 / jnp.sqrt(9.0 * n_output)
    params = {
        "conv1": (jax.random.normal(ks[0], (n_output, n_input, 3, 3), jnp.float32) * scale3,
                  1.0 + 0.1 * jax.random.normal(ks[1], (n_output,), jnp.float32),
                  0.1 * jax.random.normal(ks[2], (n_output,), jnp.float32)),
        "conv2": (jax.random.normal(ks[3], (n_output, n_output, 3, 3), jnp.float32) * scale3b,
                  1.0 + 0.1 * jax.random.normal(ks[4], (n_output,), jnp.float32),
                  0.1 * jax.random.normal(ks[5], (n_output,), jnp.float32)),
        "conv3": (jax.random.normal(ks[6], (n_output, n_output, 3, 3), jnp.float32) * scale3b,
                  1.0 + 0.1 * jax.random.normal(ks[7], (n_output,), jnp.float32),
                  0.1 * jax.random.normal(ks[8], (n_output,), jnp.float32)),
        "down": None,
    }
    if stride != 1 or n_input != n_output:
        params["down"] = (
            jax.random.normal(ks[9], (n_output, n_input, 1, 1), jnp.float32) / jnp.sqrt(float(n_input)),
            0.1 * jax.random.normal(ks[10], (n_output,), jnp.float32),  # conv bias (bias=True in PyTorch)
            1.0 + 0.1 * jax.random.normal(ks[11], (n_output,), jnp.float32),
            jnp.zeros((n_output,), jnp.float32),
        )
    return params


if __name__ == "__main__":
    N, C_IN, C_OUT, H, W, STRIDE = 2, 4, 8, 16, 16, 2

    key = jax.random.PRNGKey(0)
    kx, kp = jax.random.split(key)
    x = jax.random.normal(kx, (N, C_IN, H, W), jnp.float32)
    params = make_params(kp, C_IN, C_OUT, STRIDE)

    fwd = jax.jit(down_block_forward, static_argnames=("stride",))
    out = jax.block_until_ready(fwd(x, params, stride=STRIDE))

    ref = jax.block_until_ready(down_block_ref(x, params, STRIDE))
    assert out.shape == ref.shape == (N, C_OUT, H // STRIDE, W // STRIDE), out.shape
    max_err = float(jnp.max(jnp.abs(out - ref)))
    # bf16 activations/weights on the MXU (f32 accumulation) + bf16 final store
    # -> looser tolerance than pure f32
    assert max_err < 1.5e-1, f"mismatch vs f32 reference: max abs err {max_err}"

    print("KERNEL_OK")
</pallas_src>

<mosaic_0001>
module attributes {stable_mosaic.version = 11 : i64} {
  func.func @_conv3x3_kernel(%arg0: i32, %arg1: memref<1x8x54x128xbf16, #tpu.memory_space<vmem>>, %arg2: memref<3x3x128x128xbf16, #tpu.memory_space<vmem>>, %arg3: memref<1x64x128xbf16, #tpu.memory_space<vmem>>, %arg4: memref<1x2x128xf32, #tpu.memory_space<vmem>>) attributes {dimension_semantics = [#tpu.dimension_semantics<parallel>], iteration_bounds = array<i64: 2>, scalar_prefetch = 0 : i64, scratch_operands = 0 : i64, tpu.core_type = #tpu.core_type<tc>, window_params = [{transform_indices = @transform_0, window_bounds = array<i64: 1, 8, 54, 128>}, {pipeline_mode = #tpu.pipeline_mode<synchronous>, transform_indices = @transform_1, window_bounds = array<i64: 3, 3, 128, 128>}, {transform_indices = @transform_2, window_bounds = array<i64: 1, 64, 128>}, {transform_indices = @transform_3, window_bounds = array<i64: 1, 2, 128>}]} {
    %c0 = arith.constant 0 : index
    %c0_0 = arith.constant 0 : index
    %c0_1 = arith.constant 0 : index
    %c0_2 = arith.constant 0 : index
    %0 = vector.load %arg1[%c0, %c0_0, %c0_1, %c0_2] : memref<1x8x54x128xbf16, #tpu.memory_space<vmem>>, vector<1x8x54x128xbf16>
    %1 = vector.shape_cast %0 : vector<1x8x54x128xbf16> to vector<8x54x128xbf16>
    %2 = vector.extract_strided_slice %1 {offsets = [0, 0, 0], sizes = [8, 8, 128], strides = [1, 1, 1]} : vector<8x54x128xbf16> to vector<8x8x128xbf16>
    %3 = vector.shape_cast %2 : vector<8x8x128xbf16> to vector<64x128xbf16>
    %c0_3 = arith.constant 0 : index
    %c0_4 = arith.constant 0 : index
    %c0_5 = arith.constant 0 : index
    %c0_6 = arith.constant 0 : index
    %4 = vector.load %arg2[%c0_3, %c0_4, %c0_5, %c0_6] : memref<3x3x128x128xbf16, #tpu.memory_space<vmem>>, vector<1x1x128x128xbf16>
    %5 = vector.shape_cast %4 : vector<1x1x128x128xbf16> to vector<128x128xbf16>
    %cst = arith.constant dense<0.000000e+00> : vector<64x128xf32>
    %6 = tpu.matmul %3, %5, %cst {dimension_numbers = #tpu.dot_dimension_numbers<[1], [0], [0], [1], [0, 0, 1, 1], [], []>} : vector<64x128xbf16>, vector<128x128xbf16>, vector<64x128xf32> -> vector<64x128xf32>
    %7 = vector.extract_strided_slice %1 {offsets = [0, 9, 0], sizes = [8, 8, 128], strides = [1, 1, 1]} : vector<8x54x128xbf16> to vector<8x8x128xbf16>
    %8 = vector.shape_cast %7 : vector<8x8x128xbf16> to vector<64x128xbf16>
    %c0_7 = arith.constant 0 : index
    %c1 = arith.constant 1 : index
    %c0_8 = arith.constant 0 : index
    %c0_9 = arith.constant 0 : index
    %9 = vector.load %arg2[%c0_7, %c1, %c0_8, %c0_9] : memref<3x3x128x128xbf16, #tpu.memory_space<vmem>>, vector<1x1x128x128xbf16>
    %10 = vector.shape_cast %9 : vector<1x1x128x128xbf16> to vector<128x128xbf16>
    %cst_10 = arith.constant dense<0.000000e+00> : vector<64x128xf32>
    %11 = tpu.matmul %8, %10, %cst_10 {dimension_numbers = #tpu.dot_dimension_numbers<[1], [0], [0], [1], [0, 0, 1, 1], [], []>} : vector<64x128xbf16>, vector<128x128xbf16>, vector<64x128xf32> -> vector<64x128xf32>
    %12 = arith.addf %6, %11 : vector<64x128xf32>
    %13 = vector.extract_strided_slice %1 {offsets = [0, 1, 0], sizes = [8, 8, 128], strides = [1, 1, 1]} : vector<8x54x128xbf16> to vector<8x8x128xbf16>
    %14 = vector.shape_cast %13 : vector<8x8x128xbf16> to vector<64x128xbf16>
    %c0_11 = arith.constant 0 : index
    %c2 = arith.constant 2 : index
    %c0_12 = arith.constant 0 : index
    %c0_13 = arith.constant 0 : index
    %15 = vector.load %arg2[%c0_11, %c2, %c0_12, %c0_13] : memref<3x3x128x128xbf16, #tpu.memory_space<vmem>>, vector<1x1x128x128xbf16>
    %16 = vector.shape_cast %15 : vector<1x1x128x128xbf16> to vector<128x128xbf16>
    %cst_14 = arith.constant dense<0.000000e+00> : vector<64x128xf32>
    %17 = tpu.matmul %14, %16, %cst_14 {dimension_numbers = #tpu.dot_dimension_numbers<[1], [0], [0], [1], [0, 0, 1, 1], [], []>} : vector<64x128xbf16>, vector<128x128xbf16>, vector<64x128xf32> -> vector<64x128xf32>
    %18 = arith.addf %12, %17 : vector<64x128xf32>
    %19 = vector.extract_strided_slice %1 {offsets = [0, 18, 0], sizes = [8, 8, 128], strides = [1, 1, 1]} : vector<8x54x128xbf16> to vector<8x8x128xbf16>
    %20 = vector.shape_cast %19 : vector<8x8x128xbf16> to vector<64x128xbf16>
    %c1_15 = arith.constant 1 : index
    %c0_16 = arith.constant 0 : index
    %c0_17 = arith.constant 0 : index
    %c0_18 = arith.constant 0 : index
    %21 = vector.load %arg2[%c1_15, %c0_16, %c0_17, %c0_18] : memref<3x3x128x128xbf16, #tpu.memory_space<vmem>>, vector<1x1x128x128xbf16>
    %22 = vector.shape_cast %21 : vector<1x1x128x128xbf16> to vector<128x128xbf16>
    %cst_19 = arith.constant dense<0.000000e+00> : vector<64x128xf32>
    %23 = tpu.matmul %20, %22, %cst_19 {dimension_numbers = #tpu.dot_dimension_numbers<[1], [0], [0], [1], [0, 0, 1, 1], [], []>} : vector<64x128xbf16>, vector<128x128xbf16>, vector<64x128xf32> -> vector<64x128xf32>
    %24 = arith.addf %18, %23 : vector<64x128xf32>
    %25 = vector.extract_strided_slice %1 {offsets = [0, 27, 0], sizes = [8, 8, 128], strides = [1, 1, 1]} : vector<8x54x128xbf16> to vector<8x8x128xbf16>
    %26 = vector.shape_cast %25 : vector<8x8x128xbf16> to vector<64x128xbf16>
    %c1_20 = arith.constant 1 : index
    %c1_21 = arith.constant 1 : index
    %c0_22 = arith.constant 0 : index
    %c0_23 = arith.constant 0 : index
    %27 = vector.load %arg2[%c1_20, %c1_21, %c0_22, %c0_23] : memref<3x3x128x128xbf16, #tpu.memory_space<vmem>>, vector<1x1x128x128xbf16>
    %28 = vector.shape_cast %27 : vector<1x1x128x128xbf16> to vector<128x128xbf16>
    %cst_24 = arith.constant dense<0.000000e+00> : vector<64x128xf32>
    %29 = tpu.matmul %26, %28, %cst_24 {dimension_numbers = #tpu.dot_dimension_numbers<[1], [0], [0], [1], [0, 0, 1, 1], [], []>} : vector<64x128xbf16>, vector<128x128xbf16>, vector<64x128xf32> -> vector<64x128xf32>
    %30 = arith.addf %24, %29 : vector<64x128xf32>
    %31 = vector.extract_strided_slice %1 {offsets = [0, 19, 0], sizes = [8, 8, 128], strides = [1, 1, 1]} : vector<8x54x128xbf16> to vector<8x8x128xbf16>
    %32 = vector.shape_cast %31 : vector<8x8x128xbf16> to vector<64x128xbf16>
    %c1_25 = arith.constant 1 : index
    %c2_26 = arith.constant 2 : index
    %c0_27 = arith.constant 0 : index
    %c0_28 = arith.constant 0 : index
    %33 = vector.load %arg2[%c1_25, %c2_26, %c0_27, %c0_28] : memref<3x3x128x128xbf16, #tpu.memory_space<vmem>>, vector<1x1x128x128xbf16>
    %34 = vector.shape_cast %33 : vector<1x1x128x128xbf16> to vector<128x128xbf16>
    %cst_29 = arith.constant dense<0.000000e+00> : vector<64x128xf32>
    %35 = tpu.matmul %32, %34, %cst_29 {dimension_numbers = #tpu.dot_dimension_numbers<[1], [0], [0], [1], [0, 0, 1, 1], [], []>} : vector<64x128xbf16>, vector<128x128xbf16>, vector<64x128xf32> -> vector<64x128xf32>
    %36 = arith.addf %30, %35 : vector<64x128xf32>
    %37 = vector.extract_strided_slice %1 {offsets = [0, 36, 0], sizes = [8, 8, 128], strides = [1, 1, 1]} : vector<8x54x128xbf16> to vector<8x8x128xbf16>
    %38 = vector.shape_cast %37 : vector<8x8x128xbf16> to vector<64x128xbf16>
    %c2_30 = arith.constant 2 : index
    %c0_31 = arith.constant 0 : index
    %c0_32 = arith.constant 0 : index
    %c0_33 = arith.constant 0 : index
    %39 = vector.load %arg2[%c2_30, %c0_31, %c0_32, %c0_33] : memref<3x3x128x128xbf16, #tpu.memory_space<vmem>>, vector<1x1x128x128xbf16>
    %40 = vector.shape_cast %39 : vector<1x1x128x128xbf16> to vector<128x128xbf16>
    %cst_34 = arith.constant dense<0.000000e+00> : vector<64x128xf32>
    %41 = tpu.matmul %38, %40, %cst_34 {dimension_numbers = #tpu.dot_dimension_numbers<[1], [0], [0], [1], [0, 0, 1, 1], [], []>} : vector<64x128xbf16>, vector<128x128xbf16>, vector<64x128xf32> -> vector<64x128xf32>
    %42 = arith.addf %36, %41 : vector<64x128xf32>
    %43 = vector.extract_strided_slice %1 {offsets = [0, 45, 0], sizes = [8, 8, 128], strides = [1, 1, 1]} : vector<8x54x128xbf16> to vector<8x8x128xbf16>
    %44 = vector.shape_cast %43 : vector<8x8x128xbf16> to vector<64x128xbf16>
    %c2_35 = arith.constant 2 : index
    %c1_36 = arith.constant 1 : index
    %c0_37 = arith.constant 0 : index
    %c0_38 = arith.constant 0 : index
    %45 = vector.load %arg2[%c2_35, %c1_36, %c0_37, %c0_38] : memref<3x3x128x128xbf16, #tpu.memory_space<vmem>>, vector<1x1x128x128xbf16>
    %46 = vector.shape_cast %45 : vector<1x1x128x128xbf16> to vector<128x128xbf16>
    %cst_39 = arith.constant dense<0.000000e+00> : vector<64x128xf32>
    %47 = tpu.matmul %44, %46, %cst_39 {dimension_numbers = #tpu.dot_dimension_numbers<[1], [0], [0], [1], [0, 0, 1, 1], [], []>} : vector<64x128xbf16>, vector<128x128xbf16>, vector<64x128xf32> -> vector<64x128xf32>
    %48 = arith.addf %42, %47 : vector<64x128xf32>
    %49 = vector.extract_strided_slice %1 {offsets = [0, 37, 0], sizes = [8, 8, 128], strides = [1, 1, 1]} : vector<8x54x128xbf16> to vector<8x8x128xbf16>
    %50 = vector.shape_cast %49 : vector<8x8x128xbf16> to vector<64x128xbf16>
    %c2_40 = arith.constant 2 : index
    %c2_41 = arith.constant 2 : index
    %c0_42 = arith.constant 0 : index
    %c0_43 = arith.constant 0 : index
    %51 = vector.load %arg2[%c2_40, %c2_41, %c0_42, %c0_43] : memref<3x3x128x128xbf16, #tpu.memory_space<vmem>>, vector<1x1x128x128xbf16>
    %52 = vector.shape_cast %51 : vector<1x1x128x128xbf16> to vector<128x128xbf16>
    %cst_44 = arith.constant dense<0.000000e+00> : vector<64x128xf32>
    %53 = tpu.matmul %50, %52, %cst_44 {dimension_numbers = #tpu.dot_dimension_numbers<[1], [0], [0], [1], [0, 0, 1, 1], [], []>} : vector<64x128xbf16>, vector<128x128xbf16>, vector<64x128xf32> -> vector<64x128xf32>
    %54 = arith.addf %48, %53 : vector<64x128xf32>
    %cst_45 = arith.constant dense<0.000000e+00> : vector<128xf32>
    %55 = vector.multi_reduction <add>, %54, %cst_45 [0] : vector<64x128xf32> to vector<128xf32>
    %56 = vector.shape_cast %55 : vector<128xf32> to vector<1x128xf32>
    %c0_46 = arith.constant 0 : index
    %c0_47 = arith.constant 0 : index
    %c0_48 = arith.constant 0 : index
    %57 = vector.load %arg4[%c0_46, %c0_47, %c0_48] : memref<1x2x128xf32, #tpu.memory_space<vmem>>, vector<1x1x128xf32>
    %58 = vector.shape_cast %57 : vector<1x1x128xf32> to vector<1x128xf32>
    %59 = vector.shape_cast %56 : vector<1x128xf32> to vector<1x1x128xf32>
    tpu.vector_store %arg4[%c0_46, %c0_47, %c0_48], %59 {strides = array<i32>} : memref<1x2x128xf32, #tpu.memory_space<vmem>>, vector<1x1x128xf32>,
    %60 = arith.mulf %54, %54 : vector<64x128xf32>
    %cst_49 = arith.constant dense<0.000000e+00> : vector<128xf32>
    %61 = vector.multi_reduction <add>, %60, %cst_49 [0] : vector<64x128xf32> to vector<128xf32>
    %62 = vector.shape_cast %61 : vector<128xf32> to vector<1x128xf32>
    %c0_50 = arith.constant 0 : index
    %c1_51 = arith.constant 1 : index
    %c0_52 = arith.constant 0 : index
    %63 = vector.load %arg4[%c0_50, %c1_51, %c0_52] : memref<1x2x128xf32, #tpu.memory_space<vmem>>, vector<1x1x128xf32>
    %64 = vector.shape_cast %63 : vector<1x1x128xf32> to vector<1x128xf32>
    %65 = vector.shape_cast %62 : vector<1x128xf32> to vector<1x1x128xf32>
    tpu.vector_store %arg4[%c0_50, %c1_51, %c0_52], %65 {strides = array<i32>} : memref<1x2x128xf32, #tpu.memory_space<vmem>>, vector<1x1x128xf32>,
    %66 = arith.truncf %54 : vector<64x128xf32> to vector<64x128xbf16>
    %c0_53 = arith.constant 0 : index
    %c0_54 = arith.constant 0 : index
    %c0_55 = arith.constant 0 : index
    %67 = vector.load %arg3[%c0_53, %c0_54, %c0_55] : memref<1x64x128xbf16, #tpu.memory_space<vmem>>, vector<1x64x128xbf16>
    %68 = vector.shape_cast %67 : vector<1x64x128xbf16> to vector<64x128xbf16>
    %69 = vector.shape_cast %66 : vector<64x128xbf16> to vector<1x64x128xbf16>
    tpu.vector_store %arg3[%c0_53, %c0_54, %c0_55], %69 {strides = array<i32>} : memref<1x64x128xbf16, #tpu.memory_space<vmem>>, vector<1x64x128xbf16>,
    return
  }
  func.func @transform_0(%arg0: i32) -> (i32, i32, i32, i32) {
    %c0_i32 = arith.constant 0 : i32
    %c0_i32_0 = arith.constant 0 : i32
    %c0_i32_1 = arith.constant 0 : i32
    %c0_i32_2 = arith.constant 0 : i32
    return %arg0, %c0_i32, %c0_i32_0, %c0_i32_1 : i32, i32, i32, i32
  }
  func.func @transform_1(%arg0: i32) -> (i32, i32, i32, i32) {
    %c0_i32 = arith.constant 0 : i32
    %c0_i32_0 = arith.constant 0 : i32
    %c0_i32_1 = arith.constant 0 : i32
    %c0_i32_2 = arith.constant 0 : i32
    %c0_i32_3 = arith.constant 0 : i32
    return %c0_i32, %c0_i32_0, %c0_i32_1, %c0_i32_2 : i32, i32, i32, i32
  }
  func.func @transform_2(%arg0: i32) -> (i32, i32, i32) {
    %c0_i32 = arith.constant 0 : i32
    %c0_i32_0 = arith.constant 0 : i32
    %c0_i32_1 = arith.constant 0 : i32
    return %arg0, %c0_i32, %c0_i32_0 : i32, i32, i32
  }
  func.func @transform_3(%arg0: i32) -> (i32, i32, i32) {
    %c0_i32 = arith.constant 0 : i32
    %c0_i32_0 = arith.constant 0 : i32
    %c0_i32_1 = arith.constant 0 : i32
    return %arg0, %c0_i32, %c0_i32_0 : i32, i32, i32
  }
}

module attributes {stable_mosaic.version = 11 : i64} {
  func.func @_conv3x3_kernel(%arg0: i32, %arg1: memref<1x10x10x128xbf16, #tpu.memory_space<vmem>>, %arg2: memref<1x128xf32, #tpu.memory_space<vmem>>, %arg3: memref<1x128xf32, #tpu.memory_space<vmem>>, %arg4: memref<3x3x128x128xbf16, #tpu.memory_space<vmem>>, %arg5: memref<1x64x128xbf16, #tpu.memory_space<vmem>>, %arg6: memref<1x2x128xf32, #tpu.memory_space<vmem>>) attributes {dimension_semantics = [#tpu.dimension_semantics<parallel>], iteration_bounds = array<i64: 2>, scalar_prefetch = 0 : i64, scratch_operands = 0 : i64, tpu.core_type = #tpu.core_type<tc>, window_params = [{transform_indices = @transform_0, window_bounds = array<i64: 1, 10, 10, 128>}, {pipeline_mode = #tpu.pipeline_mode<synchronous>, transform_indices = @transform_1, window_bounds = array<i64: 1, 128>}, {pipeline_mode = #tpu.pipeline_mode<synchronous>, transform_indices = @transform_2, window_bounds = array<i64: 1, 128>}, {pipeline_mode = #tpu.pipeline_mode<synchronous>, transform_indices = @transform_3, window_bounds = array<i64: 3, 3, 128, 128>}, {transform_indices = @transform_4, window_bounds = array<i64: 1, 64, 128>}, {transform_indices = @transform_5, window_bounds = array<i64: 1, 2, 128>}]} {
    %c0 = arith.constant 0 : index
    %c0_0 = arith.constant 0 : index
    %c0_1 = arith.constant 0 : index
    %c0_2 = arith.constant 0 : index
    %0 = vector.load %arg1[%c0, %c0_0, %c0_1, %c0_2] : memref<1x10x10x128xbf16, #tpu.memory_space<vmem>>, vector<1x10x10x128xbf16>
    %1 = vector.shape_cast %0 : vector<1x10x10x128xbf16> to vector<10x10x128xbf16>
    %2 = arith.extf %1 : vector<10x10x128xbf16> to vector<10x10x128xf32>
    %c1_i32 = arith.constant 1 : i32
    %c0_i32 = arith.constant 0 : i32
    %3 = arith.cmpi eq, %c1_i32, %c0_i32 : i32
    %c1_i32_3 = arith.constant 1 : i32
    %4 = arith.select %3, %c1_i32_3, %c1_i32 : i32
    %5 = arith.remsi %arg0, %4 : i32
    %c0_i32_4 = arith.constant 0 : i32
    %6 = arith.cmpi ne, %5, %c0_i32_4 : i32
    %c0_i32_5 = arith.constant 0 : i32
    %7 = arith.cmpi slt, %5, %c0_i32_5 : i32
    %c0_i32_6 = arith.constant 0 : i32
    %8 = arith.cmpi slt, %4, %c0_i32_6 : i32
    %9 = arith.xori %7, %8 : i1
    %10 = arith.andi %9, %6 : i1
    %11 = arith.addi %5, %4 : i32
    %12 = arith.select %10, %11, %5 : i32
    %13 = tpu.iota {dimensions = array<i32: 0>} : vector<10x10x128xi32>
    %14 = tpu.iota {dimensions = array<i32: 1>} : vector<10x10x128xi32>
    %c1_i32_7 = arith.constant 1 : i32
    %15 = vector.broadcast %c1_i32_7 : i32 to vector<10x10x128xi32>
    %16 = arith.cmpi sge, %14, %15 : vector<10x10x128xi32>
    %c8_i32 = arith.constant 8 : i32
    %17 = vector.broadcast %c8_i32 : i32 to vector<10x10x128xi32>
    %18 = arith.cmpi sle, %14, %17 : vector<10x10x128xi32>
    %19 = arith.andi %16, %18 : vector<10x10x128xi1>
    %c1_i32_8 = arith.constant 1 : i32
    %20 = vector.broadcast %c1_i32_8 : i32 to vector<10x10x128xi32>
    %21 = arith.cmpi sge, %13, %20 : vector<10x10x128xi32>
    %c0_i32_9 = arith.constant 0 : i32
    %22 = arith.cmpi ne, %12, %c0_i32_9 : i32
    %23 = vector.broadcast %22 : i1 to vector<10x10x128xi1>
    %24 = arith.ori %21, %23 : vector<10x10x128xi1>
    %25 = arith.andi %19, %24 : vector<10x10x128xi1>
    %c8_i32_10 = arith.constant 8 : i32
    %26 = vector.broadcast %c8_i32_10 : i32 to vector<10x10x128xi32>
    %27 = arith.cmpi sle, %13, %26 : vector<10x10x128xi32>
    %c0_i32_11 = arith.constant 0 : i32
    %28 = arith.cmpi ne, %12, %c0_i32_11 : i32
    %29 = vector.broadcast %28 : i1 to vector<10x10x128xi1>
    %30 = arith.ori %27, %29 : vector<10x10x128xi1>
    %31 = arith.andi %25, %30 : vector<10x10x128xi1>
    %c0_12 = arith.constant 0 : index
    %c0_13 = arith.constant 0 : index
    %32 = vector.load %arg2[%c0_12, %c0_13] : memref<1x128xf32, #tpu.memory_space<vmem>>, vector<1x128xf32>
    %33 = vector.shape_cast %32 : vector<1x128xf32> to vector<1x1x128xf32>
    %34 = vector.broadcast %33 : vector<1x1x128xf32> to vector<10x10x128xf32>
    %35 = arith.mulf %2, %34 : vector<10x10x128xf32>
    %c0_14 = arith.constant 0 : index
    %c0_15 = arith.constant 0 : index
    %36 = vector.load %arg3[%c0_14, %c0_15] : memref<1x128xf32, #tpu.memory_space<vmem>>, vector<1x128xf32>
    %37 = vector.shape_cast %36 : vector<1x128xf32> to vector<1x1x128xf32>
    %38 = vector.broadcast %37 : vector<1x1x128xf32> to vector<10x10x128xf32>
    %39 = arith.addf %35, %38 : vector<10x10x128xf32>
    %cst = arith.constant 0.000000e+00 : f32
    %40 = vector.broadcast %cst : f32 to vector<10x10x128xf32>
    %41 = arith.maximumf %39, %40 : vector<10x10x128xf32>
    %cst_16 = arith.constant 0.000000e+00 : f32
    %42 = vector.broadcast %cst_16 : f32 to vector<10x10x128xf32>
    %43 = arith.select %31, %41, %42 : vector<10x10x128xi1>, vector<10x10x128xf32>
    %44 = arith.truncf %43 : vector<10x10x128xf32> to vector<10x10x128xbf16>
    %45 = vector.extract_strided_slice %44 {offsets = [0, 0, 0], sizes = [8, 8, 128], strides = [1, 1, 1]} : vector<10x10x128xbf16> to vector<8x8x128xbf16>
    %46 = vector.shape_cast %45 : vector<8x8x128xbf16> to vector<64x128xbf16>
    %c0_17 = arith.constant 0 : index
    %c0_18 = arith.constant 0 : index
    %c0_19 = arith.constant 0 : index
    %c0_20 = arith.constant 0 : index
    %47 = vector.load %arg4[%c0_17, %c0_18, %c0_19, %c0_20] : memref<3x3x128x128xbf16, #tpu.memory_space<vmem>>, vector<1x1x128x128xbf16>
    %48 = vector.shape_cast %47 : vector<1x1x128x128xbf16> to vector<128x128xbf16>
    %cst_21 = arith.constant dense<0.000000e+00> : vector<64x128xf32>
    %49 = tpu.matmul %46, %48, %cst_21 {dimension_numbers = #tpu.dot_dimension_numbers<[1], [0], [0], [1], [0, 0, 1, 1], [], []>} : vector<64x128xbf16>, vector<128x128xbf16>, vector<64x128xf32> -> vector<64x128xf32>
    %50 = vector.extract_strided_slice %44 {offsets = [0, 1, 0], sizes = [8, 8, 128], strides = [1, 1, 1]} : vector<10x10x128xbf16> to vector<8x8x128xbf16>
    %51 = vector.shape_cast %50 : vector<8x8x128xbf16> to vector<64x128xbf16>
    %c0_22 = arith.constant 0 : index
    %c1 = arith.constant 1 : index
    %c0_23 = arith.constant 0 : index
    %c0_24 = arith.constant 0 : index
    %52 = vector.load %arg4[%c0_22, %c1, %c0_23, %c0_24] : memref<3x3x128x128xbf16, #tpu.memory_space<vmem>>, vector<1x1x128x128xbf16>
    %53 = vector.shape_cast %52 : vector<1x1x128x128xbf16> to vector<128x128xbf16>
    %cst_25 = arith.constant dense<0.000000e+00> : vector<64x128xf32>
    %54 = tpu.matmul %51, %53, %cst_25 {dimension_numbers = #tpu.dot_dimension_numbers<[1], [0], [0], [1], [0, 0, 1, 1], [], []>} : vector<64x128xbf16>, vector<128x128xbf16>, vector<64x128xf32> -> vector<64x128xf32>
    %55 = arith.addf %49, %54 : vector<64x128xf32>
    %56 = vector.extract_strided_slice %44 {offsets = [0, 2, 0], sizes = [8, 8, 128], strides = [1, 1, 1]} : vector<10x10x128xbf16> to vector<8x8x128xbf16>
    %57 = vector.shape_cast %56 : vector<8x8x128xbf16> to vector<64x128xbf16>
    %c0_26 = arith.constant 0 : index
    %c2 = arith.constant 2 : index
    %c0_27 = arith.constant 0 : index
    %c0_28 = arith.constant 0 : index
    %58 = vector.load %arg4[%c0_26, %c2, %c0_27, %c0_28] : memref<3x3x128x128xbf16, #tpu.memory_space<vmem>>, vector<1x1x128x128xbf16>
    %59 = vector.shape_cast %58 : vector<1x1x128x128xbf16> to vector<128x128xbf16>
    %cst_29 = arith.constant dense<0.000000e+00> : vector<64x128xf32>
    %60 = tpu.matmul %57, %59, %cst_29 {dimension_numbers = #tpu.dot_dimension_numbers<[1], [0], [0], [1], [0, 0, 1, 1], [], []>} : vector<64x128xbf16>, vector<128x128xbf16>, vector<64x128xf32> -> vector<64x128xf32>
    %61 = arith.addf %55, %60 : vector<64x128xf32>
    %62 = vector.extract_strided_slice %44 {offsets = [1, 0, 0], sizes = [8, 8, 128], strides = [1, 1, 1]} : vector<10x10x128xbf16> to vector<8x8x128xbf16>
    %63 = vector.shape_cast %62 : vector<8x8x128xbf16> to vector<64x128xbf16>
    %c1_30 = arith.constant 1 : index
    %c0_31 = arith.constant 0 : index
    %c0_32 = arith.constant 0 : index
    %c0_33 = arith.constant 0 : index
    %64 = vector.load %arg4[%c1_30, %c0_31, %c0_32, %c0_33] : memref<3x3x128x128xbf16, #tpu.memory_space<vmem>>, vector<1x1x128x128xbf16>
    %65 = vector.shape_cast %64 : vector<1x1x128x128xbf16> to vector<128x128xbf16>
    %cst_34 = arith.constant dense<0.000000e+00> : vector<64x128xf32>
    %66 = tpu.matmul %63, %65, %cst_34 {dimension_numbers = #tpu.dot_dimension_numbers<[1], [0], [0], [1], [0, 0, 1, 1], [], []>} : vector<64x128xbf16>, vector<128x128xbf16>, vector<64x128xf32> -> vector<64x128xf32>
    %67 = arith.addf %61, %66 : vector<64x128xf32>
    %68 = vector.extract_strided_slice %44 {offsets = [1, 1, 0], sizes = [8, 8, 128], strides = [1, 1, 1]} : vector<10x10x128xbf16> to vector<8x8x128xbf16>
    %69 = vector.shape_cast %68 : vector<8x8x128xbf16> to vector<64x128xbf16>
    %c1_35 = arith.constant 1 : index
    %c1_36 = arith.constant 1 : index
    %c0_37 = arith.constant 0 : index
    %c0_38 = arith.constant 0 : index
    %70 = vector.load %arg4[%c1_35, %c1_36, %c0_37, %c0_38] : memref<3x3x128x128xbf16, #tpu.memory_space<vmem>>, vector<1x1x128x128xbf16>
    %71 = vector.shape_cast %70 : vector<1x1x128x128xbf16> to vector<128x128xbf16>
    %cst_39 = arith.constant dense<0.000000e+00> : vector<64x128xf32>
    %72 = tpu.matmul %69, %71, %cst_39 {dimension_numbers = #tpu.dot_dimension_numbers<[1], [0], [0], [1], [0, 0, 1, 1], [], []>} : vector<64x128xbf16>, vector<128x128xbf16>, vector<64x128xf32> -> vector<64x128xf32>
    %73 = arith.addf %67, %72 : vector<64x128xf32>
    %74 = vector.extract_strided_slice %44 {offsets = [1, 2, 0], sizes = [8, 8, 128], strides = [1, 1, 1]} : vector<10x10x128xbf16> to vector<8x8x128xbf16>
    %75 = vector.shape_cast %74 : vector<8x8x128xbf16> to vector<64x128xbf16>
    %c1_40 = arith.constant 1 : index
    %c2_41 = arith.constant 2 : index
    %c0_42 = arith.constant 0 : index
    %c0_43 = arith.constant 0 : index
    %76 = vector.load %arg4[%c1_40, %c2_41, %c0_42, %c0_43] : memref<3x3x128x128xbf16, #tpu.memory_space<vmem>>, vector<1x1x128x128xbf16>
    %77 = vector.shape_cast %76 : vector<1x1x128x128xbf16> to vector<128x128xbf16>
    %cst_44 = arith.constant dense<0.000000e+00> : vector<64x128xf32>
    %78 = tpu.matmul %75, %77, %cst_44 {dimension_numbers = #tpu.dot_dimension_numbers<[1], [0], [0], [1], [0, 0, 1, 1], [], []>} : vector<64x128xbf16>, vector<128x128xbf16>, vector<64x128xf32> -> vector<64x128xf32>
    %79 = arith.addf %73, %78 : vector<64x128xf32>
    %80 = vector.extract_strided_slice %44 {offsets = [2, 0, 0], sizes = [8, 8, 128], strides = [1, 1, 1]} : vector<10x10x128xbf16> to vector<8x8x128xbf16>
    %81 = vector.shape_cast %80 : vector<8x8x128xbf16> to vector<64x128xbf16>
    %c2_45 = arith.constant 2 : index
    %c0_46 = arith.constant 0 : index
    %c0_47 = arith.constant 0 : index
    %c0_48 = arith.constant 0 : index
    %82 = vector.load %arg4[%c2_45, %c0_46, %c0_47, %c0_48] : memref<3x3x128x128xbf16, #tpu.memory_space<vmem>>, vector<1x1x128x128xbf16>
    %83 = vector.shape_cast %82 : vector<1x1x128x128xbf16> to vector<128x128xbf16>
    %cst_49 = arith.constant dense<0.000000e+00> : vector<64x128xf32>
    %84 = tpu.matmul %81, %83, %cst_49 {dimension_numbers = #tpu.dot_dimension_numbers<[1], [0], [0], [1], [0, 0, 1, 1], [], []>} : vector<64x128xbf16>, vector<128x128xbf16>, vector<64x128xf32> -> vector<64x128xf32>
    %85 = arith.addf %79, %84 : vector<64x128xf32>
    %86 = vector.extract_strided_slice %44 {offsets = [2, 1, 0], sizes = [8, 8, 128], strides = [1, 1, 1]} : vector<10x10x128xbf16> to vector<8x8x128xbf16>
    %87 = vector.shape_cast %86 : vector<8x8x128xbf16> to vector<64x128xbf16>
    %c2_50 = arith.constant 2 : index
    %c1_51 = arith.constant 1 : index
    %c0_52 = arith.constant 0 : index
    %c0_53 = arith.constant 0 : index
    %88 = vector.load %arg4[%c2_50, %c1_51, %c0_52, %c0_53] : memref<3x3x128x128xbf16, #tpu.memory_space<vmem>>, vector<1x1x128x128xbf16>
    %89 = vector.shape_cast %88 : vector<1x1x128x128xbf16> to vector<128x128xbf16>
    %cst_54 = arith.constant dense<0.000000e+00> : vector<64x128xf32>
    %90 = tpu.matmul %87, %89, %cst_54 {dimension_numbers = #tpu.dot_dimension_numbers<[1], [0], [0], [1], [0, 0, 1, 1], [], []>} : vector<64x128xbf16>, vector<128x128xbf16>, vector<64x128xf32> -> vector<64x128xf32>
    %91 = arith.addf %85, %90 : vector<64x128xf32>
    %92 = vector.extract_strided_slice %44 {offsets = [2, 2, 0], sizes = [8, 8, 128], strides = [1, 1, 1]} : vector<10x10x128xbf16> to vector<8x8x128xbf16>
    %93 = vector.shape_cast %92 : vector<8x8x128xbf16> to vector<64x128xbf16>
    %c2_55 = arith.constant 2 : index
    %c2_56 = arith.constant 2 : index
    %c0_57 = arith.constant 0 : index
    %c0_58 = arith.constant 0 : index
    %94 = vector.load %arg4[%c2_55, %c2_56, %c0_57, %c0_58] : memref<3x3x128x128xbf16, #tpu.memory_space<vmem>>, vector<1x1x128x128xbf16>
    %95 = vector.shape_cast %94 : vector<1x1x128x128xbf16> to vector<128x128xbf16>
    %cst_59 = arith.constant dense<0.000000e+00> : vector<64x128xf32>
    %96 = tpu.matmul %93, %95, %cst_59 {dimension_numbers = #tpu.dot_dimension_numbers<[1], [0], [0], [1], [0, 0, 1, 1], [], []>} : vector<64x128xbf16>, vector<128x128xbf16>, vector<64x128xf32> -> vector<64x128xf32>
    %97 = arith.addf %91, %96 : vector<64x128xf32>
    %cst_60 = arith.constant dense<0.000000e+00> : vector<128xf32>
    %98 = vector.multi_reduction <add>, %97, %cst_60 [0] : vector<64x128xf32> to vector<128xf32>
    %99 = vector.shape_cast %98 : vector<128xf32> to vector<1x128xf32>
    %c0_61 = arith.constant 0 : index
    %c0_62 = arith.constant 0 : index
    %c0_63 = arith.constant 0 : index
    %100 = vector.load %arg6[%c0_61, %c0_62, %c0_63] : memref<1x2x128xf32, #tpu.memory_space<vmem>>, vector<1x1x128xf32>
    %101 = vector.shape_cast %100 : vector<1x1x128xf32> to vector<1x128xf32>
    %102 = vector.shape_cast %99 : vector<1x128xf32> to vector<1x1x128xf32>
    tpu.vector_store %arg6[%c0_61, %c0_62, %c0_63], %102 {strides = array<i32>} : memref<1x2x128xf32, #tpu.memory_space<vmem>>, vector<1x1x128xf32>,
    %103 = arith.mulf %97, %97 : vector<64x128xf32>
    %cst_64 = arith.constant dense<0.000000e+00> : vector<128xf32>
    %104 = vector.multi_reduction <add>, %103, %cst_64 [0] : vector<64x128xf32> to vector<128xf32>
    %105 = vector.shape_cast %104 : vector<128xf32> to vector<1x128xf32>
    %c0_65 = arith.constant 0 : index
    %c1_66 = arith.constant 1 : index
    %c0_67 = arith.constant 0 : index
    %106 = vector.load %arg6[%c0_65, %c1_66, %c0_67] : memref<1x2x128xf32, #tpu.memory_space<vmem>>, vector<1x1x128xf32>
    %107 = vector.shape_cast %106 : vector<1x1x128xf32> to vector<1x128xf32>
    %108 = vector.shape_cast %105 : vector<1x128xf32> to vector<1x1x128xf32>
    tpu.vector_store %arg6[%c0_65, %c1_66, %c0_67], %108 {strides = array<i32>} : memref<1x2x128xf32, #tpu.memory_space<vmem>>, vector<1x1x128xf32>,
    %109 = arith.truncf %97 : vector<64x128xf32> to vector<64x128xbf16>
    %c0_68 = arith.constant 0 : index
    %c0_69 = arith.constant 0 : index
    %c0_70 = arith.constant 0 : index
    %110 = vector.load %arg5[%c0_68, %c0_69, %c0_70] : memref<1x64x128xbf16, #tpu.memory_space<vmem>>, vector<1x64x128xbf16>
    %111 = vector.shape_cast %110 : vector<1x64x128xbf16> to vector<64x128xbf16>
    %112 = vector.shape_cast %109 : vector<64x128xbf16> to vector<1x64x128xbf16>
    tpu.vector_store %arg5[%c0_68, %c0_69, %c0_70], %112 {strides = array<i32>} : memref<1x64x128xbf16, #tpu.memory_space<vmem>>, vector<1x64x128xbf16>,
    return
  }
  func.func @transform_0(%arg0: i32) -> (i32, i32, i32, i32) {
    %c0_i32 = arith.constant 0 : i32
    %c0_i32_0 = arith.constant 0 : i32
    %c0_i32_1 = arith.constant 0 : i32
    %c0_i32_2 = arith.constant 0 : i32
    return %arg0, %c0_i32, %c0_i32_0, %c0_i32_1 : i32, i32, i32, i32
  }
  func.func @transform_1(%arg0: i32) -> (i32, i32) {
    %c0_i32 = arith.constant 0 : i32
    %c0_i32_0 = arith.constant 0 : i32
    %c0_i32_1 = arith.constant 0 : i32
    return %c0_i32, %c0_i32_0 : i32, i32
  }
  func.func @transform_2(%arg0: i32) -> (i32, i32) {
    %c0_i32 = arith.constant 0 : i32
    %c0_i32_0 = arith.constant 0 : i32
    %c0_i32_1 = arith.constant 0 : i32
    return %c0_i32, %c0_i32_0 : i32, i32
  }
  func.func @transform_3(%arg0: i32) -> (i32, i32, i32, i32) {
    %c0_i32 = arith.constant 0 : i32
    %c0_i32_0 = arith.constant 0 : i32
    %c0_i32_1 = arith.constant 0 : i32
    %c0_i32_2 = arith.constant 0 : i32
    %c0_i32_3 = arith.constant 0 : i32
    return %c0_i32, %c0_i32_0, %c0_i32_1, %c0_i32_2 : i32, i32, i32, i32
  }
  func.func @transform_4(%arg0: i32) -> (i32, i32, i32) {
    %c0_i32 = arith.constant 0 : i32
    %c0_i32_0 = arith.constant 0 : i32
    %c0_i32_1 = arith.constant 0 : i32
    return %arg0, %c0_i32, %c0_i32_0 : i32, i32, i32
  }
  func.func @transform_5(%arg0: i32) -> (i32, i32, i32) {
    %c0_i32 = arith.constant 0 : i32
    %c0_i32_0 = arith.constant 0 : i32
    %c0_i32_1 = arith.constant 0 : i32
    return %arg0, %c0_i32, %c0_i32_0 : i32, i32, i32
  }
}

module attributes {stable_mosaic.version = 11 : i64} {
  func.func @_matmul_stats_kernel(%arg0: i32, %arg1: memref<128x128xbf16, #tpu.memory_space<vmem>>, %arg2: memref<128x128xbf16, #tpu.memory_space<vmem>>, %arg3: memref<128x128xbf16, #tpu.memory_space<vmem>>, %arg4: memref<1x2x128xf32, #tpu.memory_space<vmem>>) attributes {dimension_semantics = [#tpu.dimension_semantics<parallel>], iteration_bounds = array<i64: 1>, scalar_prefetch = 0 : i64, scratch_operands = 0 : i64, tpu.core_type = #tpu.core_type<tc>, window_params = [{transform_indices = @transform_0, window_bounds = array<i64: 128, 128>}, {pipeline_mode = #tpu.pipeline_mode<synchronous>, transform_indices = @transform_1, window_bounds = array<i64: 128, 128>}, {transform_indices = @transform_2, window_bounds = array<i64: 128, 128>}, {transform_indices = @transform_3, window_bounds = array<i64: 1, 2, 128>}]} {
    %c0 = arith.constant 0 : index
    %c0_0 = arith.constant 0 : index
    %0 = vector.load %arg1[%c0, %c0_0] : memref<128x128xbf16, #tpu.memory_space<vmem>>, vector<128x128xbf16>
    %c0_1 = arith.constant 0 : index
    %c0_2 = arith.constant 0 : index
    %1 = vector.load %arg2[%c0_1, %c0_2] : memref<128x128xbf16, #tpu.memory_space<vmem>>, vector<128x128xbf16>
    %cst = arith.constant dense<0.000000e+00> : vector<128x128xf32>
    %2 = tpu.matmul %0, %1, %cst {dimension_numbers = #tpu.dot_dimension_numbers<[1], [0], [0], [1], [0, 0, 1, 1], [], []>} : vector<128x128xbf16>, vector<128x128xbf16>, vector<128x128xf32> -> vector<128x128xf32>
    %cst_3 = arith.constant dense<0.000000e+00> : vector<128xf32>
    %3 = vector.multi_reduction <add>, %2, %cst_3 [0] : vector<128x128xf32> to vector<128xf32>
    %4 = vector.shape_cast %3 : vector<128xf32> to vector<1x128xf32>
    %c0_4 = arith.constant 0 : index
    %c0_5 = arith.constant 0 : index
    %c0_6 = arith.constant 0 : index
    %5 = vector.load %arg4[%c0_4, %c0_5, %c0_6] : memref<1x2x128xf32, #tpu.memory_space<vmem>>, vector<1x1x128xf32>
    %6 = vector.shape_cast %5 : vector<1x1x128xf32> to vector<1x128xf32>
    %7 = vector.shape_cast %4 : vector<1x128xf32> to vector<1x1x128xf32>
    tpu.vector_store %arg4[%c0_4, %c0_5, %c0_6], %7 {strides = array<i32>} : memref<1x2x128xf32, #tpu.memory_space<vmem>>, vector<1x1x128xf32>,
    %8 = arith.mulf %2, %2 : vector<128x128xf32>
    %cst_7 = arith.constant dense<0.000000e+00> : vector<128xf32>
    %9 = vector.multi_reduction <add>, %8, %cst_7 [0] : vector<128x128xf32> to vector<128xf32>
    %10 = vector.shape_cast %9 : vector<128xf32> to vector<1x128xf32>
    %c0_8 = arith.constant 0 : index
    %c1 = arith.constant 1 : index
    %c0_9 = arith.constant 0 : index
    %11 = vector.load %arg4[%c0_8, %c1, %c0_9] : memref<1x2x128xf32, #tpu.memory_space<vmem>>, vector<1x1x128xf32>
    %12 = vector.shape_cast %11 : vector<1x1x128xf32> to vector<1x128xf32>
    %13 = vector.shape_cast %10 : vector<1x128xf32> to vector<1x1x128xf32>
    tpu.vector_store %arg4[%c0_8, %c1, %c0_9], %13 {strides = array<i32>} : memref<1x2x128xf32, #tpu.memory_space<vmem>>, vector<1x1x128xf32>,
    %14 = arith.truncf %2 : vector<128x128xf32> to vector<128x128xbf16>
    %c0_10 = arith.constant 0 : index
    %c0_11 = arith.constant 0 : index
    %15 = vector.load %arg3[%c0_10, %c0_11] : memref<128x128xbf16, #tpu.memory_space<vmem>>, vector<128x128xbf16>
    tpu.vector_store %arg3[%c0_10, %c0_11], %14 {strides = array<i32>} : memref<128x128xbf16, #tpu.memory_space<vmem>>, vector<128x128xbf16>,
    return
  }
  func.func @transform_0(%arg0: i32) -> (i32, i32) {
    %c0_i32 = arith.constant 0 : i32
    %c0_i32_0 = arith.constant 0 : i32
    return %arg0, %c0_i32 : i32, i32
  }
  func.func @transform_1(%arg0: i32) -> (i32, i32) {
    %c0_i32 = arith.constant 0 : i32
    %c0_i32_0 = arith.constant 0 : i32
    %c0_i32_1 = arith.constant 0 : i32
    return %c0_i32, %c0_i32_0 : i32, i32
  }
  func.func @transform_2(%arg0: i32) -> (i32, i32) {
    %c0_i32 = arith.constant 0 : i32
    %c0_i32_0 = arith.constant 0 : i32
    return %arg0, %c0_i32 : i32, i32
  }
  func.func @transform_3(%arg0: i32) -> (i32, i32, i32) {
    %c0_i32 = arith.constant 0 : i32
    %c0_i32_0 = arith.constant 0 : i32
    %c0_i32_1 = arith.constant 0 : i32
    return %arg0, %c0_i32, %c0_i32_0 : i32, i32, i32
  }
}

module attributes {stable_mosaic.version = 11 : i64} {
  func.func @_bn_relu_add_kernel(%arg0: i32, %arg1: memref<128x128xbf16, #tpu.memory_space<vmem>>, %arg2: memref<1x128xf32, #tpu.memory_space<vmem>>, %arg3: memref<1x128xf32, #tpu.memory_space<vmem>>, %arg4: memref<128x128xbf16, #tpu.memory_space<vmem>>, %arg5: memref<1x128xf32, #tpu.memory_space<vmem>>, %arg6: memref<1x128xf32, #tpu.memory_space<vmem>>, %arg7: memref<128x128xbf16, #tpu.memory_space<vmem>>) attributes {dimension_semantics = [#tpu.dimension_semantics<parallel>], iteration_bounds = array<i64: 1>, scalar_prefetch = 0 : i64, scratch_operands = 0 : i64, tpu.core_type = #tpu.core_type<tc>, window_params = [{transform_indices = @transform_0, window_bounds = array<i64: 128, 128>}, {pipeline_mode = #tpu.pipeline_mode<synchronous>, transform_indices = @transform_1, window_bounds = array<i64: 1, 128>}, {pipeline_mode = #tpu.pipeline_mode<synchronous>, transform_indices = @transform_2, window_bounds = array<i64: 1, 128>}, {transform_indices = @transform_3, window_bounds = array<i64: 128, 128>}, {pipeline_mode = #tpu.pipeline_mode<synchronous>, transform_indices = @transform_4, window_bounds = array<i64: 1, 128>}, {pipeline_mode = #tpu.pipeline_mode<synchronous>, transform_indices = @transform_5, window_bounds = array<i64: 1, 128>}, {transform_indices = @transform_6, window_bounds = array<i64: 128, 128>}]} {
    %c0 = arith.constant 0 : index
    %c0_0 = arith.constant 0 : index
    %0 = vector.load %arg1[%c0, %c0_0] : memref<128x128xbf16, #tpu.memory_space<vmem>>, vector<128x128xbf16>
    %1 = arith.extf %0 : vector<128x128xbf16> to vector<128x128xf32>
    %c0_1 = arith.constant 0 : index
    %c0_2 = arith.constant 0 : index
    %2 = vector.load %arg2[%c0_1, %c0_2] : memref<1x128xf32, #tpu.memory_space<vmem>>, vector<1x128xf32>
    %3 = vector.broadcast %2 : vector<1x128xf32> to vector<128x128xf32>
    %4 = arith.mulf %1, %3 : vector<128x128xf32>
    %c0_3 = arith.constant 0 : index
    %c0_4 = arith.constant 0 : index
    %5 = vector.load %arg3[%c0_3, %c0_4] : memref<1x128xf32, #tpu.memory_space<vmem>>, vector<1x128xf32>
    %6 = vector.broadcast %5 : vector<1x128xf32> to vector<128x128xf32>
    %7 = arith.addf %4, %6 : vector<128x128xf32>
    %cst = arith.constant 0.000000e+00 : f32
    %8 = vector.broadcast %cst : f32 to vector<128x128xf32>
    %9 = arith.maximumf %7, %8 : vector<128x128xf32>
    %c0_5 = arith.constant 0 : index
    %c0_6 = arith.constant 0 : index
    %10 = vector.load %arg4[%c0_5, %c0_6] : memref<128x128xbf16, #tpu.memory_space<vmem>>, vector<128x128xbf16>
    %11 = arith.extf %10 : vector<128x128xbf16> to vector<128x128xf32>
    %c0_7 = arith.constant 0 : index
    %c0_8 = arith.constant 0 : index
    %12 = vector.load %arg5[%c0_7, %c0_8] : memref<1x128xf32, #tpu.memory_space<vmem>>, vector<1x128xf32>
    %13 = vector.broadcast %12 : vector<1x128xf32> to vector<128x128xf32>
    %14 = arith.mulf %11, %13 : vector<128x128xf32>
    %c0_9 = arith.constant 0 : index
    %c0_10 = arith.constant 0 : index
    %15 = vector.load %arg6[%c0_9, %c0_10] : memref<1x128xf32, #tpu.memory_space<vmem>>, vector<1x128xf32>
    %16 = vector.broadcast %15 : vector<1x128xf32> to vector<128x128xf32>
    %17 = arith.addf %14, %16 : vector<128x128xf32>
    %18 = arith.addf %9, %17 : vector<128x128xf32>
    %19 = arith.truncf %18 : vector<128x128xf32> to vector<128x128xbf16>
    %c0_11 = arith.constant 0 : index
    %c0_12 = arith.constant 0 : index
    %20 = vector.load %arg7[%c0_11, %c0_12] : memref<128x128xbf16, #tpu.memory_space<vmem>>, vector<128x128xbf16>
    tpu.vector_store %arg7[%c0_11, %c0_12], %19 {strides = array<i32>} : memref<128x128xbf16, #tpu.memory_space<vmem>>, vector<128x128xbf16>,
    return
  }
  func.func @transform_0(%arg0: i32) -> (i32, i32) {
    %c0_i32 = arith.constant 0 : i32
    %c0_i32_0 = arith.constant 0 : i32
    return %arg0, %c0_i32 : i32, i32
  }
  func.func @transform_1(%arg0: i32) -> (i32, i32) {
    %c0_i32 = arith.constant 0 : i32
    %c0_i32_0 = arith.constant 0 : i32
    %c0_i32_1 = arith.constant 0 : i32
    return %c0_i32, %c0_i32_0 : i32, i32
  }
  func.func @transform_2(%arg0: i32) -> (i32, i32) {
    %c0_i32 = arith.constant 0 : i32
    %c0_i32_0 = arith.constant 0 : i32
    %c0_i32_1 = arith.constant 0 : i32
    return %c0_i32, %c0_i32_0 : i32, i32
  }
  func.func @transform_3(%arg0: i32) -> (i32, i32) {
    %c0_i32 = arith.constant 0 : i32
    %c0_i32_0 = arith.constant 0 : i32
    return %arg0, %c0_i32 : i32, i32
  }
  func.func @transform_4(%arg0: i32) -> (i32, i32) {
    %c0_i32 = arith.constant 0 : i32
    %c0_i32_0 = arith.constant 0 : i32
    %c0_i32_1 = arith.constant 0 : i32
    return %c0_i32, %c0_i32_0 : i32, i32
  }
  func.func @transform_5(%arg0: i32) -> (i32, i32) {
    %c0_i32 = arith.constant 0 : i32
    %c0_i32_0 = arith.constant 0 : i32
    %c0_i32_1 = arith.constant 0 : i32
    return %c0_i32, %c0_i32_0 : i32, i32
  }
  func.func @transform_6(%arg0: i32) -> (i32, i32) {
    %c0_i32 = arith.constant 0 : i32
    %c0_i32_0 = arith.constant 0 : i32
    return %arg0, %c0_i32 : i32, i32
  }
}

</mosaic_0001>

<bundles_post_ra>
// kernel: down_block_forward.6
= control target key start
LH: loop header
LB: loop body
LE: loop exit
PB: predicated region body
PF: predicated region fallthrough
CT: control target
= control target key end

     0   :  { %s2983_s18 = smov 0   ;;  %s3647_s0 = inlined_call_operand.vmem [shape: bf16[2,10,10,128], index: 0, kind: input, shape index: {}]   ;;  %s3648_s1 = inlined_call_operand.vmem [shape: f32[1,128], index: 1, kind: input, shape index: {}]   ;;  %s3649_s2 = inlined_call_operand.vmem [shape: f32[1,128], index: 2, kind: input, shape index: {}]   ;;  %s3650_s3 = inlined_call_operand.vmem [shape: bf16[3,3,128,128], index: 3, kind: input, shape index: {}]   ;;  %s3651_s4 = inlined_call_operand.vmem [shape: bf16[2,64,128], index: 4, kind: output, shape index: {0}]   ;;  %s3652_s5 = inlined_call_operand.vmem [shape: f32[2,2,128], index: 5, kind: output, shape index: {1}]  }
   0x1 LB: > { %s2095_s19 = sadd.s32 4294967295, %s2950_s18   ;;  %p2099_p0 = scmp.ge.s32.totalorder %s2950_s18, 1  ;;  %s2950_s18 = sphi %s2983_s18, %s16_s18  }
   0x2   : > { %p190_p1 = scmp.lt.s32.totalorder %s2950_s18, 3 }
   0x4   : > { %p191_p2 = pnand %p2099_p0, %p190_p1 }
   0x5   : > { %v2872_v0 = vld [vmem:[%s3650_s3 + $0x40] sm:$0xff] (!%p191_p2)   ;;  %p222_p3 = scmp.lt.s32.totalorder (!%p191_p2), %s2095_s19, 1  ;;  %v2874_v2 = vld [vmem:[%s3650_s3 + $0x48] sm:$0xff] (!%p191_p2)   ;;  %v277_v4 = vlaneseq (!%p191_p2)  ;;  %v2876_v5 = vld [vmem:[%s3650_s3 + $0x50] sm:$0xff] (!%p191_p2)   ;;  %v2952_v6 = vmov (!%p191_p2), 0.0|0.0   ;;  %vm836_vm5 = vcmask (!%p191_p2), 1042432  }
   0x6   : > { %194 = sbr.rel (%p191_p2) target bundleno = 433 (0x1b1), region = 36  ;;  %v2873_v1 = vld [vmem:[%s3650_s3 + $0x100] sm:$0xff] (!%p191_p2)   ;;  %2566 = vmatprep.subr.bf16.mxu1 (!%p191_p2), %v2872_v0  ;;  %v2875_v3 = vld [vmem:[%s3650_s3 + $0x108] sm:$0xff] (!%p191_p2)   ;;  %v3010_v7 = vcombine.low (!%p191_p2), %v2952_v6, %v2952_v6  ;;  %v2877_v8 = vld [vmem:[%s3650_s3 + $0x110] sm:$0xff] (!%p191_p2)   ;;  %v3023_v11 = vcombine.high (!%p191_p2), %v2952_v6, %v2952_v6  ;;  %vm454_vm2 = vsmask.f32 (!%p191_p2), 3328 }
   0x7   : > { %2662 = vmatprep.subr.bf16.mxu0 (!%p191_p2), %v2873_v1  ;;  %2567 = vmatpush3.bf16.msra.mxu1 (!%p191_p2), %v2872_v0  ;;  %v3016_v9 = vshrl.u32 (!%p191_p2), %v277_v4, 7  ;;  %v2878_v10 = vld [vmem:[%s3650_s3 + $0x58] sm:$0xff] (!%p191_p2)   ;;  %v2880_v18 = vld [vmem:[%s3650_s3 + $0x60] sm:$0xff] (!%p191_p2)   ;;  %v2882_v22 = vld [vmem:[%s3650_s3 + $0x68] sm:$0xff] (!%p191_p2)   ;;  %vm455_vm3 = vsmask.f32 (!%p191_p2), 7440 }
   0x8   : > { %2663 = vmatpush3.bf16.msra.mxu0 (!%p191_p2), %v2873_v1  ;;  %2568 = vmatprep.subr.bf16.mxu1 (!%p191_p2), %v2874_v2  ;;  %v458_v12 = vshrl.u32 (!%p191_p2), %v3010_v7, 16  ;;  %v2879_v13 = vld [vmem:[%s3650_s3 + $0x118] sm:$0xff] (!%p191_p2)   ;;  %v461_v14 = vshll.u32 (!%p191_p2), %v3010_v7, 16  ;;  %v467_v19 = vshll.u32 (!%p191_p2), %v3023_v11, 16  ;;  %v2881_v20 = vld [vmem:[%s3650_s3 + $0x120] sm:$0xff] (!%p191_p2)   ;;  %v2883_v23 = vld [vmem:[%s3650_s3 + $0x128] sm:$0xff] (!%p191_p2)  }
   0x9   : > { %2664 = vmatprep.subr.bf16.mxu0 (!%p191_p2), %v2875_v3  ;;  %v3031_v15 = vadd.s32 (!%p191_p2), 8, %v3016_v9  ;;  %vm280_vm0 = vcmp.ge.s32.totalorder (!%p191_p2), %v3016_v9, 1  ;;  %v3059_v33 = vld [vmem:[%s3648_s1] ss:$0 sm:$0xff] (!%p191_p2)  ;;  %v2884_v35 = vld [vmem:[%s3650_s3 + $0x70] sm:$0xff] (!%p191_p2)   ;;  %vm3073_vm4 = vmor (!%p191_p2), %vm454_vm2, %vm455_vm3  ;;  %vm837_vm6 = vcmask (!%p191_p2), 1046532  }
   0xa   : > { %v460_v16 = vrot.slane (!%p191_p2), %v458_v12, 4  ;;  %v463_v17 = vrot.slane (!%p191_p2), %v461_v14, 5  ;;  %v469_v25 = vrot.slane (!%p191_p2), %v467_v19, 5  ;;  %v3064_v34 = vld [vmem:[%s3649_s2] ss:$0 sm:$0xff] (!%p191_p2)  ;;  %v2885_v47 = vld [vmem:[%s3650_s3 + $0x130] sm:$0xff] (!%p191_p2)   ;;  %vm3345_vm7 = vmor (!%p191_p2), %vm836_vm5, %vm837_vm6 }
   0xb   : > { %2569 = vmatpush3.bf16.msra.mxu1 (!%p191_p2), %v2874_v2  ;;  %vm283_vm1 = vcmp.le.s32.totalorder (!%p191_p2), %v3031_v15, 8  ;;  %v2886_v57 = vld [vmem:[%s3650_s3 + $0x78] sm:$0xff] (!%p191_p2)   ;;  %vm3426_vm8 = vmpackc.low (!%p191_p2), %vm280_vm0, %vm280_vm0 }
   0xc   : > { %2665 = vmatpush3.bf16.msra.mxu0 (!%p191_p2), %v2875_v3  ;;  %2570 = vmatprep.subr.bf16.mxu1 (!%p191_p2), %v2876_v5  ;;  %v464_v21 = vor.u32 (!%p191_p2), %v463_v17, %v460_v16  ;;  %v2887_v58 = vld [vmem:[%s3650_s3 + $0x138] sm:$0xff] (!%p191_p2)  }
   0xd   : > { %s3660_s19 = smov (!%p222_p3, %s2095_s19), 1  ;;  %2666 = vmatprep.subr.bf16.mxu0 %v2877_v8 }
   0xe   : > { %s2862_s7 = smul.u32 80, %s3660_s19  ;;  %v465_v24 = vrot.slane %v464_v21, 4  ;;  %s2373_s9 = sshll.u32 %s3660_s19, 5 }
   0xf   : > { %2571 = vmatpush3.bf16.msra.mxu1 %v2876_v5  ;;  %s231_s12 = scalar_lea.vmem %s3651_s4, %s2373_s9  ;;  %s2103_s13 = sshll.u32 %s3660_s19, 1 }
  0x10   : > { %2667 = vmatpush3.bf16.msra.mxu0 %v2877_v8  ;;  %2572 = vmatprep.subr.bf16.mxu1 %v2878_v10  ;;  %s3043_s20 = scalar_lea.vmem %s3647_s0, %s2862_s7  ;;  %v3080_v42 = vsel %vm3073_vm4, %v465_v24, %v469_v25  ;;  %v3160_v24 = vld [vmem:[%s3650_s3] sm:$0xff]   ;;  %s235_s16 = scalar_lea.vmem %s3652_s5, %s2103_s13 }
  0x11   : > { %2668 = vmatprep.subr.bf16.mxu0 %v2879_v13  ;;  %v239_v26 = vld [vmem:[%s3043_s20 + $0x8] ss:$56 sps:$4 sm:$0xff]   ;;  %v240_v27 = vld [vmem:[%s3043_s20 + $0xc] sm:$0x1]  ;;  %v254_v28 = vld [vmem:[%s3043_s20 + $0x44] sm:$0x1] }
  0x12   : > { %v259_v29 = vunpack.c.l.bf16 %v239_v26  ;;  %v260_v30 = vunpack.c.l.bf16 %v240_v27  ;;  %v273_v31 = vunpack.c.h.bf16 %v239_v26  ;;  %v274_v32 = vunpack.c.l.bf16 %v254_v28  ;;  %v241_v41 = vld [vmem:[%s3043_s20 + $0x10] ss:$8 sps:$4 sm:$0xff]   ;;  %v242_v43 = vld [vmem:[%s3043_s20 + $0x14] sm:$0x1]  ;;  %v244_v44 = vld [vmem:[%s3043_s20 + $0x1c] sm:$0x1] }
  0x13   : > { %2573 = vmatpush3.bf16.msra.mxu1 %v2878_v10  ;;  %v261_v45 = vunpack.c.l.bf16 %v241_v41  ;;  %v263_v46 = vunpack.c.h.bf16 %v241_v41  ;;  %v3096_v52 = vld [vmem:[%s3043_s20 + $0x20] ss:$8 sps:$4 sm:$0xff]   ;;  %v262_v53 = vunpack.c.l.bf16 %v242_v43  ;;  %v264_v54 = vunpack.c.l.bf16 %v244_v44 }
  0x14   : > { %2669 = vmatpush3.bf16.msra.mxu0 %v2879_v13  ;;  %2574 = vmatprep.subr.bf16.mxu1 %v2880_v18  ;;  %v303_v36 = vmul.f32 %v3059_v33, %v259_v29  ;;  %v304_v37 = vmul.f32 %v3059_v33, %v260_v30  ;;  %v317_v38 = vmul.f32 %v3059_v33, %v273_v31  ;;  %v265_v2 = vunpack.c.l.bf16 %v3096_v52  ;;  %v3165_v25 = vld [vmem:[%s3650_s3 + $0x140] sm:$0xff]  }
  0x15   : > { %2670 = vmatprep.subr.bf16.mxu0 %v2881_v20  ;;  %v318_v39 = vmul.f32 %v3059_v33, %v274_v32  ;;  %v305_v55 = vmul.f32 %v3059_v33, %v261_v45  ;;  %v307_v56 = vmul.f32 %v3059_v33, %v263_v46  ;;  %v306_v63 = vmul.f32 %v3059_v33, %v262_v53 }
  0x16   : > { %v3088_v48 = vadd.f32 %v3064_v34, %v303_v36  ;;  %v331_v49 = vadd.f32 %v3064_v34, %v304_v37  ;;  %v3092_v50 = vadd.f32 %v3064_v34, %v317_v38  ;;  %v308_v0 = vmul.f32 %v3059_v33, %v264_v54 }
  0x17   : > { %2575 = vmatpush3.bf16.msra.mxu1 %v2880_v18  ;;  %v345_v51 = vadd.f32 %v3064_v34, %v318_v39  ;;  %v332_v1 = vadd.f32 %v3064_v34, %v305_v55  ;;  %v333_v16 = vadd.f32 %v3064_v34, %v306_v63  ;;  %v334_v17 = vadd.f32 %v3064_v34, %v307_v56 }
  0x18   : > { %2671 = vmatpush3.bf16.msra.mxu0 %v2881_v20  ;;  %2576 = vmatprep.subr.bf16.mxu1 %v2882_v22  ;;  %v350_v59 = vmax.f32 %v3088_v48, 0.0  ;;  %v351_v60 = vmax.f32 %v331_v49, 0.0  ;;  %v364_v61 = vmax.f32 %v3092_v50, 0.0  ;;  %v335_v18 = vadd.f32 %v3064_v34, %v308_v0  ;;  %v2903_v50 = vld [vmem:[%s3650_s3 + $0x178] sm:$0xff]  }
  0x19   : > { %2672 = vmatprep.subr.bf16.mxu0 %v2883_v23  ;;  %v365_v62 = vmax.f32 %v345_v51, 0.0  ;;  %v3151_v19 = vmax.f32 %v332_v1, 0.0  ;;  %v353_v28 = vmax.f32 %v333_v16, 0.0  ;;  %v3169_v29 = vmax.f32 %v334_v17, 0.0 }
  0x1a   : > { %v3116_v3 = vsel %vm280_vm0, %v350_v59, 0.0  ;;  %v3120_v4 = vsel %vm283_vm1, %v351_v60, 0.0  ;;  %v3126_v5 = vsel %vm280_vm0, %v364_v61, 0.0  ;;  %v355_v38 = vmax.f32 %v335_v18, 0.0 }
  0x1b   : > { %2577 = vmatpush3.bf16.msra.mxu1 %v2882_v22  ;;  %v3130_v8 = vsel %vm283_vm1, %v365_v62, 0.0  ;;  %v3134_v10 = vpack.c.bf16 %v3116_v3, %v3116_v3  ;;  %v3138_v12 = vpack.c.bf16 %v3120_v4, %v3120_v4  ;;  %v3142_v13 = vpack.c.bf16 %v3126_v5, %v3126_v5 }
  0x1c   : > { %2673 = vmatpush3.bf16.msra.mxu0 %v2883_v23  ;;  %2578 = vmatprep.subr.bf16.mxu1 %v2884_v35  ;;  %v3146_v14 = vpack.c.bf16 %v3130_v8, %v3130_v8  ;;  %v372_v39 = vsel %vm280_vm0, %v3151_v19, 0.0  ;;  %v373_v43 = vsel %vm283_vm1, %v353_v28, 0.0  ;;  %v374_v44 = vsel %vm280_vm0, %v3169_v29, 0.0 }
  0x1d   : > { %2674 = vmatprep.subr.bf16.mxu0 %v2885_v47  ;;  %v472_v20 = vshrl.u32 %v3134_v10, 16  ;;  %v475_v21 = vshll.u32 %v3134_v10, 16  ;;  %v481_v22 = vshll.u32 %v3138_v12, 16  ;;  %v1177_v23 = vshrl.u32 %v3142_v13, 16 }
  0x1e   : > { %v1180_v26 = vshll.u32 %v3142_v13, 16  ;;  %v1186_v27 = vshll.u32 %v3146_v14, 16  ;;  %v3180_v45 = vpack.c.bf16 %v372_v39, %v372_v39  ;;  %v3184_v49 = vpack.c.bf16 %v373_v43, %v373_v43 }
  0x1f   : > { %2579 = vmatpush3.bf16.msra.mxu1 %v2884_v35  ;;  %v474_v30 = vrot.slane %v472_v20, 4  ;;  %v477_v31 = vrot.slane %v475_v21, 5  ;;  %v483_v32 = vrot.slane %v481_v22, 5  ;;  %v1179_v35 = vrot.slane %v1177_v23, 4  ;;  %v248_v23 = vld [vmem:[%s3043_s20 + $0x2c] sm:$0x1] }
  0x20   : > { %2675 = vmatpush3.bf16.msra.mxu0 %v2885_v47  ;;  %2580 = vmatprep.subr.bf16.mxu1 %v2886_v57  ;;  %v1182_v36 = vrot.slane %v1180_v26, 5  ;;  %v1188_v37 = vrot.slane %v1186_v27, 5  ;;  %v375_v47 = vsel %vm283_vm1, %v355_v38, 0.0  ;;  %v3186_v51 = vpack.c.bf16 %v374_v44, %v374_v44  ;;  %v250_v38 = vld [vmem:[%s3043_s20 + $0x34] sm:$0x1] }
  0x21   : > { %2676 = vmatprep.subr.bf16.mxu0 %v2887_v58  ;;  %v478_v41 = vor.u32 %v477_v31, %v474_v30  ;;  %v3189_v54 = vpack.c.bf16 %v375_v47, %v375_v47  ;;  %v486_v55 = vshrl.u32 %v3180_v45, 16  ;;  %v489_v56 = vshll.u32 %v3180_v45, 16 }
  0x22   : > { %v1183_v46 = vor.u32 %v1182_v36, %v1179_v35  ;;  %v495_v60 = vshll.u32 %v3184_v49, 16  ;;  %v500_v62 = vshrl.u32 %v3186_v51, 16  ;;  %v503_v63 = vshll.u32 %v3186_v51, 16 }
  0x23   : > { %2581 = vmatpush3.bf16.msra.mxu1 %v2886_v57  ;;  %v479_v53 = vrot.slane %v478_v41, 4  ;;  %v246_v57 = vld [vmem:[%s3043_s20 + $0x24] sm:$0x1]  ;;  %v488_v1 = vrot.slane %v486_v55, 4  ;;  %v491_v16 = vrot.slane %v489_v56, 5  ;;  %v509_v17 = vshll.u32 %v3189_v54, 16 }
  0x24   : > { %2677 = vmatpush3.bf16.msra.mxu0 %v2887_v58  ;;  %2590 = vmatprep.subr.bf16.mxu1 %v3160_v24  ;;  %v1184_v58 = vrot.slane %v1183_v46, 4  ;;  %v497_v21 = vrot.slane %v495_v60, 5  ;;  %v502_v22 = vrot.slane %v500_v62, 4  ;;  %v505_v28 = vrot.slane %v503_v63, 5 }
  0x25   : > { %2686 = vmatprep.subr.bf16.mxu0 %v3165_v25  ;;  %v484_v0 = vsel %vm3073_vm4, %v479_v53, %v483_v32  ;;  %v492_v27 = vor.u32 %v491_v16, %v488_v1  ;;  %v511_v30 = vrot.slane %v509_v17, 5  ;;  %v266_v31 = vunpack.c.l.bf16 %v246_v57 }
  0x26   : > { %v2138_v18 = vcombine.low %v3080_v42, %v484_v0  ;;  %v3203_v20 = vsel %vm3073_vm4, %v1184_v58, %v1188_v37  ;;  %v309_v32 = vmul.f32 %v3059_v33, %v265_v2  ;;  %v267_v35 = vunpack.c.h.bf16 %v3096_v52  ;;  %v3213_v37 = vld [vmem:[%s3043_s20 + $0x30] ss:$8 sps:$4 sm:$0xff]  }
  0x27   : > { %v2328_v26 = vcombine.low %v3203_v20, %v3080_v42  ;;  %v268_v36 = vunpack.c.l.bf16 %v248_v23  ;;  %v493_v39 = vrot.slane %v492_v27, 4  ;;  %v506_v41 = vor.u32 %v505_v28, %v502_v22  ;;  %v2890_v27 = vld [vmem:[%s3650_s3 + $0x8] sm:$0xff]  }
  0x28   : > { %2582 = vmatprep.mubr.bf16.mxu1 %v2138_v18  ;;  %v269_v43 = vunpack.c.l.bf16 %v3213_v37  ;;  %v270_v44 = vunpack.c.l.bf16 %v250_v38  ;;  %v310_v46 = vmul.f32 %v3059_v33, %v266_v31  ;;  %v336_v47 = vadd.f32 %v3064_v34, %v309_v32 }
  0x29   : > { %v311_v53 = vmul.f32 %v3059_v33, %v267_v35  ;;  %v312_v2 = vmul.f32 %v3059_v33, %v268_v36  ;;  %v498_v52 = vsel %vm3073_vm4, %v493_v39, %v497_v21  ;;  %v507_v55 = vrot.slane %v506_v41, 4  ;;  %v252_v21 = vld [vmem:[%s3043_s20 + $0x3c] sm:$0x1] }
  0x2a   : > { %v313_v56 = vmul.f32 %v3059_v33, %v269_v43  ;;  %v314_v57 = vmul.f32 %v3059_v33, %v270_v44  ;;  %v2244_v58 = vcombine.low %v484_v0, %v498_v52  ;;  %v337_v60 = vadd.f32 %v3064_v34, %v310_v46 }
  0x2b   : > { %v3226_v62 = vmax.f32 %v336_v47, 0.0  ;;  %v338_v63 = vadd.f32 %v3064_v34, %v311_v53  ;;  %v3231_v1 = vsel %vm3073_vm4, %v507_v55, %v511_v30  ;;  %v339_v16 = vadd.f32 %v3064_v34, %v312_v2  ;;  %v2892_v47 = vld [vmem:[%s3650_s3 + $0x10] sm:$0xff]  }
  0x2c   : > { %v340_v17 = vadd.f32 %v3064_v34, %v313_v56  ;;  %v341_v18 = vadd.f32 %v3064_v34, %v314_v57  ;;  %v3238_v22 = vcombine.low %v498_v52, %v3231_v1  ;;  %2678 = vmatprep.mubr.bf16.mxu0 %v2244_v58  ;;  %v357_v0 = vmax.f32 %v337_v60, 0.0 }
  0x2d   : > { %v376_v23 = vsel %vm280_vm0, %v3226_v62, 0.0  ;;  %v3246_v28 = vmax.f32 %v338_v63, 0.0  ;;  %v359_v31 = vmax.f32 %v339_v16, 0.0  ;;  %v271_v39 = vunpack.c.h.bf16 %v3213_v37 }
  0x2e   : > { %v3248_v30 = vpack.c.bf16 %v376_v23, %v376_v23  ;;  %v3250_v32 = vmax.f32 %v340_v17, 0.0  ;;  %v361_v35 = vmax.f32 %v341_v18, 0.0  ;;  %2583 = vmatmul.mubr.bf16.vlgmr.msra.gmra.mrb[0].mxu1 %v3238_v22  ;;  %v377_v36 = vsel %vm283_vm1, %v357_v0, 0.0 }
  0x2f   : > { %v378_v38 = vsel %vm280_vm0, %v3246_v28, 0.0  ;;  %v272_v41 = vunpack.c.l.bf16 %v252_v21  ;;  %2591 = vmatpush3.bf16.msra.mxu1 %v3160_v24  ;;  %v3260_v43 = vpack.c.bf16 %v377_v36, %v377_v36  ;;  %v379_v53 = vsel %vm283_vm1, %v359_v31, 0.0  ;;  %v2894_v31 = vld [vmem:[%s3650_s3 + $0x18] sm:$0xff]  }
  0x30   : > { %v514_v44 = vshrl.u32 %v3248_v30, 16  ;;  %v517_v46 = vshll.u32 %v3248_v30, 16  ;;  %2592 = vmatprep.subr.bf16.mxu1 %v2890_v27  ;;  %v3269_v2 = vpack.c.bf16 %v378_v38, %v378_v38  ;;  %v3271_v37 = vpack.c.bf16 %v379_v53, %v379_v53 }
  0x31   : > { %v380_v24 = vsel %vm280_vm0, %v3250_v32, 0.0  ;;  %v381_v52 = vsel %vm283_vm1, %v361_v35, 0.0  ;;  %v523_v57 = vshll.u32 %v3260_v43, 16 }
  0x32   : > { %v516_v55 = vrot.slane %v514_v44, 4  ;;  %v519_v56 = vrot.slane %v517_v46, 5  ;;  %v3279_v58 = vpack.c.bf16 %v380_v24, %v380_v24  ;;  %v528_v60 = vshrl.u32 %v3269_v2, 16 }
  0x33   : > { %v531_v63 = vshll.u32 %v3269_v2, 16  ;;  %v537_v16 = vshll.u32 %v3271_v37, 16  ;;  %v3284_v17 = vpack.c.bf16 %v381_v52, %v381_v52  ;;  %v525_v21 = vrot.slane %v523_v57, 5  ;;  %2593 = vmatpush3.bf16.msra.mxu1 %v2890_v27  ;;  %v2891_v57 = vld [vmem:[%s3650_s3 + $0x148] sm:$0xff]  }
  0x34   : > { %v520_v18 = vor.u32 %v519_v56, %v516_v55  ;;  %v542_v0 = vshrl.u32 %v3279_v58, 16  ;;  %v545_v23 = vshll.u32 %v3279_v58, 16  ;;  %2594 = vmatprep.subr.bf16.mxu1 %v2892_v47  ;;  %v530_v35 = vrot.slane %v528_v60, 4 }
  0x35   : > { %v533_v36 = vrot.slane %v531_v63, 5  ;;  %v551_v38 = vshll.u32 %v3284_v17, 16  ;;  %v315_v24 = vmul.f32 %v3059_v33, %v271_v39  ;;  %v539_v27 = vrot.slane %v537_v16, 5  ;;  %v2896_v39 = vld [vmem:[%s3650_s3 + $0x20] sm:$0xff]  }
  0x36   : > { %v521_v44 = vrot.slane %v520_v18, 4  ;;  %v544_v46 = vrot.slane %v542_v0, 4  ;;  %v547_v53 = vrot.slane %v545_v23, 5  ;;  %v316_v55 = vmul.f32 %v3059_v33, %v272_v41 }
  0x37   : > { %v534_v52 = vor.u32 %v533_v36, %v530_v35  ;;  %2595 = vmatpush3.bf16.msra.mxu1 %v2892_v47  ;;  %v553_v63 = vrot.slane %v551_v38, 5  ;;  %v342_v18 = vadd.f32 %v3064_v34, %v315_v24  ;;  %v2895_v24 = vld [vmem:[%s3650_s3 + $0x158] sm:$0xff]   ;;  %v2168_v9 = vrot.slane %v3279_v58, 9 }
  0x38   : > { %v526_v56 = vsel %vm3073_vm4, %v521_v44, %v525_v21  ;;  %v548_v60 = vor.u32 %v547_v53, %v544_v46  ;;  %2596 = vmatprep.subr.bf16.mxu1 %v2894_v31  ;;  %v343_v41 = vadd.f32 %v3064_v34, %v316_v55  ;;  %v2163_v53 = vrot.slane %v3134_v10, 9 }
  0x39   : > { %v2245_v0 = vcombine.low %v3231_v1, %v526_v56  ;;  %v535_v33 = vrot.slane %v534_v52, 4  ;;  %v3305_v21 = vmax.f32 %v342_v18, 0.0  ;;  %v2893_v1 = vld [vmem:[%s3650_s3 + $0x150] sm:$0xff]   ;;  %v845_v55 = vrot.slane %v3138_v12, 5 }
  0x3a   : > { %v549_v16 = vrot.slane %v548_v60, 4  ;;  %v363_v23 = vmax.f32 %v343_v41, 0.0  ;;  %v2900_v52 = vld [vmem:[%s3650_s3 + $0x30] sm:$0xff]   ;;  %v849_v60 = vrot.slane %v3184_v49, 5  ;;  %v2897_v49 = vld [vmem:[%s3650_s3 + $0x160] sm:$0xff]  }
  0x3b   : > { %2679 = vmatmul.mubr.bf16.vlgmr.msra.gmra.mrb[0].mxu0 %v2245_v0  ;;  %v540_v47 = vsel %vm3073_vm4, %v535_v33, %v539_v27  ;;  %2597 = vmatpush3.bf16.msra.mxu1 %v2894_v31  ;;  %v382_v36 = vsel %vm280_vm0, %v3305_v21, 0.0  ;;  %v3406_v48 = vpack.c.bf16 %v364_v61, %v3305_v21  ;;  %v2165_v61 = vrot.slane %v3186_v51, 9  ;;  %v2911_v0 = vld [vmem:[%s3650_s3 + $0x198] sm:$0xff]  }
  0x3c   : > { %2687 = vmatpush3.bf16.msra.mxu0 %v3165_v25  ;;  %v3313_v35 = vcombine.low %v526_v56, %v540_v47  ;;  %v554_v34 = vsel %vm3073_vm4, %v549_v16, %v553_v63  ;;  %2598 = vmatprep.subr.bf16.mxu1 %v2896_v39  ;;  %v2898_v25 = vld [vmem:[%s3650_s3 + $0x28] sm:$0xff]   ;;  %v383_v44 = vsel %vm283_vm1, %v363_v23, 0.0  ;;  %v3325_v31 = vpack.c.bf16 %v382_v36, %v382_v36 }
  0x3d   : > { %2688 = vmatprep.subr.bf16.mxu0 %v2891_v57  ;;  %v2246_v38 = vcombine.low %v540_v47, %v554_v34  ;;  %v3328_v46 = vpack.c.bf16 %v383_v44, %v383_v44  ;;  %v2164_v56 = vrot.slane %v3180_v45, 9  ;;  %v389_v45 = vpack.c.bf16 %v3120_v4, %v3116_v3 }
  0x3e   : > { %2586 = vmatprep.mubr.bf16.mxu1 %v3313_v35  ;;  %v556_v15 = vshrl.u32 %v3325_v31, 16  ;;  %v559_v27 = vshll.u32 %v3325_v31, 16  ;;  %v2256_v4 = vrot.slane %v3142_v13, 9  ;;  %v1339_v16 = vrot.slane %v3146_v14, 5 }
  0x3f   : > { %2682 = vmatprep.mubr.bf16.mxu0 %v2246_v38  ;;  %2599 = vmatpush3.bf16.msra.mxu1 %v2896_v39  ;;  %v565_v10 = vshll.u32 %v3328_v46, 16  ;;  %v3359_v39 = vsel %vm3345_vm7, %v2163_v53, %v845_v55  ;;  %v3363_v41 = vsel %vm3345_vm7, %v2164_v56, %v849_v60  ;;  %v2162_v47 = vrot.slane %v3010_v7, 9  ;;  %v2899_v38 = vld [vmem:[%s3650_s3 + $0x168] sm:$0xff]  }
  0x40   : > { %2689 = vmatpush3.bf16.msra.mxu0 %v2891_v57  ;;  %2600 = vmatprep.subr.bf16.mxu1 %v2898_v25  ;;  %v558_v63 = vrot.slane %v556_v15, 4  ;;  %v561_v18 = vrot.slane %v559_v27, 5  ;;  %v2902_v57 = vld [vmem:[%s3650_s3 + $0x38] sm:$0xff]   ;;  %v841_v23 = vrot.slane %v3023_v11, 5  ;;  %v2150_v36 = vcombine.low %v2952_v6, %v389_v45  ;;  %v2904_v11 = vld [vmem:[%s3650_s3 + $0x80] sm:$0xff]   ;;  %v2906_v15 = vld [vmem:[%s3650_s3 + $0x88] sm:$0xff]  }
  0x41   : > { %2690 = vmatprep.subr.bf16.mxu0 %v2893_v1  ;;  %v567_v12 = vrot.slane %v565_v10, 5  ;;  %v3385_v40 = vsel %vm3345_vm7, %v2256_v4, %v1339_v16  ;;  %v2408_v53 = vpack.c.bf16 %v3226_v62, %v3169_v29  ;;  %v853_v27 = vrot.slane %v3189_v54, 5  ;;  %v2914_v4 = vld [vmem:[%s3650_s3 + $0xa8] sm:$0xff]   ;;  %v2916_v16 = vld [vmem:[%s3650_s3 + $0xb0] sm:$0xff]  }
  0x42   : > { %v562_v33 = vor.u32 %v561_v18, %v558_v63  ;;  %v3389_v14 = vsel %vm3345_vm7, %v2162_v47, %v841_v23  ;;  %v2166_v56 = vrot.slane %v3248_v30, 9  ;;  %v857_v10 = vrot.slane %v3260_v43, 5  ;;  %v2913_v47 = vld [vmem:[%s3650_s3 + $0x1a0] sm:$0xff]   ;;  %v2918_v23 = vld [vmem:[%s3650_s3 + $0xb8] sm:$0xff]  }
  0x43   : > { %2601 = vmatpush3.bf16.msra.mxu1 %v2898_v25  ;;  %v2273_v25 = vcombine.low %v3359_v39, %v3363_v41  ;;  %v2354_v44 = vcombine.low %v3385_v40, %v3389_v14  ;;  %v2167_v51 = vrot.slane %v3269_v2, 9  ;;  %v861_v54 = vrot.slane %v3271_v37, 5  ;;  %v2908_v2 = vld [vmem:[%s3650_s3 + $0x90] sm:$0xff]   ;;  %v2905_v37 = vld [vmem:[%s3650_s3 + $0x180] sm:$0xff]  }
  0x44   : > { %2691 = vmatpush3.bf16.msra.mxu0 %v2893_v1  ;;  %2602 = vmatprep.subr.bf16.mxu1 %v2900_v52  ;;  %v563_v3 = vrot.slane %v562_v33, 4  ;;  %v865_v60 = vrot.slane %v3284_v17, 5  ;;  %v854_v30 = vsel %vm3345_vm7, %v2165_v61, %v853_v27  ;;  %v858_v43 = vsel %vm3345_vm7, %v2166_v56, %v857_v10  ;;  %v2910_v33 = vld [vmem:[%s3650_s3 + $0x98] sm:$0xff]   ;;  %v2923_v61 = vld [vmem:[%s3650_s3 + $0x1c8] sm:$0xff]   ;;  %v2928_v56 = vld [vmem:[%s3650_s3 + $0xe0] sm:$0xff]  }
  0x45   : > { %2692 = vmatprep.subr.bf16.mxu0 %v2895_v24  ;;  %v862_v58 = vsel %vm3345_vm7, %v2167_v51, %v861_v54  ;;  %v3464_v63 = vpack.c.bf16 %v3305_v21, %v3250_v32  ;;  %v2274_v18 = vcombine.low %v854_v30, %v858_v43  ;;  %v869_v45 = vrot.slane %v3328_v46, 5  ;;  %v2925_v10 = vld [vmem:[%s3650_s3 + $0x1d0] sm:$0xff]   ;;  %v2934_v51 = vld [vmem:[%s3650_s3 + $0xf8] sm:$0xff]   ;;  %v2931_v54 = vld [vmem:[%s3650_s3 + $0x1e8] sm:$0xff]  }
  0x46   : > { %v568_v1 = vsel %vm3073_vm4, %v563_v3, %v567_v12  ;;  %v3460_v17 = vsel %vm3345_vm7, %v2168_v9, %v865_v60  ;;  %v2169_v12 = vrot.slane %v3325_v31, 9  ;;  %v2912_v31 = vld [vmem:[%s3650_s3 + $0xa0] sm:$0xff]   ;;  %v2909_v3 = vld [vmem:[%s3650_s3 + $0x190] sm:$0xff]   ;;  %v396_v27 = vpack.c.bf16 %v3130_v8, %v3126_v5  ;;  %v2930_v8 = vld [vmem:[%s3650_s3 + $0xe8] sm:$0xff]  }
  0x47   : > { %v3377_v13 = vcombine.low %v554_v34, %v568_v1  ;;  %2603 = vmatpush3.bf16.msra.mxu1 %v2900_v52  ;;  %v2247_v7 = vcombine.low %v568_v1, %v3203_v20  ;;  %v3394_v34 = vpack.c.bf16 %v3151_v19, %v350_v59  ;;  %v2901_v59 = vld [vmem:[%s3650_s3 + $0x170] sm:$0xff]   ;;  %v3413_v52 = vpack.c.bf16 %v3169_v29, %v3151_v19  ;;  %v2915_v1 = vld [vmem:[%s3650_s3 + $0x1a8] sm:$0xff]   ;;  %v2936_v9 = vld [vmem:[%s3650_s3 + $0x200] sm:$0xff]  }
  0x48   : > { %2693 = vmatpush3.bf16.msra.mxu0 %v2895_v24  ;;  %2604 = vmatprep.subr.bf16.mxu1 %v2902_v57  ;;  %v2411_v24 = vpack.c.bf16 %v3250_v32, %v3246_v28  ;;  %v3432_v19 = vpack.c.bf16 %v3246_v28, %v3226_v62  ;;  %v2275_v21 = vcombine.low %v862_v58, %v3460_v17  ;;  %v2937_v60 = vld [vmem:[%s3650_s3 + $0x208] sm:$0xff]   ;;  %v2939_v29 = vld [vmem:[%s3650_s3 + $0x218] sm:$0xff]   ;;  %v2940_v62 = vld [vmem:[%s3650_s3 + $0x220] sm:$0xff]  }
  0x49   : > { %2694 = vmatprep.subr.bf16.mxu0 %v2897_v49  ;;  %2587 = vmatmul.mubr.bf16.gmra.mrb[4].mxu1 %v3377_v13  ;;  %v870_v46 = vsel %vm3345_vm7, %v2169_v12, %v869_v45  ;;  %v2301_v5 = vcombine.low %v396_v27, %v2952_v6  ;;  %v2929_v6 = vld [vmem:[%s3650_s3 + $0x1e0] sm:$0xff]   ;;  %v2941_v28 = vld [vmem:[%s3650_s3 + $0x228] sm:$0xff]   ;;  %v2942_v32 = vld [vmem:[%s3650_s3 + $0x230] sm:$0xff]  }
  0x4a   : > { %2683 = vmatmul.mubr.bf16.gmra.mrb[4].mxu0 %v2247_v7  ;;  %2606 = vmatprep.mubr.bf16.mxu1 %v2150_v36  ;;  %v2920_v36 = vld [vmem:[%s3650_s3 + $0xc0] sm:$0xff]   ;;  %v3519_v7 = vcombine.low %v858_v43, %v862_v58  ;;  %v2938_v43 = vld [vmem:[%s3650_s3 + $0x210] sm:$0xff]  }
  0x4b   : > { %2702 = vmatprep.mubr.bf16.mxu0 %v2273_v25  ;;  %2605 = vmatpush3.bf16.msra.mxu1 %v2902_v57  ;;  %v2186_v57 = vcombine.low %v3389_v14, %v3359_v39  ;;  %v2276_v39 = vcombine.low %v870_v46, %v3385_v40  ;;  %v2917_v25 = vld [vmem:[%s3650_s3 + $0x1b0] sm:$0xff]  }
  0x4c   : > { %2695 = vmatpush3.bf16.msra.mxu0 %v2897_v49  ;;  %2614 = vmatprep.subr.bf16.mxu1 %v2904_v11  ;;  %v2907_v49 = vld [vmem:[%s3650_s3 + $0x188] sm:$0xff]  }
  0x4d   : > { %2696 = vmatprep.subr.bf16.mxu0 %v2899_v38 }
  0x50   : > { %2697 = vmatpush3.bf16.msra.mxu0 %v2899_v38  ;;  %v3517_v38 = vcombine.low %v3363_v41, %v854_v30  ;;  %v2924_v41 = vld [vmem:[%s3650_s3 + $0xd0] sm:$0xff]   ;;  %v2935_v30 = vld [vmem:[%s3650_s3 + $0x1f8] sm:$0xff]  }
  0x51   : > { %2698 = vmatprep.subr.bf16.mxu0 %v2901_v59  ;;  %2607 = vmatmul.mubr.msk.bf16.vlgmr.msra.gmra.mrb[0].mxu1 %vm3426_vm8, %v3413_v52 }
  0x52   : > { %2615 = vmatpush3.bf16.msra.mxu1 %v2904_v11  ;;  %2610 = vmatprep.mubr.msk.bf16.mxu1 %vm3426_vm8, %v3432_v19  ;;  %v2922_v11 = vld [vmem:[%s3650_s3 + $0xc8] sm:$0xff]  }
  0x53   : > { %2616 = vmatprep.subr.bf16.mxu1 %v2906_v15 }
  0x54   : > { %2699 = vmatpush3.bf16.msra.mxu0 %v2901_v59  ;;  %v2919_v59 = vld [vmem:[%s3650_s3 + $0x1b8] sm:$0xff]  }
  0x55   : > { %2700 = vmatprep.subr.bf16.mxu0 %v2903_v50 }
  0x56   : > { %2617 = vmatpush3.bf16.msra.mxu1 %v2906_v15  ;;  %v3536_v15 = vcombine.low %v3460_v17, %v870_v46 }
  0x57   : > { %2618 = vmatprep.subr.bf16.mxu1 %v2908_v2 }
  0x58   : > { %2701 = vmatpush3.bf16.msra.mxu0 %v2903_v50  ;;  %v2926_v50 = vld [vmem:[%s3650_s3 + $0xd8] sm:$0xff]  }
  0x59   : > { %2710 = vmatprep.subr.bf16.mxu0 %v2905_v37  ;;  %2611 = vmatmul.mubr.msk.bf16.gmra.mrb[4].mxu1 %vm3426_vm8, %v3464_v63 }
  0x5a   : > { %2619 = vmatpush3.bf16.msra.mxu1 %v2908_v2  ;;  %2630 = vmatprep.mubr.bf16.mxu1 %v2186_v57 }
  0x5b   : > { %2703 = vmatmul.mubr.bf16.vlgmr.msra.gmra.mrb[0].mxu0 %v2274_v18  ;;  %2620 = vmatprep.subr.bf16.mxu1 %v2910_v33 }
  0x5c   : > { %2711 = vmatpush3.bf16.msra.mxu0 %v2905_v37  ;;  %2706 = vmatprep.mubr.bf16.mxu0 %v2275_v21 }
  0x5d   : > { %2712 = vmatprep.subr.bf16.mxu0 %v2907_v49 }
  0x5e   : > { %2621 = vmatpush3.bf16.msra.mxu1 %v2910_v33 }
  0x5f   : > { %2622 = vmatprep.subr.bf16.mxu1 %v2912_v31 }
  0x60   : > { %2713 = vmatpush3.bf16.msra.mxu0 %v2907_v49 }
  0x61   : > { %2714 = vmatprep.subr.bf16.mxu0 %v2909_v3 }
  0x62   : > { %2623 = vmatpush3.bf16.msra.mxu1 %v2912_v31 }
  0x63   : > { %2707 = vmatmul.mubr.bf16.gmra.mrb[4].mxu0 %v2276_v39  ;;  %2624 = vmatprep.subr.bf16.mxu1 %v2914_v4 }
  0x64   : > { %2715 = vmatpush3.bf16.msra.mxu0 %v2909_v3  ;;  %2726 = vmatprep.mubr.msk.bf16.mxu0 %vm3426_vm8, %v3413_v52  ;;  %v2921_v52 = vld [vmem:[%s3650_s3 + $0x1c0] sm:$0xff]  }
  0x65   : > { %2716 = vmatprep.subr.bf16.mxu0 %v2911_v0 }
  0x66   : > { %2625 = vmatpush3.bf16.msra.mxu1 %v2914_v4 }
  0x67   : > { %2626 = vmatprep.subr.bf16.mxu1 %v2916_v16 }
  0x68   : > { %2717 = vmatpush3.bf16.msra.mxu0 %v2911_v0 }
  0x69   : > { %2718 = vmatprep.subr.bf16.mxu0 %v2913_v47 }
  0x6a   : > { %2627 = vmatpush3.bf16.msra.mxu1 %v2916_v16 }
  0x6b   : > { %2628 = vmatprep.subr.bf16.mxu1 %v2918_v23 }
  0x6c   : > { %2719 = vmatpush3.bf16.msra.mxu0 %v2913_v47 }
  0x6d   : > { %2720 = vmatprep.subr.bf16.mxu0 %v2915_v1 }
  0x6e   : > { %2629 = vmatpush3.bf16.msra.mxu1 %v2918_v23 }
  0x6f   : > { %2638 = vmatprep.subr.bf16.mxu1 %v2920_v36 }
  0x70   : > { %2721 = vmatpush3.bf16.msra.mxu0 %v2915_v1 }
  0x71   : > { %2722 = vmatprep.subr.bf16.mxu0 %v2917_v25  ;;  %2631 = vmatmul.mubr.bf16.vlgmr.msra.gmra.mrb[0].mxu1 %v3517_v38 }
  0x72   : > { %2639 = vmatpush3.bf16.msra.mxu1 %v2920_v36  ;;  %2634 = vmatprep.mubr.bf16.mxu1 %v3519_v7 }
  0x73   : > { %2640 = vmatprep.subr.bf16.mxu1 %v2922_v11 }
  0x74   : > { %2723 = vmatpush3.bf16.msra.mxu0 %v2917_v25 }
  0x75   : > { %2724 = vmatprep.subr.bf16.mxu0 %v2919_v59 }
  0x76   : > { %2641 = vmatpush3.bf16.msra.mxu1 %v2922_v11 }
  0x77   : > { %2642 = vmatprep.subr.bf16.mxu1 %v2924_v41 }
  0x78   : > { %2725 = vmatpush3.bf16.msra.mxu0 %v2919_v59 }
  0x79   : > { %2734 = vmatprep.subr.bf16.mxu0 %v2921_v52  ;;  %2635 = vmatmul.mubr.bf16.gmra.mrb[4].mxu1 %v3536_v15 }
  0x7a   : > { %2643 = vmatpush3.bf16.msra.mxu1 %v2924_v41  ;;  %2654 = vmatprep.mubr.msk.bf16.mxu1 %vm3426_vm8, %v3394_v34  ;;  %v2932_v34 = vld [vmem:[%s3650_s3 + $0xf0] sm:$0xff]  }
  0x7b   : > { %2727 = vmatmul.mubr.msk.bf16.vlgmr.msra.gmra.mrb[0].mxu0 %vm3426_vm8, %v3432_v19  ;;  %2644 = vmatprep.subr.bf16.mxu1 %v2926_v50  ;;  %v2927_v19 = vld [vmem:[%s3650_s3 + $0x1d8] sm:$0xff]  }
  0x7c   : > { %2735 = vmatpush3.bf16.msra.mxu0 %v2921_v52  ;;  %2730 = vmatprep.mubr.msk.bf16.mxu0 %vm3426_vm8, %v3464_v63 }
  0x7d   : > { %2736 = vmatprep.subr.bf16.mxu0 %v2923_v61 }
  0x7e   : > { %2645 = vmatpush3.bf16.msra.mxu1 %v2926_v50 }
  0x7f   : > { %2646 = vmatprep.subr.bf16.mxu1 %v2928_v56 }
  0x80   : > { %2737 = vmatpush3.bf16.msra.mxu0 %v2923_v61 }
  0x81   : > { %2738 = vmatprep.subr.bf16.mxu0 %v2925_v10 }
  0x82   : > { %2647 = vmatpush3.bf16.msra.mxu1 %v2928_v56 }
  0x83   : > { %2731 = vmatmul.mubr.bf16.gmra.mrb[4].mxu0 %v2301_v5  ;;  %2648 = vmatprep.subr.bf16.mxu1 %v2930_v8 }
  0x84   : > { %2739 = vmatpush3.bf16.msra.mxu0 %v2925_v10  ;;  %2750 = vmatprep.mubr.bf16.mxu0 %v3238_v22  ;;  %v2933_v22 = vld [vmem:[%s3650_s3 + $0x1f0] sm:$0xff]  }
  0x85   : > { %2740 = vmatprep.subr.bf16.mxu0 %v2927_v19 }
  0x86   : > { %2649 = vmatpush3.bf16.msra.mxu1 %v2930_v8 }
  0x87   : > { %2650 = vmatprep.subr.bf16.mxu1 %v2932_v34 }
  0x88   : > { %2741 = vmatpush3.bf16.msra.mxu0 %v2927_v19 }
  0x89   : > { %2742 = vmatprep.subr.bf16.mxu0 %v2929_v6 }
  0x8a   : > { %2651 = vmatpush3.bf16.msra.mxu1 %v2932_v34 }
  0x8b   : > { %2652 = vmatprep.subr.bf16.mxu1 %v2934_v51 }
  0x8c   : > { %2743 = vmatpush3.bf16.msra.mxu0 %v2929_v6 }
  0x8d   : > { %2744 = vmatprep.subr.bf16.mxu0 %v2931_v54 }
  0x8e   : > { %2653 = vmatpush3.bf16.msra.mxu1 %v2934_v51 }
  0x8f   : > { %2782 = vmatprep.subr.bf16.mxu1 %v2936_v9 }
  0x90   : > { %2745 = vmatpush3.bf16.msra.mxu0 %v2931_v54 }
  0x91   : > { %2746 = vmatprep.subr.bf16.mxu0 %v2933_v22  ;;  %2655 = vmatmul.mubr.msk.bf16.vlgmr.msra.gmra.mrb[0].mxu1 %vm3426_vm8, %v2408_v53 }
  0x92   : > { %2790 = vmatpush3.bf16.msra.mxu1 %v2936_v9  ;;  %2658 = vmatprep.mubr.msk.bf16.mxu1 %vm3426_vm8, %v2411_v24 }
  0x93   : > { %2783 = vmatprep.subr.bf16.mxu1 %v2937_v60 }
  0x94   : > { %2747 = vmatpush3.bf16.msra.mxu0 %v2933_v22 }
  0x95   : > { %2748 = vmatprep.subr.bf16.mxu0 %v2935_v30 }
  0x96   : > { %2791 = vmatpush3.bf16.msra.mxu1 %v2937_v60 }
  0x97   : > { %2784 = vmatprep.subr.bf16.mxu1 %v2938_v43 }
  0x98   : > { %2749 = vmatpush3.bf16.msra.mxu0 %v2935_v30 }
  0x99   : > { %2758 = vmatprep.subr.bf16.mxu0 %v2936_v9  ;;  %2659 = vmatmul.mubr.msk.bf16.gmra.mrb[4].mxu1 %vm3426_vm8, %v3406_v48 }
  0x9a   : > { %2792 = vmatpush3.bf16.msra.mxu1 %v2938_v43  ;;  %2778 = vmatprep.mubr.bf16.mxu1 %v3536_v15 }
  0x9b   : > { %2751 = vmatmul.mubr.bf16.vlgmr.msra.gmra.mrb[0].mxu0 %v3313_v35  ;;  %2785 = vmatprep.subr.bf16.mxu1 %v2939_v29  ;;  %v2943_v35 = vld [vmem:[%s3650_s3 + $0x238] sm:$0xff]  }
  0x9c   : > { %2759 = vmatpush3.bf16.msra.mxu0 %v2936_v9  ;;  %2754 = vmatprep.mubr.bf16.mxu0 %v3377_v13 }
  0x9d   : > { %2760 = vmatprep.subr.bf16.mxu0 %v2937_v60 }
  0x9e   : > { %2793 = vmatpush3.bf16.msra.mxu1 %v2939_v29 }
  0x9f   : > { %2786 = vmatprep.subr.bf16.mxu1 %v2940_v62 }
  0xa0   : > { %2761 = vmatpush3.bf16.msra.mxu0 %v2937_v60 }
  0xa1   : > { %2762 = vmatprep.subr.bf16.mxu0 %v2938_v43 }
  0xa2   : > { %2794 = vmatpush3.bf16.msra.mxu1 %v2940_v62 }
  0xa3   : > { %2755 = vmatmul.mubr.bf16.gmra.mrb[4].mxu0 %v2328_v26  ;;  %2787 = vmatprep.subr.bf16.mxu1 %v2941_v28 }
  0xa4   : > { %2763 = vmatpush3.bf16.msra.mxu0 %v2938_v43  ;;  %2774 = vmatprep.mubr.bf16.mxu0 %v3517_v38 }
  0xa5   : > { %2764 = vmatprep.subr.bf16.mxu0 %v2939_v29 }
  0xa6   : > { %2795 = vmatpush3.bf16.msra.mxu1 %v2941_v28 }
  0xa7   : > { %2788 = vmatprep.subr.bf16.mxu1 %v2942_v32 }
  0xa8   : > { %2765 = vmatpush3.bf16.msra.mxu0 %v2939_v29 }
  0xa9   : > { %2766 = vmatprep.subr.bf16.mxu0 %v2940_v62 }
  0xaa   : > { %2796 = vmatpush3.bf16.msra.mxu1 %v2942_v32 }
  0xab   : > { %2789 = vmatprep.subr.bf16.mxu1 %v2943_v35 }
  0xac   : > { %2767 = vmatpush3.bf16.msra.mxu0 %v2940_v62 }
  0xad   : > { %2768 = vmatprep.subr.bf16.mxu0 %v2941_v28 }
  0xae   : > { %2797 = vmatpush3.bf16.msra.mxu1 %v2943_v35 }
  0xb0   : > { %2769 = vmatpush3.bf16.msra.mxu0 %v2941_v28 }
  0xb1   : > { %2770 = vmatprep.subr.bf16.mxu0 %v2942_v32  ;;  %2779 = vmatmul.mubr.bf16.vlgmr.msra.gmra.mrb[8].mxu1 %v2354_v44 }
  0xb4   : > { %2771 = vmatpush3.bf16.msra.mxu0 %v2942_v32 }
  0xb5   : > { %2772 = vmatprep.subr.bf16.mxu0 %v2943_v35 }
  0xb8   : > { %2773 = vmatpush3.bf16.msra.mxu0 %v2943_v35 }
  0xbb   : > { %2775 = vmatmul.mubr.bf16.vlgmr.msra.gmra.mrb[0].mxu0 %v3519_v7 }
 0x164   : > { %v2656_v42 = vpop.f32.mrb[0].mxu1 }
 0x165   : > { %v1134_v20 = vpop.f32.mrb[1].mxu1 }
 0x166   : > { %v2657_v26 = vpop.f32.mrb[2].mxu1 }
 0x167   : > { %v1137_v13 = vpop.f32.mrb[3].mxu1 }
 0x16c   : > { %v2660_v53 = vpop.f32.mrb[4].mxu1 }
 0x16d   : > { %v1150_v24 = vpop.f32.mrb[5].mxu1 }
 0x16e   : > { %v2661_v48 = vpop.f32.mrb[6].mxu1 }
 0x16f   : > { %v1153_v55 = vpop.f32.mrb[7].mxu1 }
 0x176   : > { %v2756_v2 = vpop.f32.mrb[4].mxu0 }
 0x177   : > { %v2802_v37 = vadd.f32 %v2756_v2, %v2660_v53  ;;  %v1765_v58 = vpop.f32.mrb[5].mxu0 }
 0x178   : > { %v2804_v17 = vadd.f32 %v1765_v58, %v1150_v24  ;;  %v2757_v40 = vpop.f32.mrb[6].mxu0 }
 0x179   : > { %v2806_v14 = vadd.f32 %v2757_v40, %v2661_v48  ;;  %v1768_v44 = vpop.f32.mrb[7].mxu0 }
 0x17a   : > { %v2808_v63 = vadd.f32 %v1768_v44, %v1153_v55 }
 0x184   : > { %v2780_v18 = vpop.f32.mrb[8].mxu1 }
 0x185   : > { %v2803_v33 = vadd.f32 %v2802_v37, %v2780_v18  ;;  %v1910_v12 = vpop.f32.mrb[9].mxu1 }
 0x186   : > { %v2805_v45 = vadd.f32 %v2804_v17, %v1910_v12  ;;  %v2781_v49 = vpop.f32.mrb[10].mxu1 }
 0x187   : > { %v2807_v21 = vadd.f32 %v2806_v14, %v2781_v49  ;;  %v1913_v57 = vpop.f32.mrb[11].mxu1  ;;  %v1953_v6 = vmul.f32 %v2803_v33, %v2803_v33 }
 0x188   : > { %v2809_v31 = vadd.f32 %v2808_v63, %v1913_v57  ;;  %v1951_v56 = vmul.f32 %v2805_v45, %v2805_v45 }
 0x189   : > { %v2453_v46 = vpack.c.bf16 %v2807_v21, %v2803_v33  ;;  %v1954_v9 = vmul.f32 %v2807_v21, %v2807_v21 }
 0x18a   : > { %v2448_v3 = vpack.c.bf16 %v2809_v31, %v2805_v45  ;;  %v1952_v19 = vmul.f32 %v2809_v31, %v2809_v31 }
 0x18b   : > { %2457 = vst [vmem:[%s231_s12 + $0x18] sm:$0xff] %v2453_v46  }
 0x18c   : > { %2456 = vst [vmem:[%s231_s12 + $0x10] sm:$0xff] %v2448_v3  }
 0x18e   : > { %v2776_v39 = vpop.f32.mrb[0].mxu0 }
 0x18f   : > { %v2798_v4 = vadd.f32 %v2776_v39, %v2656_v42  ;;  %v1894_v0 = vpop.f32.mrb[1].mxu0 }
 0x190   : > { %v2799_v16 = vadd.f32 %v1894_v0, %v1134_v20  ;;  %v2777_v47 = vpop.f32.mrb[2].mxu0 }
 0x191   : > { %v2800_v23 = vadd.f32 %v2777_v47, %v2657_v26  ;;  %v1897_v1 = vpop.f32.mrb[3].mxu0  ;;  %v1949_v41 = vmul.f32 %v2798_v4, %v2798_v4 }
 0x192   : > { %v2801_v36 = vadd.f32 %v1897_v1, %v1137_v13  ;;  %v1947_v38 = vmul.f32 %v2799_v16, %v2799_v16 }
 0x193   : > { %v2443_v25 = vpack.c.bf16 %v2800_v23, %v2798_v4  ;;  %v1950_v50 = vmul.f32 %v2800_v23, %v2800_v23 }
 0x194   : > { %v1933_v7 = vadd.f32 %v2801_v36, %v2799_v16  ;;  %v1948_v11 = vmul.f32 %v2801_v36, %v2801_v36  ;;  %v2438_v59 = vpack.c.bf16 %v2801_v36, %v2799_v16 }
 0x195   : > { %2455 = vst [vmem:[%s231_s12 + $0x8] sm:$0xff] %v2443_v25  }
 0x196   : > { %v1934_v52 = vadd.f32 %v2798_v4, %v1933_v7  ;;  %v1955_v15 = vadd.f32 %v1948_v11, %v1947_v38  ;;  %2439 = vst [vmem:[%s231_s12] sm:$0xff] %v2438_v59  }
 0x198   : > { %v1956_v61 = vadd.f32 %v1955_v15, %v1949_v41  ;;  %v1935_v27 = vadd.f32 %v2800_v23, %v1934_v52 }
 0x19a   : > { %v1936_v10 = vadd.f32 %v2805_v45, %v1935_v27  ;;  %v1957_v5 = vadd.f32 %v1956_v61, %v1950_v50 }
 0x19c   : > { %v1937_v8 = vadd.f32 %v2809_v31, %v1936_v10  ;;  %v1958_v34 = vadd.f32 %v1957_v5, %v1951_v56 }
 0x19e   : > { %v1938_v51 = vadd.f32 %v2803_v33, %v1937_v8  ;;  %v1959_v54 = vadd.f32 %v1958_v34, %v1952_v19 }
 0x1a0   : > { %v1939_v22 = vadd.f32 %v2807_v21, %v1938_v51  ;;  %v1960_v60 = vadd.f32 %v1959_v54, %v1953_v6 }
 0x1a2   : > { %v1940_v30 = vrot.slane %v1939_v22, 4  ;;  %v1961_v43 = vadd.f32 %v1960_v60, %v1954_v9 }
 0x1a4   : > { %v1941_v29 = vadd.f32 %v1940_v30, %v1939_v22  ;;  %v1962_v62 = vrot.slane %v1961_v43, 4 }
 0x1a6   : > { %v1942_v28 = vrot.slane %v1941_v29, 2  ;;  %v1963_v32 = vadd.f32 %v1962_v62, %v1961_v43 }
 0x1a8   : > { %v1943_v35 = vadd.f32 %v1942_v28, %v1941_v29  ;;  %v1964_v42 = vrot.slane %v1963_v32, 2 }
 0x1aa   : > { %v1944_v20 = vrot.slane %v1943_v35, 1  ;;  %v1965_v26 = vadd.f32 %v1964_v42, %v1963_v32 }
 0x1ac   : > { %v1945_v13 = vadd.f32 %v1944_v20, %v1943_v35  ;;  %v1966_v53 = vrot.slane %v1965_v26, 1 }
 0x1ae   : > { %1946 = vst [vmem:[%s235_s16] sm:$0x1] %v1945_v13  ;;  %v1967_v24 = vadd.f32 %v1966_v53, %v1965_v26 }
 0x1b0   : > { %1968 = vst [vmem:[%s235_s16 + $0x1] sm:$0x1] %v1967_v24 }
 0x1b1 PF: > { %s16_s18 = sadd.s32 1, %s2950_s18  }
 0x1b2   : > { %p13_p4 = scmp.ge.s32.totalorder %s16_s18, 4  }
 0x1b4   :  { %15 = sbr.rel (!%p13_p4) target bundleno = 1 (0x1), region = 86 }

// kernel: down_block_forward.5
= control target key start
LH: loop header
LB: loop body
LE: loop exit
PB: predicated region body
PF: predicated region fallthrough
CT: control target
= control target key end

     0   :  { %s3300_s12 = smov 0   ;;  %s4211_s0 = inlined_call_operand.vmem [shape: bf16[2,8,54,128], index: 0, kind: input, shape index: {}]   ;;  %s4212_s1 = inlined_call_operand.vmem [shape: bf16[3,3,128,128], index: 1, kind: input, shape index: {}]   ;;  %s4213_s2 = inlined_call_operand.vmem [shape: bf16[2,64,128], index: 2, kind: output, shape index: {0}]   ;;  %s4214_s3 = inlined_call_operand.vmem [shape: f32[2,2,128], index: 3, kind: output, shape index: {1}]  }
   0x1 LB: > { %s2465_s13 = sadd.s32 4294967295, %s3278_s12   ;;  %p2469_p0 = scmp.ge.s32.totalorder %s3278_s12, 1  ;;  %s3278_s12 = sphi %s3300_s12, %s14_s12  }
   0x2   : > { %p140_p1 = scmp.lt.s32.totalorder %s3278_s12, 3 }
   0x4   : > { %p141_p2 = pnand %p2469_p0, %p140_p1 }
   0x6   : > { %144 = sbr.rel (%p141_p2) target bundleno = 434 (0x1b2), region = 28 }
   0xd   : > { %v3181_v0 = vld [vmem:[%s4212_s1 + $0x40] sm:$0xff]   ;;  %p168_p3 = scmp.lt.s32.totalorder %s2465_s13, 1  ;;  %v3183_v2 = vld [vmem:[%s4212_s1 + $0x48] sm:$0xff]   ;;  %v3185_v4 = vld [vmem:[%s4212_s1 + $0x50] sm:$0xff]   ;;  %vm255_vm0 = vsmask.f32 3328 }
   0xe   : > { %v3182_v1 = vld [vmem:[%s4212_s1 + $0x100] sm:$0xff]   ;;  %2876 = vmatprep.subr.bf16.mxu1 %v3181_v0  ;;  %v3184_v3 = vld [vmem:[%s4212_s1 + $0x108] sm:$0xff]   ;;  %v3186_v5 = vld [vmem:[%s4212_s1 + $0x110] sm:$0xff]   ;;  %vm256_vm1 = vsmask.f32 7440  ;;  %vm1619_vm6 = vcmask 1041408  }
   0xf   : > { %2972 = vmatprep.subr.bf16.mxu0 %v3182_v1  ;;  %2877 = vmatpush3.bf16.msra.mxu1 %v3181_v0  ;;  %s4273_s13 = smov (!%p168_p3, %s2465_s13), 1  ;;  %v3187_v6 = vld [vmem:[%s4212_s1 + $0x58] sm:$0xff]   ;;  %v3189_v8 = vld [vmem:[%s4212_s1 + $0x60] sm:$0xff]   ;;  %v3191_v10 = vld [vmem:[%s4212_s1 + $0x68] sm:$0xff]   ;;  %vm1092_vm3 = vsmask.f32 2304 }
  0x10   : > { %2973 = vmatpush3.bf16.msra.mxu0 %v3182_v1  ;;  %2878 = vmatprep.subr.bf16.mxu1 %v3183_v2  ;;  %v3188_v7 = vld [vmem:[%s4212_s1 + $0x118] sm:$0xff]   ;;  %s3172_s30 = smul.u32 224, %s4273_s13  ;;  %v3190_v9 = vld [vmem:[%s4212_s1 + $0x120] sm:$0xff]   ;;  %v3192_v14 = vld [vmem:[%s4212_s1 + $0x128] sm:$0xff]   ;;  %vm1093_vm4 = vsmask.f32 6416 }
  0x11   : > { %2974 = vmatprep.subr.bf16.mxu0 %v3184_v3  ;;  %v3193_v16 = vld [vmem:[%s4212_s1 + $0x70] sm:$0xff]   ;;  %v3195_v32 = vld [vmem:[%s4212_s1 + $0x78] sm:$0xff]   ;;  %vm3392_vm2 = vmor %vm255_vm0, %vm256_vm1  ;;  %vm1620_vm7 = vcmask 1045508   ;;  %vm903_vm9 = vcmask 1042432   ;;  %vm904_vm10 = vcmask 1046532   ;;  %s2736_s16 = sshll.u32 %s4273_s13, 5 }
  0x12   : > { %s3344_s10 = scalar_lea.vmem %s4211_s0, %s3172_s30  ;;  %v3194_v23 = vld [vmem:[%s4212_s1 + $0x130] sm:$0xff]   ;;  %v3196_v37 = vld [vmem:[%s4212_s1 + $0x138] sm:$0xff]   ;;  %v3407_v58 = vld [vmem:[%s4212_s1] sm:$0xff]   ;;  %vm1808_vm12 = vsmask.f32 1280  ;;  %s177_s19 = scalar_lea.vmem %s4213_s2, %s2736_s16 }
  0x13   : > { %2879 = vmatpush3.bf16.msra.mxu1 %v3183_v2  ;;  %v184_v11 = vld [vmem:[%s3344_s10 + $0x4] sm:$0xf]  ;;  %v3351_v12 = vld [vmem:[%s3344_s10 + $0x8] sm:$0xf]  ;;  %v191_v13 = vld [vmem:[%s3344_s10 + $0x20] sm:$0xf] }
  0x14   : > { %2975 = vmatpush3.bf16.msra.mxu0 %v3184_v3  ;;  %2880 = vmatprep.subr.bf16.mxu1 %v3185_v4  ;;  %v3358_v15 = vld [vmem:[%s3344_s10 + $0x24] sm:$0xf]  ;;  %v259_v17 = vshrl.u32 %v184_v11, 16  ;;  %v262_v18 = vshll.u32 %v184_v11, 16  ;;  %v268_v19 = vshll.u32 %v3351_v12, 16  ;;  %v273_v20 = vshrl.u32 %v191_v13, 16  ;;  %vm3421_vm5 = vmor %vm1092_vm3, %vm1093_vm4 }
  0x15   : > { %2976 = vmatprep.subr.bf16.mxu0 %v3186_v5  ;;  %v276_v21 = vshll.u32 %v191_v13, 16  ;;  %v282_v22 = vshll.u32 %v3358_v15, 16  ;;  %v186_v31 = vld [vmem:[%s3344_s10 + $0xc] sm:$0xf]  ;;  %v3381_v34 = vld [vmem:[%s3344_s10 + $0x10] sm:$0xf]  ;;  %vm3800_vm8 = vmor %vm1619_vm6, %vm1620_vm7 }
  0x16   : > { %v261_v24 = vrot.slane %v259_v17, 4  ;;  %v3368_v25 = vrot.slane %v262_v18, 5  ;;  %v275_v26 = vrot.slane %v273_v20, 4  ;;  %v270_v27 = vrot.slane %v268_v19, 5  ;;  %v193_v35 = vld [vmem:[%s3344_s10 + $0x28] sm:$0xf]  ;;  %vm3926_vm11 = vmor %vm903_vm9, %vm904_vm10 }
  0x17   : > { %2881 = vmatpush3.bf16.msra.mxu1 %v3185_v4  ;;  %v3370_v28 = vrot.slane %v276_v21, 5  ;;  %v284_v29 = vrot.slane %v282_v22, 5  ;;  %v3385_v36 = vld [vmem:[%s3344_s10 + $0x2c] sm:$0xf]  ;;  %v1096_v40 = vshrl.u32 %v186_v31, 16  ;;  %v1099_v42 = vshll.u32 %v186_v31, 16 }
  0x18   : > { %2977 = vmatpush3.bf16.msra.mxu0 %v3186_v5  ;;  %2882 = vmatprep.subr.bf16.mxu1 %v3187_v6  ;;  %v265_v33 = vor.u32 %v3368_v25, %v261_v24  ;;  %v1105_v43 = vshrl.u32 %v3381_v34, 16  ;;  %v1108_v44 = vshll.u32 %v3381_v34, 16  ;;  %v1114_v47 = vshrl.u32 %v193_v35, 16  ;;  %v198_v62 = vld [vmem:[%s3344_s10 + $0x3c] sm:$0xf]  ;;  %v3432_v5 = vld [vmem:[%s4212_s1 + $0x140] sm:$0xff]  }
  0x19   : > { %2978 = vmatprep.subr.bf16.mxu0 %v3188_v7  ;;  %v279_v39 = vor.u32 %v3370_v28, %v275_v26  ;;  %v1098_v46 = vrot.slane %v1096_v40, 5  ;;  %v1117_v48 = vshll.u32 %v193_v35, 16  ;;  %v1101_v50 = vrot.slane %v1099_v42, 6  ;;  %v3414_v63 = vld [vmem:[%s3344_s10 + $0x40] sm:$0xf]  ;;  %s2473_s20 = sshll.u32 %s4273_s13, 1 }
  0x1a   : > { %v266_v41 = vrot.slane %v265_v33, 4  ;;  %v1107_v51 = vrot.slane %v1105_v43, 5  ;;  %v1110_v52 = vrot.slane %v1108_v44, 6  ;;  %v1116_v54 = vrot.slane %v1114_v47, 5  ;;  %v206_v11 = vld [vmem:[%s3344_s10 + $0x5c] sm:$0xf]  ;;  %s181_s23 = scalar_lea.vmem %s4214_s3, %s2473_s20 }
  0x1b   : > { %2883 = vmatpush3.bf16.msra.mxu1 %v3187_v6  ;;  %v280_v45 = vrot.slane %v279_v39, 4  ;;  %v1119_v55 = vrot.slane %v1117_v48, 6  ;;  %v1123_v56 = vshrl.u32 %v3385_v36, 16  ;;  %v3409_v59 = vor.u32 %v1101_v50, %v1098_v46  ;;  %v205_v6 = vld [vmem:[%s3344_s10 + $0x58] sm:$0xf] }
  0x1c   : > { %2979 = vmatpush3.bf16.msra.mxu0 %v3188_v7  ;;  %2884 = vmatprep.subr.bf16.mxu1 %v3189_v8  ;;  %v271_v49 = vsel %vm3392_vm2, %v266_v41, %v270_v27  ;;  %v1111_v60 = vor.u32 %v1110_v52, %v1107_v51  ;;  %v1126_v61 = vshll.u32 %v3385_v36, 16  ;;  %v3416_v0 = vrot.slane %v268_v19, 6  ;;  %v3461_v33 = vld [vmem:[%s3344_s10 + $0x48] sm:$0xf]  ;;  %v3468_v48 = vld [vmem:[%s3344_s10 + $0x64] sm:$0xf] }
  0x1d   : > { %2980 = vmatprep.subr.bf16.mxu0 %v3190_v9  ;;  %v285_v53 = vsel %vm3392_vm2, %v280_v45, %v284_v29  ;;  %v3425_v3 = vor.u32 %v1119_v55, %v1116_v54  ;;  %v1125_v4 = vrot.slane %v1123_v56, 5  ;;  %v3437_v7 = vrot.slane %v282_v22, 6  ;;  %v200_v22 = vld [vmem:[%s3344_s10 + $0x44] sm:$0xf]  ;;  %v207_v45 = vld [vmem:[%s3344_s10 + $0x60] sm:$0xf] }
  0x1e   : > { %v2490_v57 = vcombine.low %v271_v49, %v285_v53  ;;  %v296_v17 = vshll.u32 %v3414_v63, 16  ;;  %v301_v20 = vshrl.u32 %v205_v6, 16  ;;  %v304_v21 = vshll.u32 %v205_v6, 16 }
  0x1f   : > { %2885 = vmatpush3.bf16.msra.mxu1 %v3189_v8  ;;  %v1103_v8 = vrot.slane %v3409_v59, 4  ;;  %v1121_v13 = vrot.slane %v3425_v3, 4  ;;  %v310_v27 = vshll.u32 %v206_v11, 16  ;;  %v1407_v42 = vshrl.u32 %v3414_v63, 16 }
  0x20   : > { %2981 = vmatpush3.bf16.msra.mxu0 %v3190_v9  ;;  %2886 = vmatprep.subr.bf16.mxu1 %v3191_v10  ;;  %v1128_v9 = vrot.slane %v1126_v61, 6  ;;  %v303_v31 = vrot.slane %v301_v20, 4  ;;  %v298_v39 = vrot.slane %v296_v17, 5  ;;  %v1132_v49 = vshrl.u32 %v200_v22, 16 }
  0x21   : > { %2982 = vmatprep.subr.bf16.mxu0 %v3192_v14  ;;  %2892 = vmatprep.mubr.bf16.mxu1 %v2490_v57  ;;  %v1112_v18 = vsel %vm3421_vm5, %v1103_v8, %v1111_v60  ;;  %v312_v40 = vrot.slane %v310_v27, 5  ;;  %v1417_v47 = vrot.slane %v310_v27, 6  ;;  %v1135_v50 = vshll.u32 %v200_v22, 16 }
  0x22   : > { %v1129_v19 = vor.u32 %v1128_v9, %v1125_v4  ;;  %v1409_v52 = vrot.slane %v1407_v42, 5  ;;  %v1141_v54 = vshrl.u32 %v3461_v33, 16  ;;  %v1134_v57 = vrot.slane %v1132_v49, 5  ;;  %v3199_v4 = vld [vmem:[%s4212_s1 + $0x8] sm:$0xff]   ;;  %v3203_v49 = vld [vmem:[%s4212_s1 + $0x18] sm:$0xff]  }
  0x23   : > { %2887 = vmatpush3.bf16.msra.mxu1 %v3191_v10  ;;  %v3442_v10 = vrot.slane %v1105_v43, 6  ;;  %v1410_v43 = vrot.slane %v296_v17, 6  ;;  %v1137_v60 = vrot.slane %v1135_v50, 6  ;;  %v3479_v6 = vrot.slane %v1123_v56, 6  ;;  %v212_v50 = vld [vmem:[%s3344_s10 + $0x74] sm:$0xf] }
  0x24   : > { %2983 = vmatpush3.bf16.msra.mxu0 %v3192_v14  ;;  %2888 = vmatprep.subr.bf16.mxu1 %v3193_v16  ;;  %v287_v14 = vshrl.u32 %v198_v62, 16  ;;  %v1130_v29 = vsel %vm3421_vm5, %v1121_v13, %v1129_v19  ;;  %v1150_v17 = vshrl.u32 %v207_v45, 16  ;;  %v1153_v20 = vshll.u32 %v207_v45, 16 }
  0x25   : > { %2984 = vmatprep.subr.bf16.mxu0 %v3194_v23  ;;  %4235 = vst [vmem:[#allocation2_spill] sm:$0xff] %v3442_v10  ;;  %v2594_v35 = vcombine.low %v1112_v18, %v1130_v29  ;;  %4236 = vst [vmem:[#allocation3_spill] sm:$0xff] %v3479_v6  ;;  %v1411_v9 = vor.u32 %v1410_v43, %v1409_v52  ;;  %v3487_v18 = vrot.slane %v1126_v61, 7  ;;  %v1162_v27 = vshll.u32 %v3468_v48, 16  ;;  %v3201_v29 = vld [vmem:[%s4212_s1 + $0x10] sm:$0xff]  }
  0x26   : > { %v289_v24 = vrot.slane %v287_v14, 4  ;;  %v3483_v14 = vor.u32 %v1137_v60, %v1134_v57  ;;  %v219_v52 = vld [vmem:[%s3344_s10 + $0x90] sm:$0xf]  ;;  %v315_v57 = vshrl.u32 %v212_v50, 16  ;;  %v318_v60 = vshll.u32 %v212_v50, 16  ;;  %v3205_v50 = vld [vmem:[%s4212_s1 + $0x20] sm:$0xff]  }
  0x27   : > { %2889 = vmatpush3.bf16.msra.mxu1 %v3193_v16  ;;  %v290_v16 = vshll.u32 %v198_v62, 16  ;;  %2988 = vmatprep.mubr.bf16.mxu0 %v2594_v35  ;;  %v1144_v62 = vshll.u32 %v3461_v33, 16  ;;  %4237 = vst [vmem:[#allocation4_spill] sm:$0xff] %v3487_v18  ;;  %v3496_v35 = vrot.slane %v1141_v54, 6  ;;  %v3504_v42 = vrot.slane %v1162_v27, 7 }
  0x28   : > { %2985 = vmatpush3.bf16.msra.mxu0 %v3194_v23  ;;  %2890 = vmatprep.subr.bf16.mxu1 %v3195_v32  ;;  %v3451_v23 = vrot.slane %v1108_v44, 7  ;;  %v1414_v44 = vshrl.u32 %v206_v11, 16  ;;  %v1143_v11 = vrot.slane %v1141_v54, 5  ;;  %v1139_v56 = vrot.slane %v3483_v14, 4  ;;  %v190_v18 = vld [vmem:[%s3344_s10 + $0x1c] sm:$0xf] }
  0x29   : > { %2986 = vmatprep.subr.bf16.mxu0 %v3196_v37  ;;  %v3454_v26 = vrot.slane %v290_v16, 5  ;;  %v1146_v16 = vrot.slane %v1144_v62, 6  ;;  %4238 = vst [vmem:[#allocation5_spill] sm:$0xff] %v3496_v35  ;;  %4241 = vst [vmem:[#allocation8_spill] sm:$0xff] %v3504_v42  ;;  %vm1809_vm13 = vsmask.f32 5392 }
  0x2a   : > { %v1416_v53 = vrot.slane %v1414_v44, 5  ;;  %vm3982_vm14 = vmor %vm1808_vm12, %vm1809_vm13 }
  0x2b   : > { %2891 = vmatpush3.bf16.msra.mxu1 %v3195_v32  ;;  %v3458_v32 = vrot.slane %v304_v21, 5  ;;  %v1159_v21 = vshrl.u32 %v3468_v48, 16  ;;  %v1147_v22 = vor.u32 %v1146_v16, %v1143_v11  ;;  %v332_v11 = vshll.u32 %v219_v52, 16 }
  0x2c   : > { %2987 = vmatpush3.bf16.msra.mxu0 %v3196_v37  ;;  %2900 = vmatprep.subr.bf16.mxu1 %v3407_v58  ;;  %v293_v37 = vor.u32 %v3454_v26, %v289_v24  ;;  %v1418_v19 = vor.u32 %v1417_v47, %v1416_v53  ;;  %v1152_v24 = vrot.slane %v1150_v17, 5  ;;  %v317_v16 = vrot.slane %v315_v57, 4  ;;  %v3583_v53 = vld [vmem:[%s3344_s10 + $0xb0] sm:$0xf] }
  0x2d   : > { %2996 = vmatprep.subr.bf16.mxu0 %v3432_v5  ;;  %v307_v41 = vor.u32 %v3458_v32, %v303_v31  ;;  %v1155_v31 = vrot.slane %v1153_v20, 6  ;;  %v1161_v61 = vrot.slane %v1159_v21, 5  ;;  %v1148_v45 = vsel %vm3421_vm5, %v1139_v56, %v1147_v22 }
  0x2e   : > { %v294_v46 = vrot.slane %v293_v37, 4  ;;  %v3498_v37 = vrot.slane %v1144_v62, 7  ;;  %v3536_v17 = vrot.slane %v318_v60, 5  ;;  %v3543_v22 = vrot.slane %v332_v11, 5 }
  0x2f   : > { %v308_v51 = vrot.slane %v307_v41, 4  ;;  %v3502_v41 = vrot.slane %v1159_v21, 6  ;;  %v3506_v43 = vor.u32 %v1155_v31, %v1152_v24 }
  0x30   : > { %v299_v55 = vsel %vm3392_vm2, %v294_v46, %v298_v39  ;;  %4239 = vst [vmem:[#allocation6_spill] sm:$0xff] %v3498_v37  ;;  %v3500_v39 = vrot.slane %v1411_v9, 4  ;;  %v329_v9 = vshrl.u32 %v219_v52, 16  ;;  %v321_v31 = vor.u32 %v3536_v17, %v317_v16 }
  0x31   : > { %v313_v8 = vsel %vm3392_vm2, %v308_v51, %v312_v40  ;;  %v1164_v40 = vrot.slane %v1162_v27, 6  ;;  %4240 = vst [vmem:[#allocation7_spill] sm:$0xff] %v3502_v41  ;;  %v3521_v51 = vld [vmem:[%s3344_s10 + $0x78] sm:$0xf]  ;;  %v1157_v54 = vrot.slane %v3506_v43, 4 }
  0x32   : > { %v2491_v13 = vcombine.low %v299_v55, %v313_v8  ;;  %v3528_v55 = vld [vmem:[%s3344_s10 + $0x94] sm:$0xf]  ;;  %v4220_v62 = vshll.u32 %v3521_v51, 16  ;;  %v3531_v8 = vrot.slane %v1418_v19, 4  ;;  %v3200_v19 = vld [vmem:[%s4212_s1 + $0x148] sm:$0xff]   ;;  %v331_v56 = vrot.slane %v329_v9, 4 }
  0x33   : > { %v1165_v46 = vor.u32 %v1164_v40, %v1161_v61  ;;  %v214_v27 = vld [vmem:[%s3344_s10 + $0x7c] sm:$0xf]  ;;  %v3550_v61 = vld [vmem:[%s3344_s10 + $0x80] sm:$0xf]  ;;  %v221_v40 = vld [vmem:[%s3344_s10 + $0x98] sm:$0xf] }
  0x34   : > { %2893 = vmatmul.mubr.bf16.vlgmr.msra.gmra.mrb[0].mxu1 %v2491_v13  ;;  %v4217_v13 = vshll.u32 %v3528_v55, 16  ;;  %v326_v20 = vrot.slane %v4220_v62, 5  ;;  %v1168_v52 = vshrl.u32 %v214_v27, 16  ;;  %v4215_v57 = vshrl.u32 %v3550_v61, 16  ;;  %v235_v62 = vld [vmem:[%s3344_s10 + $0xd0] sm:$0xf] }
  0x35   : > { %2901 = vmatpush3.bf16.msra.mxu1 %v3407_v58  ;;  %v322_v60 = vrot.slane %v321_v31, 4  ;;  %v4216_v9 = vshll.u32 %v3550_v61, 16  ;;  %v1186_v11 = vshrl.u32 %v221_v40, 16  ;;  %v226_v58 = vld [vmem:[%s3344_s10 + $0xac] sm:$0xf] }
  0x36   : > { %2902 = vmatprep.subr.bf16.mxu1 %v3199_v4  ;;  %v340_v24 = vrot.slane %v4217_v13, 5  ;;  %v3606_v13 = vld [vmem:[%s3344_s10 + $0xb8] sm:$0xf] }
  0x37   : > { %v1182_v31 = vrot.slane %v4216_v9, 6 }
  0x39   : > { %2903 = vmatpush3.bf16.msra.mxu1 %v3199_v4  ;;  %v1166_v4 = vsel %vm3421_vm5, %v1157_v54, %v1165_v46  ;;  %v3554_v46 = vld [vmem:[%s3344_s10 + $0x9c] sm:$0xf]  ;;  %v1171_v54 = vshll.u32 %v214_v27, 16  ;;  %v327_v27 = vsel %vm3392_vm2, %v322_v60, %v326_v20  ;;  %v233_v20 = vld [vmem:[%s3344_s10 + $0xc8] sm:$0xf] }
  0x3a   : > { %2904 = vmatprep.subr.bf16.mxu1 %v3201_v29  ;;  %v2595_v21 = vcombine.low %v1148_v45, %v1166_v4  ;;  %v3202_v45 = vld [vmem:[%s4212_s1 + $0x150] sm:$0xff]   ;;  %v1189_v4 = vshll.u32 %v221_v40, 16  ;;  %v1188_v40 = vrot.slane %v1186_v11, 5  ;;  %v3204_v60 = vld [vmem:[%s4212_s1 + $0x158] sm:$0xff]   ;;  %v357_v44 = vshrl.u32 %v233_v20, 16 }
  0x3b   : > { %v1173_v47 = vrot.slane %v1171_v54, 6 }
  0x3c   : > { %2989 = vmatmul.mubr.bf16.vlgmr.msra.gmra.mrb[0].mxu0 %v2595_v21  ;;  %v1170_v21 = vrot.slane %v1168_v52, 5  ;;  %v359_v1 = vrot.slane %v357_v44, 4 }
  0x3d   : > { %2905 = vmatpush3.bf16.msra.mxu1 %v3201_v29  ;;  %v335_v29 = vor.u32 %v3543_v22, %v331_v56  ;;  %2997 = vmatpush3.bf16.msra.mxu0 %v3432_v5  ;;  %v1179_v56 = vrot.slane %v4215_v57, 5  ;;  %v3207_v5 = vld [vmem:[%s4212_s1 + $0x28] sm:$0xff]   ;;  %v4219_v57 = vshll.u32 %v3554_v46, 16 }
  0x3e   : > { %2906 = vmatprep.subr.bf16.mxu1 %v3203_v49  ;;  %2998 = vmatprep.subr.bf16.mxu0 %v3200_v19  ;;  %v3578_v54 = vor.u32 %v1173_v47, %v1170_v21  ;;  %v3592_v47 = vld [vmem:[%s3344_s10 + $0xcc] sm:$0xf] }
  0x3f   : > { %v336_v16 = vrot.slane %v335_v29, 4  ;;  %v1191_v29 = vrot.slane %v1189_v4, 6  ;;  %v1183_v4 = vor.u32 %v1182_v31, %v1179_v56  ;;  %v346_v56 = vshll.u32 %v226_v58, 16  ;;  %v228_v31 = vld [vmem:[%s3344_s10 + $0xb4] sm:$0xf] }
  0x40   : > { %v1175_v21 = vrot.slane %v3578_v54, 4  ;;  %v4224_v30 = vshll.u32 %v3592_v47, 16  ;;  %v1204_v41 = vshrl.u32 %v228_v31, 16 }
  0x41   : > { %2907 = vmatpush3.bf16.msra.mxu1 %v3203_v49  ;;  %v341_v52 = vsel %vm3392_vm2, %v336_v16, %v340_v24  ;;  %v4218_v49 = vshrl.u32 %v3554_v46, 16  ;;  %2999 = vmatpush3.bf16.msra.mxu0 %v3200_v19  ;;  %v3589_v9 = vor.u32 %v1191_v29, %v1188_v40  ;;  %v343_v24 = vshrl.u32 %v226_v58, 16  ;;  %v3209_v16 = vld [vmem:[%s4212_s1 + $0x30] sm:$0xff]  }
  0x42   : > { %2908 = vmatprep.subr.bf16.mxu1 %v3205_v50  ;;  %v2492_v11 = vcombine.low %v327_v27, %v341_v52  ;;  %3000 = vmatprep.subr.bf16.mxu0 %v3202_v45  ;;  %v1200_v27 = vrot.slane %v4219_v57, 6  ;;  %v4225_v52 = vshll.u32 %v3583_v53, 16  ;;  %v1184_v58 = vsel %vm3421_vm5, %v1175_v21, %v1183_v4  ;;  %v3625_v21 = vld [vmem:[%s3344_s10 + $0xd4] sm:$0xf] }
  0x43   : > { %v1197_v19 = vrot.slane %v4218_v49, 5  ;;  %v1193_v40 = vrot.slane %v3589_v9, 4  ;;  %v345_v29 = vrot.slane %v343_v24, 4  ;;  %v3206_v49 = vld [vmem:[%s4212_s1 + $0x160] sm:$0xff]   ;;  %v1206_v44 = vrot.slane %v1204_v41, 5 }
  0x44   : > { %2896 = vmatprep.mubr.bf16.mxu1 %v2492_v11  ;;  %v360_v11 = vshll.u32 %v233_v20, 16  ;;  %v354_v24 = vrot.slane %v4225_v52, 5  ;;  %v1207_v20 = vshll.u32 %v228_v31, 16  ;;  %v1216_v31 = vshll.u32 %v3606_v13, 16 }
  0x45   : > { %2909 = vmatpush3.bf16.msra.mxu1 %v3205_v50  ;;  %v1201_v57 = vor.u32 %v1200_v27, %v1197_v19  ;;  %v3613_v50 = vrot.slane %v346_v56, 5  ;;  %3001 = vmatpush3.bf16.msra.mxu0 %v3202_v45  ;;  %v368_v19 = vrot.slane %v4224_v30, 5  ;;  %v1213_v27 = vshrl.u32 %v3606_v13, 16  ;;  %v183_v30 = vld [vmem:[%s3344_s10] sm:$0xf] }
  0x46   : > { %2910 = vmatprep.subr.bf16.mxu1 %v3207_v5  ;;  %3002 = vmatprep.subr.bf16.mxu0 %v3204_v60  ;;  %v3622_v4 = vrot.slane %v360_v11, 5  ;;  %v1231_v11 = vshrl.u32 %v3625_v21, 16  ;;  %v1218_v52 = vrot.slane %v1216_v31, 6 }
  0x47   : > { %v1202_v42 = vsel %vm3421_vm5, %v1193_v40, %v1201_v57  ;;  %v349_v35 = vor.u32 %v3613_v50, %v345_v29  ;;  %v3208_v57 = vld [vmem:[%s4212_s1 + $0x168] sm:$0xff]   ;;  %v1209_v29 = vrot.slane %v1207_v20, 6  ;;  %v1215_v41 = vrot.slane %v1213_v27, 5 }
  0x48   : > { %v2596_v45 = vcombine.low %v1184_v58, %v1202_v42  ;;  %v363_v40 = vor.u32 %v3622_v4, %v359_v1  ;;  %v3211_v42 = vld [vmem:[%s4212_s1 + $0x38] sm:$0xff]   ;;  %v1225_v58 = vshll.u32 %v235_v62, 16 }
  0x49   : > { %2911 = vmatpush3.bf16.msra.mxu1 %v3207_v5  ;;  %v350_v56 = vrot.slane %v349_v35, 4  ;;  %3003 = vmatpush3.bf16.msra.mxu0 %v3204_v60  ;;  %v1222_v5 = vshrl.u32 %v235_v62, 16  ;;  %v3642_v20 = vor.u32 %v1209_v29, %v1206_v44  ;;  %v1233_v60 = vrot.slane %v1231_v11, 5  ;;  %v3210_v62 = vld [vmem:[%s4212_s1 + $0x170] sm:$0xff]  }
  0x4a   : > { %2912 = vmatprep.subr.bf16.mxu1 %v3209_v16  ;;  %2992 = vmatprep.mubr.bf16.mxu0 %v2596_v45  ;;  %v364_v35 = vrot.slane %v363_v40, 4  ;;  %v1227_v6 = vrot.slane %v1225_v58, 6  ;;  %v1234_v45 = vshll.u32 %v3625_v21, 16  ;;  %v1219_v44 = vor.u32 %v1218_v52, %v1215_v41 }
  0x4b   : > { %3004 = vmatprep.subr.bf16.mxu0 %v3206_v49  ;;  %v355_v1 = vsel %vm3392_vm2, %v350_v56, %v354_v24  ;;  %v1224_v37 = vrot.slane %v1222_v5, 5  ;;  %v1211_v24 = vrot.slane %v3642_v20, 4  ;;  %v3652_v56 = vrot.slane %v1213_v27, 6 }
  0x4c   : > { %v369_v10 = vsel %vm3392_vm2, %v364_v35, %v368_v19  ;;  %v1236_v5 = vrot.slane %v1234_v45, 6  ;;  %v3659_v58 = vrot.slane %v1216_v31, 7  ;;  %v3663_v52 = vrot.slane %v1231_v11, 6  ;;  %v197_v35 = vld [vmem:[%s3344_s10 + $0x38] sm:$0xf] }
  0x4d   : > { %2913 = vmatpush3.bf16.msra.mxu1 %v3209_v16  ;;  %4242 = vst [vmem:[#allocation9_spill] sm:$0xff] %v3652_v56  ;;  %v3214_v16 = vld [vmem:[%s4212_s1 + $0x80] sm:$0xff]   ;;  %3005 = vmatpush3.bf16.msra.mxu0 %v3206_v49  ;;  %v2493_v40 = vcombine.low %v355_v1, %v369_v10  ;;  %v3657_v29 = vor.u32 %v1227_v6, %v1224_v37  ;;  %v3665_v27 = vrot.slane %v1234_v45, 7  ;;  %v654_v37 = vshrl.u32 %v183_v30, 16 }
  0x4e   : > { %2914 = vmatprep.subr.bf16.mxu1 %v3211_v42  ;;  %3006 = vmatprep.subr.bf16.mxu0 %v3208_v57  ;;  %v1220_v19 = vsel %vm3421_vm5, %v1211_v24, %v1219_v44  ;;  %v2502_v41 = vcombine.low %v183_v30, %v190_v18  ;;  %v1237_v10 = vor.u32 %v1236_v5, %v1233_v60  ;;  %v657_v1 = vshll.u32 %v183_v30, 16  ;;  %v204_v24 = vld [vmem:[%s3344_s10 + $0x54] sm:$0xf]  ;;  %v3212_v30 = vld [vmem:[%s4212_s1 + $0x178] sm:$0xff]  }
  0x4f   : > { %2897 = vmatmul.mubr.bf16.gmra.mrb[4].mxu1 %v2493_v40  ;;  %v1229_v49 = vrot.slane %v3657_v29, 4  ;;  %v2146_v31 = vor.u32 %v3665_v27, %v3663_v52  ;;  %v664_v11 = vshrl.u32 %v190_v18, 16  ;;  %v667_v44 = vshll.u32 %v190_v18, 16 }
  0x50   : > { %2916 = vmatprep.mubr.bf16.mxu1 %v2502_v41  ;;  %v4243_v60 = vshrl.u32 %v3351_v12, 16  ;;  %v4244_v5 = vshrl.u32 %v3358_v15, 16  ;;  %v1413_v18 = vsel %vm3421_vm5, %v3500_v39, %v3483_v14  ;;  %v1420_v12 = vsel %vm3421_vm5, %v3531_v8, %v3506_v43  ;;  %v3215_v14 = vld [vmem:[%s4212_s1 + $0x180] sm:$0xff]  }
  0x51   : > { %2915 = vmatpush3.bf16.msra.mxu1 %v3211_v42  ;;  %3007 = vmatpush3.bf16.msra.mxu0 %v3208_v57  ;;  %v1238_v45 = vsel %vm3421_vm5, %v1229_v49, %v1237_v10  ;;  %v3683_v42 = vrot.slane %v654_v37, 4  ;;  %v674_v41 = vshrl.u32 %v197_v35, 16  ;;  %v3217_v49 = vld [vmem:[%s4212_s1 + $0x88] sm:$0xff]   ;;  %v3698_v10 = vrot.slane %v657_v1, 5 }
  0x52   : > { %2924 = vmatprep.subr.bf16.mxu1 %v3214_v16  ;;  %v1395_v40 = vrot.slane %v4243_v60, 5  ;;  %v1402_v6 = vrot.slane %v4244_v5, 5  ;;  %3008 = vmatprep.subr.bf16.mxu0 %v3210_v62  ;;  %v2597_v56 = vcombine.low %v1220_v19, %v1238_v45  ;;  %v2503_v19 = vcombine.low %v197_v35, %v204_v24  ;;  %v218_v5 = vld [vmem:[%s3344_s10 + $0x8c] sm:$0xf] }
  0x53   : > { %v677_v39 = vshll.u32 %v197_v35, 16  ;;  %v684_v37 = vshrl.u32 %v204_v24, 16  ;;  %v687_v43 = vshll.u32 %v204_v24, 16 }
  0x54   : > { %v1397_v15 = vor.u32 %v3416_v0, %v1395_v40  ;;  %v1404_v57 = vor.u32 %v3437_v7, %v1402_v6  ;;  %2993 = vmatmul.mubr.bf16.gmra.mrb[4].mxu0 %v2597_v56  ;;  %v3703_v0 = vrot.slane %v664_v11, 4  ;;  %v3705_v7 = vrot.slane %v667_v44, 5  ;;  %v3219_v11 = vld [vmem:[%s4212_s1 + $0x90] sm:$0xff]  }
  0x55   : > { %3009 = vmatpush3.bf16.msra.mxu0 %v3210_v62  ;;  %v3707_v56 = vrot.slane %v674_v41, 4  ;;  %v3709_v1 = vrot.slane %v677_v39, 5  ;;  %v3711_v45 = vrot.slane %v684_v37, 4  ;;  %v3713_v60 = vrot.slane %v687_v43, 5  ;;  %v211_v40 = vld [vmem:[%s3344_s10 + $0x70] sm:$0xf] }
  0x56   : > { %v1398_v8 = vrot.slane %v1397_v15, 4  ;;  %v1405_v6 = vrot.slane %v1404_v57, 4  ;;  %3010 = vmatprep.subr.bf16.mxu0 %v3212_v30  ;;  %v2623_v44 = vcombine.low %v1413_v18, %v1420_v12  ;;  %v694_v15 = vshrl.u32 %v211_v40, 16  ;;  %v3220_v37 = vld [vmem:[%s4212_s1 + $0x190] sm:$0xff]   ;;  %v3221_v43 = vld [vmem:[%s4212_s1 + $0x98] sm:$0xff]  }
  0x57   : > { %2917 = vmatmul.mubr.bf16.vlgmr.msra.gmra.mrb[0].mxu1 %v2503_v19  ;;  %v697_v57 = vshll.u32 %v211_v40, 16  ;;  %v2504_v19 = vcombine.low %v211_v40, %v218_v5  ;;  %v707_v18 = vshll.u32 %v218_v5, 16  ;;  %v1428_v39 = vshrl.u32 %v3528_v55, 16  ;;  %v232_v40 = vld [vmem:[%s3344_s10 + $0xc4] sm:$0xf] }
  0x58   : > { %v1399_v62 = vsel %vm3421_vm5, %v1398_v8, %v3409_v59  ;;  %v1406_v35 = vsel %vm3421_vm5, %v1405_v6, %v3425_v3  ;;  %2925 = vmatpush3.bf16.msra.mxu1 %v3214_v16  ;;  %v660_v59 = vor.u32 %v3698_v10, %v3683_v42  ;;  %v3218_v3 = vld [vmem:[%s4212_s1 + $0x188] sm:$0xff]   ;;  %v704_v16 = vshrl.u32 %v218_v5, 16 }
  0x59   : > { %v2622_v24 = vcombine.low %v1399_v62, %v1406_v35  ;;  %3011 = vmatpush3.bf16.msra.mxu0 %v3212_v30  ;;  %2926 = vmatprep.subr.bf16.mxu1 %v3217_v49  ;;  %v1421_v30 = vshrl.u32 %v3521_v51, 16  ;;  %v3732_v12 = vrot.slane %v694_v15, 4  ;;  %v3734_v41 = vrot.slane %v697_v57, 5 }
  0x5a   : > { %3020 = vmatprep.subr.bf16.mxu0 %v3215_v14  ;;  %v4245_v42 = vshll.u32 %v3521_v51, 16  ;;  %v3745_v8 = vrot.slane %v704_v16, 4  ;;  %v4246_v62 = vshll.u32 %v3528_v55, 16  ;;  %v670_v35 = vor.u32 %v3705_v7, %v3703_v0  ;;  %2920 = vmatprep.mubr.bf16.mxu1 %v2504_v19 }
  0x5b   : > { %3012 = vmatprep.mubr.bf16.mxu0 %v2622_v24  ;;  %v1423_v6 = vrot.slane %v1421_v30, 5  ;;  %v1430_v24 = vrot.slane %v1428_v39, 5  ;;  %v680_v5 = vor.u32 %v3709_v1, %v3707_v56  ;;  %v690_v15 = vor.u32 %v3713_v60, %v3711_v45  ;;  %v3223_v60 = vld [vmem:[%s4212_s1 + $0xa0] sm:$0xff]  }
  0x5c   : > { %v1424_v10 = vrot.slane %v4245_v42, 6  ;;  %3013 = vmatmul.mubr.bf16.vlgmr.msra.gmra.mrb[0].mxu0 %v2623_v44  ;;  %2927 = vmatpush3.bf16.msra.mxu1 %v3217_v49  ;;  %v1431_v51 = vrot.slane %v4246_v62, 6  ;;  %v3751_v49 = vrot.slane %v707_v18, 5  ;;  %v225_v44 = vld [vmem:[%s3344_s10 + $0xa8] sm:$0xf]  ;;  %v1435_v7 = vshrl.u32 %v3583_v53, 16 }
  0x5d   : > { %3021 = vmatpush3.bf16.msra.mxu0 %v3215_v14  ;;  %2928 = vmatprep.subr.bf16.mxu1 %v3219_v11  ;;  %v2505_v57 = vcombine.low %v225_v44, %v232_v40  ;;  %v714_v16 = vshrl.u32 %v225_v44, 16  ;;  %v717_v30 = vshll.u32 %v225_v44, 16  ;;  %v724_v14 = vshrl.u32 %v232_v40, 16  ;;  %v3222_v62 = vld [vmem:[%s4212_s1 + $0x198] sm:$0xff]  }
  0x5e   : > { %3022 = vmatprep.subr.bf16.mxu0 %v3218_v3  ;;  %v1425_v55 = vor.u32 %v1424_v10, %v1423_v6  ;;  %v1432_v0 = vor.u32 %v1431_v51, %v1430_v24  ;;  %v700_v18 = vor.u32 %v3734_v41, %v3732_v12  ;;  %v727_v56 = vshll.u32 %v232_v40, 16  ;;  %v3229_v12 = vld [vmem:[%s4212_s1 + $0x1b0] sm:$0xff]   ;;  %v3233_v41 = vld [vmem:[%s4212_s1 + $0xc0] sm:$0xff]  }
  0x5f   : > { %v3762_v39 = vrot.slane %v714_v16, 4  ;;  %v4247_v1 = vshll.u32 %v3583_v53, 16  ;;  %v3769_v10 = vrot.slane %v717_v30, 5  ;;  %v3771_v6 = vrot.slane %v724_v14, 4  ;;  %2921 = vmatmul.mubr.bf16.gmra.mrb[4].mxu1 %v2505_v57  ;;  %v3786_v30 = vld [vmem:[%s3344_s10 + $0x14] sm:$0xf] }
  0x60   : > { %2929 = vmatpush3.bf16.msra.mxu1 %v3219_v11  ;;  %v1426_v42 = vrot.slane %v1425_v55, 4  ;;  %v1433_v19 = vrot.slane %v1432_v0, 4  ;;  %v1437_v11 = vrot.slane %v1435_v7, 5  ;;  %v4248_v51 = vshll.u32 %v3592_v47, 16 }
  0x61   : > { %v1438_v45 = vrot.slane %v4247_v1, 6  ;;  %3023 = vmatpush3.bf16.msra.mxu0 %v3218_v3  ;;  %2930 = vmatprep.subr.bf16.mxu1 %v3221_v43  ;;  %v1442_v3 = vshrl.u32 %v3592_v47, 16  ;;  %v661_v44 = vrot.slane %v660_v59, 4  ;;  %v671_v16 = vrot.slane %v670_v35, 4  ;;  %v3796_v59 = vld [vmem:[%s3344_s10 + $0x30] sm:$0xf] }
  0x62   : > { %3024 = vmatprep.subr.bf16.mxu0 %v3220_v37  ;;  %v1427_v53 = vsel %vm3421_vm5, %v1426_v42, %v3578_v54  ;;  %v1445_v24 = vrot.slane %v4248_v51, 6  ;;  %v1434_v40 = vsel %vm3421_vm5, %v1433_v19, %v3589_v9  ;;  %v2634_v0 = vrot.slane %v3381_v34, 10  ;;  %v3224_v54 = vld [vmem:[%s4212_s1 + $0x1a0] sm:$0xff]  }
  0x63   : > { %v1439_v55 = vor.u32 %v1438_v45, %v1437_v11  ;;  %v2624_v57 = vcombine.low %v1427_v53, %v1434_v40  ;;  %v1444_v14 = vrot.slane %v1442_v3, 5  ;;  %v662_v47 = vsel %vm3392_vm2, %v661_v44, %v3368_v25  ;;  %v3814_v11 = vld [vmem:[%s3344_s10 + $0x4c] sm:$0xf]  ;;  %v3817_v53 = vld [vmem:[%s3344_s10 + $0x68] sm:$0xf]  ;;  %v3228_v3 = vld [vmem:[%s4212_s1 + $0xb0] sm:$0xff]  }
  0x64   : > { %2931 = vmatpush3.bf16.msra.mxu1 %v3221_v43  ;;  %v1624_v34 = vrot.slane %v3786_v30, 6  ;;  %v3225_v43 = vld [vmem:[%s4212_s1 + $0xa8] sm:$0xff]   ;;  %v672_v25 = vsel %vm3392_vm2, %v671_v16, %v3370_v28  ;;  %v2635_v7 = vrot.slane %v3385_v36, 10  ;;  %v1628_v42 = vrot.slane %v3796_v59, 6 }
  0x65   : > { %3025 = vmatpush3.bf16.msra.mxu0 %v3220_v37  ;;  %2932 = vmatprep.subr.bf16.mxu1 %v3223_v60  ;;  %v1440_v35 = vrot.slane %v1439_v55, 4  ;;  %v729_v1 = vrot.slane %v727_v56, 5  ;;  %v1446_v45 = vor.u32 %v1445_v24, %v1444_v14  ;;  %v2530_v19 = vcombine.low %v662_v47, %v672_v25  ;;  %v3231_v14 = vld [vmem:[%s4212_s1 + $0xb8] sm:$0xff]   ;;  %v3890_v25 = vld [vmem:[%s3344_s10 + $0xa0] sm:$0xf] }
  0x66   : > { %3026 = vmatprep.subr.bf16.mxu0 %v3222_v62  ;;  %3016 = vmatprep.mubr.bf16.mxu0 %v2624_v57  ;;  %v681_v37 = vrot.slane %v680_v5, 4  ;;  %v1625_v36 = vsel %vm3800_vm8, %v2634_v0, %v1624_v34  ;;  %v691_v51 = vrot.slane %v690_v15, 4  ;;  %v2636_v56 = vrot.slane %v3461_v33, 10 }
  0x67   : > { %v1441_v28 = vsel %vm3421_vm5, %v1440_v35, %v3642_v20  ;;  %v1447_v5 = vrot.slane %v1446_v45, 4  ;;  %2940 = vmatprep.mubr.bf16.mxu1 %v2530_v19  ;;  %v1629_v24 = vsel %vm3800_vm8, %v2635_v7, %v1628_v42  ;;  %v1632_v40 = vrot.slane %v3814_v11, 6  ;;  %v3887_v35 = vld [vmem:[%s3344_s10 + $0x84] sm:$0xf] }
  0x68   : > { %2933 = vmatpush3.bf16.msra.mxu1 %v3223_v60  ;;  %v682_v44 = vsel %vm3392_vm2, %v681_v37, %v3454_v26  ;;  %v692_v20 = vsel %vm3392_vm2, %v691_v51, %v3458_v32  ;;  %v2637_v33 = vrot.slane %v3468_v48, 10  ;;  %v1636_v15 = vrot.slane %v3817_v53, 6  ;;  %v3226_v26 = vld [vmem:[%s4212_s1 + $0x1a8] sm:$0xff]   ;;  %v3909_v37 = vld [vmem:[%s3344_s10 + $0xd8] sm:$0xf] }
  0x69   : > { %3027 = vmatpush3.bf16.msra.mxu0 %v3222_v62  ;;  %2934 = vmatprep.subr.bf16.mxu1 %v3225_v43  ;;  %v710_v60 = vor.u32 %v3751_v49, %v3745_v8  ;;  %v1448_v62 = vsel %vm3421_vm5, %v1447_v5, %v3657_v29  ;;  %v3847_v55 = vcombine.low %v682_v44, %v692_v20  ;;  %v701_v29 = vrot.slane %v700_v18, 4 }
  0x6a   : > { %3028 = vmatprep.subr.bf16.mxu0 %v3224_v54  ;;  %v3851_v32 = vsel %vm3800_vm8, %v2636_v56, %v1632_v40  ;;  %v2625_v48 = vcombine.low %v1441_v28, %v1448_v62  ;;  %v2658_v16 = vcombine.low %v1625_v36, %v1629_v24  ;;  %v3855_v8 = vsel %vm3800_vm8, %v2637_v33, %v1636_v15  ;;  %v3258_v56 = vld [vmem:[%s3344_s10 + $0x8] sm:$0xf]  ;;  %v3234_v24 = vld [vmem:[%s4212_s1 + $0x1c0] sm:$0xff]   ;;  %v3259_v33 = vld [vmem:[%s3344_s10 + $0xc] sm:$0xf] }
  0x6b   : > { %v720_v49 = vor.u32 %v3769_v10, %v3762_v39  ;;  %v2659_v2 = vcombine.low %v3851_v32, %v3855_v8  ;;  %v711_v0 = vrot.slane %v710_v60, 4  ;;  %v730_v57 = vor.u32 %v729_v1, %v3771_v6  ;;  %v3232_v6 = vld [vmem:[%s4212_s1 + $0x1b8] sm:$0xff]   ;;  %v3235_v1 = vld [vmem:[%s4212_s1 + $0xc8] sm:$0xff]   ;;  %v3238_v8 = vld [vmem:[%s4212_s1 + $0x1d0] sm:$0xff]  }
  0x6c   : > { %2935 = vmatpush3.bf16.msra.mxu1 %v3225_v43  ;;  %v2544_v39 = vrot.slane %v3414_v63, 9  ;;  %3017 = vmatmul.mubr.bf16.gmra.mrb[4].mxu0 %v2625_v48  ;;  %v2638_v34 = vrot.slane %v3550_v61, 10  ;;  %v2639_v43 = vrot.slane %v3554_v46, 10  ;;  %v2640_v7 = vrot.slane %v3606_v13, 10  ;;  %v3261_v48 = vld [vmem:[%s3344_s10 + $0x28] sm:$0xf] }
  0x6d   : > { %3029 = vmatpush3.bf16.msra.mxu0 %v3224_v54  ;;  %2936 = vmatprep.subr.bf16.mxu1 %v3228_v3  ;;  %v721_v18 = vrot.slane %v720_v49, 4  ;;  %v731_v10 = vrot.slane %v730_v57, 4  ;;  %v702_v54 = vsel %vm3392_vm2, %v701_v29, %v3536_v17  ;;  %v712_v47 = vsel %vm3392_vm2, %v711_v0, %v3543_v22  ;;  %v189_v49 = vld [vmem:[%s3344_s10 + $0x18] sm:$0x7]  ;;  %v196_v57 = vld [vmem:[%s3344_s10 + $0x34] sm:$0x7] }
  0x6e   : > { %3030 = vmatprep.subr.bf16.mxu0 %v3226_v26  ;;  %3036 = vmatprep.mubr.bf16.mxu0 %v2658_v16  ;;  %v2641_v17 = vrot.slane %v3625_v21, 10  ;;  %v1640_v22 = vrot.slane %v3887_v35, 6  ;;  %v1644_v42 = vrot.slane %v3890_v25, 6  ;;  %v2532_v45 = vcombine.low %v702_v54, %v712_v47  ;;  %v3906_v21 = vld [vmem:[%s3344_s10 + $0xbc] sm:$0xf] }
  0x6f   : > { %v722_v19 = vsel %vm3392_vm2, %v721_v18, %v3613_v50  ;;  %v732_v13 = vsel %vm3392_vm2, %v731_v10, %v3622_v4  ;;  %v1648_v50 = vrot.slane %v3906_v21, 6  ;;  %v1652_v38 = vrot.slane %v3909_v37, 6  ;;  %v3922_v4 = vld [vmem:[%s3344_s10 + $0x5c] sm:$0xf]  ;;  %v3236_v10 = vld [vmem:[%s4212_s1 + $0x1c8] sm:$0xff]  }
  0x70   : > { %2937 = vmatpush3.bf16.msra.mxu1 %v3228_v3  ;;  %v3913_v3 = vsel %vm3800_vm8, %v2638_v34, %v1640_v22  ;;  %v3917_v28 = vsel %vm3800_vm8, %v2639_v43, %v1644_v42  ;;  %v2545_v36 = vrot.slane %v3922_v4, 9  ;;  %v2542_v5 = vrot.slane %v3258_v56, 9  ;;  %v203_v42 = vld [vmem:[%s3344_s10 + $0x50] sm:$0x7]  ;;  %v3263_v56 = vld [vmem:[%s3344_s10 + $0x60] sm:$0xf] }
  0x71   : > { %3031 = vmatpush3.bf16.msra.mxu0 %v3226_v26  ;;  %2938 = vmatprep.subr.bf16.mxu1 %v3231_v14  ;;  %v2533_v44 = vcombine.low %v722_v19, %v732_v13  ;;  %v3936_v40 = vsel %vm3800_vm8, %v2640_v7, %v1648_v50  ;;  %v3940_v20 = vsel %vm3800_vm8, %v2641_v17, %v1652_v38  ;;  %v908_v15 = vrot.slane %v3259_v33, 5  ;;  %v3260_v26 = vld [vmem:[%s3344_s10 + $0x24] sm:$0xf] }
  0x72   : > { %3032 = vmatprep.subr.bf16.mxu0 %v3229_v12  ;;  %v2660_v60 = vcombine.low %v3913_v3, %v3917_v28  ;;  %v2543_v62 = vrot.slane %v3260_v26, 9  ;;  %v912_v16 = vrot.slane %v3261_v48, 5  ;;  %v1812_v29 = vshrl.u32 %v3786_v30, 16  ;;  %v3262_v13 = vld [vmem:[%s3344_s10 + $0x44] sm:$0xf] }
  0x73   : > { %v2661_v9 = vcombine.low %v3936_v40, %v3940_v20  ;;  %v909_v0 = vsel %vm3926_vm11, %v2542_v5, %v908_v15  ;;  %v1821_v18 = vshrl.u32 %v189_v49, 16  ;;  %v1824_v54 = vshll.u32 %v189_v49, 16  ;;  %v3241_v4 = vld [vmem:[%s4212_s1 + $0xe0] sm:$0xff]   ;;  %v3266_v40 = vld [vmem:[%s3344_s10 + $0x94] sm:$0xf] }
  0x74   : > { %2939 = vmatpush3.bf16.msra.mxu1 %v3231_v14  ;;  %v913_v14 = vsel %vm3926_vm11, %v2543_v62, %v912_v16  ;;  %v1830_v47 = vshrl.u32 %v3796_v59, 16  ;;  %v1833_v34 = vshll.u32 %v3796_v59, 16  ;;  %v1839_v17 = vshrl.u32 %v196_v57, 16  ;;  %v3239_v59 = vld [vmem:[%s4212_s1 + $0xd8] sm:$0xff]   ;;  %v210_v62 = vld [vmem:[%s3344_s10 + $0x6c] sm:$0x7] }
  0x75   : > { %3033 = vmatpush3.bf16.msra.mxu0 %v3229_v12  ;;  %2948 = vmatprep.subr.bf16.mxu1 %v3233_v41  ;;  %v1814_v12 = vrot.slane %v1812_v29, 6  ;;  %v1823_v7 = vrot.slane %v1821_v18, 6  ;;  %v1842_v22 = vshll.u32 %v196_v57, 16  ;;  %v916_v3 = vrot.slane %v3262_v13, 5 }
  0x76   : > { %3034 = vmatprep.subr.bf16.mxu0 %v3232_v6  ;;  %v1835_v19 = vrot.slane %v1833_v34, 7  ;;  %v1841_v50 = vrot.slane %v1839_v17, 6  ;;  %v920_v32 = vrot.slane %v3263_v56, 5  ;;  %v1848_v33 = vshrl.u32 %v3814_v11, 16  ;;  %v3243_v17 = vld [vmem:[%s4212_s1 + $0xe8] sm:$0xff]  }
  0x77   : > { %2941 = vmatmul.mubr.bf16.vlgmr.msra.gmra.mrb[0].mxu1 %v3847_v55  ;;  %v3237_v55 = vld [vmem:[%s4212_s1 + $0xd0] sm:$0xff]   ;;  %v1844_v38 = vrot.slane %v1842_v22, 7  ;;  %v1851_v48 = vshll.u32 %v3814_v11, 16  ;;  %v1857_v16 = vshrl.u32 %v203_v42, 16  ;;  %v1860_v49 = vshll.u32 %v203_v42, 16 }
  0x78   : > { %2949 = vmatpush3.bf16.msra.mxu1 %v3233_v41  ;;  %2944 = vmatprep.mubr.bf16.mxu1 %v2532_v45  ;;  %v1815_v41 = vshll.u32 %v3786_v30, 16  ;;  %v1826_v30 = vrot.slane %v1824_v54, 7  ;;  %v1832_v45 = vrot.slane %v1830_v47, 6  ;;  %v4000_v26 = vsel %vm3926_vm11, %v2545_v36, %v920_v32 }
  0x79   : > { %3035 = vmatpush3.bf16.msra.mxu0 %v3232_v6  ;;  %2950 = vmatprep.subr.bf16.mxu1 %v3235_v1  ;;  %v2566_v6 = vcombine.low %v909_v0, %v913_v14  ;;  %v1853_v11 = vrot.slane %v1851_v48, 7  ;;  %v1866_v29 = vshrl.u32 %v3817_v53, 16  ;;  %v3240_v0 = vld [vmem:[%s4212_s1 + $0x1d8] sm:$0xff]   ;;  %v1869_v14 = vshll.u32 %v3817_v53, 16 }
  0x7a   : > { %3044 = vmatprep.subr.bf16.mxu0 %v3234_v24  ;;  %v1817_v43 = vrot.slane %v1815_v41, 7  ;;  %v3986_v5 = vor.u32 %v1835_v19, %v1832_v45  ;;  %v217_v41 = vld [vmem:[%s3344_s10 + $0x88] sm:$0x7]  ;;  %v2547_v20 = vrot.slane %v3266_v40, 9  ;;  %v3242_v19 = vld [vmem:[%s4212_s1 + $0x1e0] sm:$0xff]   ;;  %v1887_v56 = vshll.u32 %v3887_v35, 16 }
  0x7b   : > { %v1868_v54 = vrot.slane %v1866_v29, 6  ;;  %v1871_v47 = vrot.slane %v1869_v14, 7  ;;  %v1893_v32 = vshrl.u32 %v217_v41, 16  ;;  %v1920_v40 = vshrl.u32 %v3906_v21, 16 }
  0x7c   : > { %3037 = vmatmul.mubr.bf16.vlgmr.msra.gmra.mrb[0].mxu0 %v2659_v2  ;;  %2951 = vmatpush3.bf16.msra.mxu1 %v3235_v1  ;;  %v3974_v28 = vor.u32 %v1817_v43, %v1814_v12  ;;  %v1827_v1 = vor.u32 %v1826_v30, %v1823_v7  ;;  %v1837_v63 = vrot.slane %v3986_v5, 4  ;;  %v1875_v12 = vshrl.u32 %v210_v62, 16  ;;  %v3264_v7 = vld [vmem:[%s3344_s10 + $0x78] sm:$0xf]  ;;  %v3265_v30 = vld [vmem:[%s3344_s10 + $0x7c] sm:$0xf] }
  0x7d   : > { %3045 = vmatpush3.bf16.msra.mxu0 %v3234_v24  ;;  %2952 = vmatprep.subr.bf16.mxu1 %v3237_v55  ;;  %v3992_v24 = vsel %vm3926_vm11, %v2544_v39, %v916_v3  ;;  %v1878_v43 = vshll.u32 %v210_v62, 16  ;;  %v2546_v53 = vrot.slane %v3264_v7, 9  ;;  %v924_v45 = vrot.slane %v3265_v30, 5  ;;  %v231_v7 = vld [vmem:[%s3344_s10 + $0xc0] sm:$0x7]  ;;  %v3254_v2 = vld [vmem:[%s4212_s1 + $0x228] sm:$0xff]  }
  0x7e   : > { %3046 = vmatprep.subr.bf16.mxu0 %v3236_v10  ;;  %3040 = vmatprep.mubr.bf16.mxu0 %v2660_v60  ;;  %v1819_v15 = vrot.slane %v3974_v28, 4  ;;  %v1845_v60 = vor.u32 %v1844_v38, %v1841_v50  ;;  %v2567_v39 = vcombine.low %v3992_v24, %v4000_v26  ;;  %v1877_v34 = vrot.slane %v1875_v12, 6  ;;  %v3271_v30 = vld [vmem:[%s3344_s10 + $0xd0] sm:$0xf]  ;;  %v4264_v26 = vld [vmem:[#allocation6_spill] sm:$0xff] }
  0x7f   : > { %2945 = vmatmul.mubr.bf16.gmra.mrb[4].mxu1 %v2533_v44  ;;  %v1850_v44 = vrot.slane %v1848_v33, 6  ;;  %v4036_v13 = vor.u32 %v1871_v47, %v1868_v54  ;;  %v1880_v3 = vrot.slane %v1878_v43, 7  ;;  %v1884_v38 = vshrl.u32 %v3887_v35, 16 }
  0x80   : > { %2953 = vmatpush3.bf16.msra.mxu1 %v3237_v55  ;;  %2964 = vmatprep.mubr.bf16.mxu1 %v2566_v6  ;;  %v1828_v36 = vsel %vm3982_vm14, %v1819_v15, %v1827_v1  ;;  %v1846_v57 = vsel %vm3982_vm14, %v1837_v63, %v1845_v60  ;;  %v1859_v55 = vrot.slane %v1857_v16, 6  ;;  %v1862_v6 = vrot.slane %v1860_v49, 7  ;;  %v3245_v60 = vld [vmem:[%s4212_s1 + $0xf0] sm:$0xff]  }
  0x81   : > { %3047 = vmatpush3.bf16.msra.mxu0 %v3236_v10  ;;  %2954 = vmatprep.subr.bf16.mxu1 %v3239_v59  ;;  %v2686_v18 = vcombine.low %v1828_v36, %v1846_v57  ;;  %v4020_v10 = vor.u32 %v1853_v11, %v1850_v44  ;;  %v1873_v1 = vrot.slane %v4036_v13, 4  ;;  %v1881_v33 = vor.u32 %v1880_v3, %v1877_v34  ;;  %v3244_v44 = vld [vmem:[%s4212_s1 + $0x1e8] sm:$0xff]   ;;  %v3269_v34 = vld [vmem:[%s3344_s10 + $0xb4] sm:$0xf]  ;;  %v238_v3 = vld [vmem:[%s3344_s10 + $0xdc] sm:$0x7] }
  0x82   : > { %3048 = vmatprep.subr.bf16.mxu0 %v3238_v8  ;;  %v1863_v42 = vor.u32 %v1862_v6, %v1859_v55  ;;  %v1886_v15 = vrot.slane %v1884_v38, 6  ;;  %v4051_v62 = vsel %vm3926_vm11, %v2546_v53, %v924_v45  ;;  %v1889_v35 = vrot.slane %v1887_v56, 7  ;;  %v3246_v53 = vld [vmem:[%s4212_s1 + $0x1f0] sm:$0xff]  }
  0x83   : > { %v1855_v22 = vrot.slane %v4020_v10, 4  ;;  %v1895_v48 = vrot.slane %v1893_v32, 6  ;;  %v1896_v63 = vshll.u32 %v217_v41, 16  ;;  %v1905_v36 = vshll.u32 %v3890_v25, 16  ;;  %v3268_v41 = vld [vmem:[%s3344_s10 + $0xb0] sm:$0xf] }
  0x84   : > { %2955 = vmatpush3.bf16.msra.mxu1 %v3239_v59  ;;  %3041 = vmatmul.mubr.bf16.gmra.mrb[4].mxu0 %v2661_v9  ;;  %v224_v9 = vld [vmem:[%s3344_s10 + $0xa4] sm:$0x7]  ;;  %v3267_v59 = vld [vmem:[%s3344_s10 + $0x98] sm:$0xf]  ;;  %v4064_v49 = vsel %vm3982_vm14, %v1873_v1, %v1881_v33  ;;  %v4066_v29 = vor.u32 %v1889_v35, %v1886_v15  ;;  %v932_v43 = vrot.slane %v3269_v34, 5  ;;  %v936_v45 = vrot.slane %v3271_v30, 5 }
  0x85   : > { %3049 = vmatpush3.bf16.msra.mxu0 %v3238_v8  ;;  %2956 = vmatprep.subr.bf16.mxu1 %v3241_v4  ;;  %v928_v50 = vrot.slane %v3267_v59, 5  ;;  %v4043_v8 = vsel %vm3982_vm14, %v1855_v22, %v1863_v42  ;;  %v1911_v11 = vshrl.u32 %v224_v9, 16  ;;  %v1914_v57 = vshll.u32 %v224_v9, 16  ;;  %v3270_v22 = vld [vmem:[%s3344_s10 + $0xcc] sm:$0xf]  ;;  %v4097_v1 = vld [vmem:[%s4212_s1 + $0x200] sm:$0xff]  }
  0x86   : > { %3050 = vmatprep.subr.bf16.mxu0 %v3240_v0  ;;  %3060 = vmatprep.mubr.bf16.mxu0 %v2686_v18  ;;  %v1907_v14 = vrot.slane %v1905_v36, 7  ;;  %v2548_v18 = vrot.slane %v3268_v41, 9  ;;  %v1891_v6 = vrot.slane %v4066_v29, 4  ;;  %v2549_v42 = vrot.slane %v3270_v22, 9 }
  0x87   : > { %v4058_v16 = vsel %vm3926_vm11, %v2547_v20, %v928_v50  ;;  %v1913_v12 = vrot.slane %v1911_v11, 6  ;;  %v1916_v47 = vrot.slane %v1914_v57, 7  ;;  %v2687_v20 = vcombine.low %v4043_v8, %v4064_v49 }
  0x88   : > { %2957 = vmatpush3.bf16.msra.mxu1 %v3241_v4  ;;  %v1902_v4 = vshrl.u32 %v3890_v25, 16  ;;  %v3247_v25 = vld [vmem:[%s4212_s1 + $0xf8] sm:$0xff]   ;;  %v2568_v9 = vcombine.low %v4051_v62, %v4058_v16  ;;  %v1923_v59 = vshll.u32 %v3906_v21, 16  ;;  %v1922_v56 = vrot.slane %v1920_v40, 6 }
  0x89   : > { %3051 = vmatpush3.bf16.msra.mxu0 %v3240_v0  ;;  %2958 = vmatprep.subr.bf16.mxu1 %v3243_v17  ;;  %v1898_v0 = vrot.slane %v1896_v63, 7  ;;  %v1929_v32 = vshrl.u32 %v231_v7, 16  ;;  %v4101_v33 = vsel %vm3926_vm11, %v2548_v18, %v932_v43  ;;  %v1932_v15 = vshll.u32 %v231_v7, 16  ;;  %v3248_v62 = vld [vmem:[%s4212_s1 + $0x1f8] sm:$0xff]  }
  0x8a   : > { %3052 = vmatprep.subr.bf16.mxu0 %v3242_v19  ;;  %v1904_v55 = vrot.slane %v1902_v4, 6  ;;  %v1925_v21 = vrot.slane %v1923_v59, 7  ;;  %v1941_v63 = vshll.u32 %v3909_v37, 16  ;;  %v4260_v34 = vshrl.u32 %v3550_v61, 16 }
  0x8b   : > { %v1899_v54 = vor.u32 %v1898_v0, %v1895_v48  ;;  %v4111_v48 = vsel %vm3926_vm11, %v2549_v42, %v936_v45  ;;  %v1931_v4 = vrot.slane %v1929_v32, 6  ;;  %v1934_v36 = vrot.slane %v1932_v15, 7  ;;  %v4267_v32 = vld [vmem:[#allocation8_spill] sm:$0xff] }
  0x8c   : > { %2959 = vmatpush3.bf16.msra.mxu1 %v3243_v17  ;;  %v4078_v17 = vor.u32 %v1907_v14, %v1904_v55  ;;  %v1926_v16 = vor.u32 %v1925_v21, %v1922_v56  ;;  %v1943_v0 = vrot.slane %v1941_v63, 7  ;;  %v1950_v55 = vshll.u32 %v238_v3, 16  ;;  %v4255_v14 = vld [vmem:[#allocation2_spill] sm:$0xff]  ;;  %v4268_v21 = vld [vmem:[#allocation7_spill] sm:$0xff] }
  0x8d   : > { %3053 = vmatpush3.bf16.msra.mxu0 %v3242_v19  ;;  %2960 = vmatprep.subr.bf16.mxu1 %v3245_v60  ;;  %v1917_v19 = vor.u32 %v1916_v47, %v1913_v12  ;;  %v4091_v50 = vsel %vm3982_vm14, %v1891_v6, %v1899_v54  ;;  %v4256_v12 = vor.u32 %v3451_v23, %v4255_v14  ;;  %v4257_v6 = vld [vmem:[#allocation4_spill] sm:$0xff]  ;;  %v4258_v54 = vld [vmem:[#allocation3_spill] sm:$0xff]  ;;  %v2129_v43 = vrot.slane %v4260_v34, 6 }
  0x8e   : > { %3054 = vmatprep.subr.bf16.mxu0 %v3244_v44  ;;  %v1909_v38 = vrot.slane %v4078_v17, 4  ;;  %v1927_v18 = vrot.slane %v1926_v16, 4  ;;  %v1952_v7 = vrot.slane %v1950_v55, 7  ;;  %v4261_v22 = vshll.u32 %v3550_v61, 16 }
  0x8f   : > { %v2112_v41 = vrot.slane %v4256_v12, 4  ;;  %v1935_v30 = vor.u32 %v1934_v36, %v1931_v4  ;;  %v4262_v40 = vshrl.u32 %v3554_v46, 16  ;;  %v4269_v15 = vor.u32 %v4267_v32, %v4268_v21 }
  0x90   : > { %2961 = vmatpush3.bf16.msra.mxu1 %v3245_v60  ;;  %v1938_v60 = vshrl.u32 %v3909_v37, 16  ;;  %v1918_v35 = vsel %vm3982_vm14, %v1909_v38, %v1917_v19  ;;  %v3250_v37 = vld [vmem:[%s4212_s1 + $0x208] sm:$0xff]   ;;  %v2130_v42 = vrot.slane %v4261_v22, 7  ;;  %v2147_v4 = vrot.slane %v2146_v31, 4 }
  0x91   : > { %3055 = vmatpush3.bf16.msra.mxu0 %v3244_v44  ;;  %2962 = vmatprep.subr.bf16.mxu1 %v3247_v25  ;;  %v1947_v44 = vshrl.u32 %v238_v3, 16  ;;  %v2688_v51 = vcombine.low %v4091_v50, %v1918_v35  ;;  %v2134_v19 = vrot.slane %v4262_v40, 6  ;;  %v4263_v3 = vshll.u32 %v3554_v46, 16  ;;  %v4270_v46 = vld [vmem:[#allocation9_spill] sm:$0xff] }
  0x92   : > { %3056 = vmatprep.subr.bf16.mxu0 %v3246_v53  ;;  %v1940_v11 = vrot.slane %v1938_v60, 6  ;;  %v2131_v38 = vor.u32 %v2130_v42, %v2129_v43  ;;  %v2127_v60 = vrot.slane %v4269_v15, 4  ;;  %v4271_v35 = vor.u32 %v3659_v58, %v4270_v46 }
  0x93   : > { %v1949_v57 = vrot.slane %v1947_v44, 6  ;;  %v2135_v59 = vrot.slane %v4263_v3, 7  ;;  %v1936_v36 = vsel %vm3982_vm14, %v1927_v18, %v1935_v30 }
  0x94   : > { %2963 = vmatpush3.bf16.msra.mxu1 %v3247_v25  ;;  %v4259_v25 = vor.u32 %v4257_v6, %v4258_v54  ;;  %v1944_v23 = vor.u32 %v1943_v0, %v1940_v11  ;;  %v2142_v63 = vrot.slane %v4271_v35, 4  ;;  %v2132_v44 = vrot.slane %v2131_v38, 4 }
  0x95   : > { %3057 = vmatpush3.bf16.msra.mxu0 %v3246_v53  ;;  %3092 = vmatprep.subr.bf16.mxu1 %v4097_v1  ;;  %v2113_v53 = vsel %vm3982_vm14, %v2112_v41, %v3974_v28  ;;  %v1953_v28 = vor.u32 %v1952_v7, %v1949_v57  ;;  %v2136_v24 = vor.u32 %v2135_v59, %v2134_v19 }
  0x96   : > { %v2117_v47 = vrot.slane %v4259_v25, 4  ;;  %3058 = vmatprep.subr.bf16.mxu0 %v3248_v62  ;;  %v1945_v61 = vrot.slane %v1944_v23, 4  ;;  %v2133_v52 = vsel %vm3982_vm14, %v2132_v44, %v4066_v29  ;;  %v2143_v31 = vsel %vm3982_vm14, %v2142_v63, %v1926_v16  ;;  %v3256_v16 = vld [vmem:[%s4212_s1 + $0x238] sm:$0xff]  }
  0x97   : > { %2965 = vmatmul.mubr.bf16.vlgmr.msra.gmra.mrb[0].mxu1 %v2567_v39  ;;  %v4265_v39 = vld [vmem:[#allocation5_spill] sm:$0xff]  ;;  %v2137_v11 = vrot.slane %v2136_v24, 4  ;;  %v2148_v49 = vsel %vm3982_vm14, %v2147_v4, %v1944_v23 }
  0x98   : > { %v2118_v45 = vsel %vm3982_vm14, %v2117_v47, %v3986_v5  ;;  %3100 = vmatpush3.bf16.msra.mxu1 %v4097_v1  ;;  %2968 = vmatprep.mubr.bf16.mxu1 %v2568_v9  ;;  %v4266_v56 = vor.u32 %v4264_v26, %v4265_v39  ;;  %v2569_v9 = vcombine.low %v4101_v33, %v4111_v48  ;;  %v3253_v48 = vld [vmem:[%s4212_s1 + $0x220] sm:$0xff]  }
  0x99   : > { %v2714_v50 = vcombine.low %v2113_v53, %v2118_v45  ;;  %3059 = vmatpush3.bf16.msra.mxu0 %v3248_v62  ;;  %3093 = vmatprep.subr.bf16.mxu1 %v3250_v37  ;;  %v3251_v62 = vld [vmem:[%s4212_s1 + $0x210] sm:$0xff]   ;;  %v2128_v33 = vsel %vm3982_vm14, %v2127_v60, %v4036_v13  ;;  %v3252_v13 = vld [vmem:[%s4212_s1 + $0x218] sm:$0xff]   ;;  %v2138_v8 = vsel %vm3982_vm14, %v2137_v11, %v4078_v17 }
  0x9a   : > { %v2122_v5 = vrot.slane %v4266_v56, 4  ;;  %3068 = vmatprep.subr.bf16.mxu0 %v4097_v1  ;;  %v2716_v29 = vcombine.low %v2133_v52, %v2138_v8  ;;  %v3255_v17 = vld [vmem:[%s4212_s1 + $0x230] sm:$0xff]  }
  0x9c   : > { %v2123_v58 = vsel %vm3982_vm14, %v2122_v5, %v4020_v10  ;;  %3061 = vmatmul.mubr.bf16.vlgmr.msra.gmra.mrb[0].mxu0 %v2687_v20  ;;  %3101 = vmatpush3.bf16.msra.mxu1 %v3250_v37  ;;  %v1954_v10 = vsel %vm3982_vm14, %v1945_v61, %v1953_v28  ;;  %v2717_v20 = vcombine.low %v2143_v31, %v2148_v49 }
  0x9d   : > { %v2715_v27 = vcombine.low %v2123_v58, %v2128_v33  ;;  %3069 = vmatpush3.bf16.msra.mxu0 %v4097_v1  ;;  %3064 = vmatprep.mubr.bf16.mxu0 %v2688_v51  ;;  %v2689_v1 = vcombine.low %v1936_v36, %v1954_v10 }
  0x9e   : > { %3070 = vmatprep.subr.bf16.mxu0 %v3250_v37  ;;  %3094 = vmatprep.subr.bf16.mxu1 %v3251_v62 }
  0x9f   : > { %2969 = vmatmul.mubr.bf16.gmra.mrb[4].mxu1 %v2569_v9 }
  0xa0   : > { %3102 = vmatpush3.bf16.msra.mxu1 %v3251_v62  ;;  %3088 = vmatprep.mubr.bf16.mxu1 %v2716_v29 }
  0xa1   : > { %3071 = vmatpush3.bf16.msra.mxu0 %v3250_v37  ;;  %3095 = vmatprep.subr.bf16.mxu1 %v3252_v13 }
  0xa2   : > { %3072 = vmatprep.subr.bf16.mxu0 %v3251_v62 }
  0xa4   : > { %3065 = vmatmul.mubr.bf16.gmra.mrb[4].mxu0 %v2689_v1  ;;  %3103 = vmatpush3.bf16.msra.mxu1 %v3252_v13 }
  0xa5   : > { %3073 = vmatpush3.bf16.msra.mxu0 %v3251_v62  ;;  %3096 = vmatprep.subr.bf16.mxu1 %v3253_v48 }
  0xa6   : > { %3074 = vmatprep.subr.bf16.mxu0 %v3252_v13  ;;  %3084 = vmatprep.mubr.bf16.mxu0 %v2714_v50 }
  0xa8   : > { %3104 = vmatpush3.bf16.msra.mxu1 %v3253_v48 }
  0xa9   : > { %3075 = vmatpush3.bf16.msra.mxu0 %v3252_v13  ;;  %3097 = vmatprep.subr.bf16.mxu1 %v3254_v2 }
  0xaa   : > { %3076 = vmatprep.subr.bf16.mxu0 %v3253_v48 }
  0xac   : > { %3105 = vmatpush3.bf16.msra.mxu1 %v3254_v2 }
  0xad   : > { %3077 = vmatpush3.bf16.msra.mxu0 %v3253_v48  ;;  %3098 = vmatprep.subr.bf16.mxu1 %v3255_v17 }
  0xae   : > { %3078 = vmatprep.subr.bf16.mxu0 %v3254_v2 }
  0xb0   : > { %3106 = vmatpush3.bf16.msra.mxu1 %v3255_v17 }
  0xb1   : > { %3079 = vmatpush3.bf16.msra.mxu0 %v3254_v2  ;;  %3099 = vmatprep.subr.bf16.mxu1 %v3256_v16 }
  0xb2   : > { %3080 = vmatprep.subr.bf16.mxu0 %v3255_v17 }
  0xb4   : > { %3107 = vmatpush3.bf16.msra.mxu1 %v3256_v16 }
  0xb5   : > { %3081 = vmatpush3.bf16.msra.mxu0 %v3255_v17 }
  0xb6   : > { %3082 = vmatprep.subr.bf16.mxu0 %v3256_v16 }
  0xb7   : > { %3089 = vmatmul.mubr.bf16.vlgmr.msra.gmra.mrb[8].mxu1 %v2717_v20 }
  0xb9   : > { %3083 = vmatpush3.bf16.msra.mxu0 %v3256_v16 }
  0xbc   : > { %3085 = vmatmul.mubr.bf16.vlgmr.msra.gmra.mrb[0].mxu0 %v2715_v27 }
 0x16a   : > { %v2966_v0 = vpop.f32.mrb[0].mxu1 }
 0x16b   : > { %v1053_v57 = vpop.f32.mrb[1].mxu1 }
 0x16c   : > { %v2967_v55 = vpop.f32.mrb[2].mxu1 }
 0x16d   : > { %v1056_v14 = vpop.f32.mrb[3].mxu1 }
 0x172   : > { %v2970_v12 = vpop.f32.mrb[4].mxu1 }
 0x173   : > { %v1069_v41 = vpop.f32.mrb[5].mxu1 }
 0x174   : > { %v2971_v37 = vpop.f32.mrb[6].mxu1 }
 0x175   : > { %v1072_v51 = vpop.f32.mrb[7].mxu1 }
 0x177   : > { %v3066_v18 = vpop.f32.mrb[4].mxu0 }
 0x178   : > { %v3112_v6 = vadd.f32 %v3066_v18, %v2970_v12  ;;  %v2086_v54 = vpop.f32.mrb[5].mxu0 }
 0x179   : > { %v3114_v25 = vadd.f32 %v2086_v54, %v1069_v41  ;;  %v3067_v47 = vpop.f32.mrb[6].mxu0 }
 0x17a   : > { %v3116_v34 = vadd.f32 %v3067_v47, %v2971_v37  ;;  %v2089_v43 = vpop.f32.mrb[7].mxu0 }
 0x17b   : > { %v3118_v23 = vadd.f32 %v2089_v43, %v1072_v51 }
 0x18a   : > { %v3090_v7 = vpop.f32.mrb[8].mxu1 }
 0x18b   : > { %v3113_v53 = vadd.f32 %v3112_v6, %v3090_v7  ;;  %v2280_v22 = vpop.f32.mrb[9].mxu1 }
 0x18c   : > { %v3115_v42 = vadd.f32 %v3114_v25, %v2280_v22  ;;  %v3091_v30 = vpop.f32.mrb[10].mxu1 }
 0x18d   : > { %v3117_v45 = vadd.f32 %v3116_v34, %v3091_v30  ;;  %v2283_v40 = vpop.f32.mrb[11].mxu1  ;;  %v2323_v27 = vmul.f32 %v3113_v53, %v3113_v53 }
 0x18e   : > { %v3119_v19 = vadd.f32 %v3118_v23, %v2283_v40  ;;  %v2321_v4 = vmul.f32 %v3115_v42, %v3115_v42 }
 0x18f   : > { %v3086_v3 = vpop.f32.mrb[0].mxu0  ;;  %v2763_v59 = vpack.c.bf16 %v3117_v45, %v3113_v53  ;;  %v2324_v13 = vmul.f32 %v3117_v45, %v3117_v45 }
 0x190   : > { %v3108_v61 = vadd.f32 %v3086_v3, %v2966_v0  ;;  %v2264_v28 = vpop.f32.mrb[1].mxu0  ;;  %v2758_v50 = vpack.c.bf16 %v3119_v19, %v3115_v42  ;;  %v2322_v33 = vmul.f32 %v3119_v19, %v3119_v19 }
 0x191   : > { %v3109_v38 = vadd.f32 %v2264_v28, %v1053_v57  ;;  %v3087_v24 = vpop.f32.mrb[2].mxu0  ;;  %2767 = vst [vmem:[%s177_s19 + $0x18] sm:$0xff] %v2763_v59  }
 0x192   : > { %v3110_v26 = vadd.f32 %v3087_v24, %v2967_v55  ;;  %v2267_v39 = vpop.f32.mrb[3].mxu0  ;;  %2766 = vst [vmem:[%s177_s19 + $0x10] sm:$0xff] %v2758_v50   ;;  %v2319_v46 = vmul.f32 %v3108_v61, %v3108_v61 }
 0x193   : > { %v3111_v56 = vadd.f32 %v2267_v39, %v1056_v14  ;;  %v2317_v32 = vmul.f32 %v3109_v38, %v3109_v38 }
 0x194   : > { %v2753_v5 = vpack.c.bf16 %v3110_v26, %v3108_v61  ;;  %v2320_v9 = vmul.f32 %v3110_v26, %v3110_v26 }
 0x195   : > { %v2303_v21 = vadd.f32 %v3111_v56, %v3109_v38  ;;  %v2318_v15 = vmul.f32 %v3111_v56, %v3111_v56  ;;  %v2748_v60 = vpack.c.bf16 %v3111_v56, %v3109_v38 }
 0x196   : > { %2765 = vst [vmem:[%s177_s19 + $0x8] sm:$0xff] %v2753_v5  }
 0x197   : > { %v2304_v35 = vadd.f32 %v3108_v61, %v2303_v21  ;;  %v2325_v63 = vadd.f32 %v2318_v15, %v2317_v32  ;;  %2749 = vst [vmem:[%s177_s19] sm:$0xff] %v2748_v60  }
 0x199   : > { %v2326_v62 = vadd.f32 %v2325_v63, %v2319_v46  ;;  %v2305_v44 = vadd.f32 %v3110_v26, %v2304_v35 }
 0x19b   : > { %v2306_v36 = vadd.f32 %v3115_v42, %v2305_v44  ;;  %v2327_v11 = vadd.f32 %v2326_v62, %v2320_v9 }
 0x19d   : > { %v2307_v58 = vadd.f32 %v3119_v19, %v2306_v36  ;;  %v2328_v52 = vadd.f32 %v2327_v11, %v2321_v4 }
 0x19f   : > { %v2308_v31 = vadd.f32 %v3113_v53, %v2307_v58  ;;  %v2329_v10 = vadd.f32 %v2328_v52, %v2322_v33 }
 0x1a1   : > { %v2309_v8 = vadd.f32 %v3117_v45, %v2308_v31  ;;  %v2330_v49 = vadd.f32 %v2329_v10, %v2323_v27 }
 0x1a3   : > { %v2310_v29 = vrot.slane %v2309_v8, 4  ;;  %v2331_v20 = vadd.f32 %v2330_v49, %v2324_v13 }
 0x1a5   : > { %v2311_v1 = vadd.f32 %v2310_v29, %v2309_v8  ;;  %v2332_v48 = vrot.slane %v2331_v20, 4 }
 0x1a7   : > { %v2312_v2 = vrot.slane %v2311_v1, 2  ;;  %v2333_v17 = vadd.f32 %v2332_v48, %v2331_v20 }
 0x1a9   : > { %v2313_v16 = vadd.f32 %v2312_v2, %v2311_v1  ;;  %v2334_v0 = vrot.slane %v2333_v17, 2 }
 0x1ab   : > { %v2314_v57 = vrot.slane %v2313_v16, 1  ;;  %v2335_v55 = vadd.f32 %v2334_v0, %v2333_v17 }
 0x1ad   : > { %v2315_v14 = vadd.f32 %v2314_v57, %v2313_v16  ;;  %v2336_v12 = vrot.slane %v2335_v55, 1 }
 0x1af   : > { %2316 = vst [vmem:[%s181_s23] sm:$0x1] %v2315_v14  ;;  %v2337_v41 = vadd.f32 %v2336_v12, %v2335_v55 }
 0x1b1   : > { %2338 = vst [vmem:[%s181_s23 + $0x1] sm:$0x1] %v2337_v41 }
 0x1b2 PF: > { %s14_s12 = sadd.s32 1, %s3278_s12  }
 0x1b3   : > { %p11_p4 = scmp.ge.s32.totalorder %s14_s12, 4  }
 0x1b5   :  { %13 = sbr.rel (!%p11_p4) target bundleno = 1 (0x1), region = 78 }

// kernel: down_block_forward.8
= control target key start
LH: loop header
LB: loop body
LE: loop exit
PB: predicated region body
PF: predicated region fallthrough
CT: control target
= control target key end

     0   :  { %s660_s1 = inlined_call_operand.vmem [shape: bf16[128,128], index: 1, kind: input, shape index: {}]   ;;  %s661_s0 = inlined_call_operand.vmem [shape: bf16[128,128], index: 0, kind: input, shape index: {}]   ;;  %s662_s2 = inlined_call_operand.vmem [shape: bf16[128,128], index: 2, kind: output, shape index: {0}]   ;;  %s663_s3 = inlined_call_operand.vmem [shape: f32[1,2,128], index: 3, kind: output, shape index: {1}]  }
   0x1   :  { %v546_v0 = vld [vmem:[%s660_s1] sm:$0xff]   ;;  %v547_v1 = vld [vmem:[%s660_s1 + $0x8] sm:$0xff]   ;;  %v548_v2 = vld [vmem:[%s660_s1 + $0x10] sm:$0xff]  }
   0x2   :  { %498 = vmatprep.subr.bf16.mxu0 %v546_v0  ;;  %530 = vmatprep.subr.bf16.mxu1 %v546_v0  ;;  %v549_v3 = vld [vmem:[%s660_s1 + $0x18] sm:$0xff]   ;;  %v554_v4 = vld [vmem:[%s661_s0] sm:$0xff]   ;;  %v551_v7 = vld [vmem:[%s660_s1 + $0x28] sm:$0xff]  }
   0x3   :  { %499 = vmatpush3.bf16.msra.mxu0 %v546_v0  ;;  %538 = vmatpush3.bf16.msra.mxu1 %v546_v0  ;;  %v550_v5 = vld [vmem:[%s660_s1 + $0x20] sm:$0xff]   ;;  %v552_v8 = vld [vmem:[%s660_s1 + $0x30] sm:$0xff]   ;;  %v553_v9 = vld [vmem:[%s660_s1 + $0x38] sm:$0xff]  }
   0x4   :  { %500 = vmatprep.subr.bf16.mxu0 %v547_v1  ;;  %531 = vmatprep.subr.bf16.mxu1 %v547_v1  ;;  %v558_v6 = vld [vmem:[%s661_s0 + $0x20] sm:$0xff]   ;;  %v555_v10 = vld [vmem:[%s661_s0 + $0x8] sm:$0xff]   ;;  %v556_v12 = vld [vmem:[%s661_s0 + $0x10] sm:$0xff]  }
   0x5   :  { %514 = vmatprep.mubr.bf16.mxu0 %v554_v4  ;;  %522 = vmatprep.mubr.bf16.mxu1 %v558_v6  ;;  %v559_v11 = vld [vmem:[%s661_s0 + $0x28] sm:$0xff]   ;;  %v560_v13 = vld [vmem:[%s661_s0 + $0x30] sm:$0xff]   ;;  %v557_v14 = vld [vmem:[%s661_s0 + $0x18] sm:$0xff]  }
   0x6   :  { %v561_v15 = vld [vmem:[%s661_s0 + $0x38] sm:$0xff]  }
   0x7   :  { %501 = vmatpush3.bf16.msra.mxu0 %v547_v1  ;;  %539 = vmatpush3.bf16.msra.mxu1 %v547_v1 }
   0x8   :  { %502 = vmatprep.subr.bf16.mxu0 %v548_v2  ;;  %532 = vmatprep.subr.bf16.mxu1 %v548_v2 }
   0xb   :  { %503 = vmatpush3.bf16.msra.mxu0 %v548_v2  ;;  %540 = vmatpush3.bf16.msra.mxu1 %v548_v2 }
   0xc   :  { %504 = vmatprep.subr.bf16.mxu0 %v549_v3  ;;  %533 = vmatprep.subr.bf16.mxu1 %v549_v3 }
   0xf   :  { %505 = vmatpush3.bf16.msra.mxu0 %v549_v3  ;;  %541 = vmatpush3.bf16.msra.mxu1 %v549_v3 }
  0x10   :  { %506 = vmatprep.subr.bf16.mxu0 %v550_v5  ;;  %534 = vmatprep.subr.bf16.mxu1 %v550_v5 }
  0x13   :  { %507 = vmatpush3.bf16.msra.mxu0 %v550_v5  ;;  %542 = vmatpush3.bf16.msra.mxu1 %v550_v5 }
  0x14   :  { %508 = vmatprep.subr.bf16.mxu0 %v551_v7  ;;  %535 = vmatprep.subr.bf16.mxu1 %v551_v7 }
  0x17   :  { %509 = vmatpush3.bf16.msra.mxu0 %v551_v7  ;;  %543 = vmatpush3.bf16.msra.mxu1 %v551_v7 }
  0x18   :  { %510 = vmatprep.subr.bf16.mxu0 %v552_v8  ;;  %536 = vmatprep.subr.bf16.mxu1 %v552_v8 }
  0x1b   :  { %511 = vmatpush3.bf16.msra.mxu0 %v552_v8  ;;  %544 = vmatpush3.bf16.msra.mxu1 %v552_v8 }
  0x1c   :  { %512 = vmatprep.subr.bf16.mxu0 %v553_v9  ;;  %537 = vmatprep.subr.bf16.mxu1 %v553_v9 }
  0x1f   :  { %513 = vmatpush3.bf16.msra.mxu0 %v553_v9  ;;  %545 = vmatpush3.bf16.msra.mxu1 %v553_v9 }
  0x22   :  { %515 = vmatmul.mubr.bf16.vlgmr.msra.gmra.mrb[0].mxu0 %v555_v10  ;;  %523 = vmatmul.mubr.bf16.vlgmr.msra.gmra.mrb[0].mxu1 %v559_v11 }
  0x23   :  { %518 = vmatprep.mubr.bf16.mxu0 %v556_v12  ;;  %526 = vmatprep.mubr.bf16.mxu1 %v560_v13 }
  0x2a   :  { %519 = vmatmul.mubr.bf16.gmra.mrb[4].mxu0 %v557_v14  ;;  %527 = vmatmul.mubr.bf16.gmra.mrb[4].mxu1 %v561_v15 }
  0xf5   :  { %v516_v16 = vpop.f32.mrb[0].mxu0  ;;  %v524_v17 = vpop.f32.mrb[0].mxu1 }
  0xf6   :  { %v176_v18 = vpop.f32.mrb[1].mxu0  ;;  %v208_v19 = vpop.f32.mrb[1].mxu1  ;;  %v263_v31 = vmul.f32 %v516_v16, %v516_v16  ;;  %v271_v3 = vmul.f32 %v524_v17, %v524_v17 }
  0xf7   :  { %v517_v20 = vpop.f32.mrb[2].mxu0  ;;  %v525_v21 = vpop.f32.mrb[2].mxu1  ;;  %v261_v26 = vmul.f32 %v176_v18, %v176_v18  ;;  %v269_v61 = vmul.f32 %v208_v19, %v208_v19 }
  0xf8   :  { %v443_v22 = vpack.c.bf16 %v517_v20, %v516_v16  ;;  %v179_v23 = vpop.f32.mrb[3].mxu0  ;;  %v463_v24 = vpack.c.bf16 %v525_v21, %v524_v17  ;;  %v211_v25 = vpop.f32.mrb[3].mxu1  ;;  %v264_v34 = vmul.f32 %v517_v20, %v517_v20  ;;  %v272_v6 = vmul.f32 %v525_v21, %v525_v21 }
  0xf9   :  { %v239_v27 = vadd.f32 %v179_v23, %v176_v18  ;;  %v262_v28 = vmul.f32 %v179_v23, %v179_v23  ;;  %v438_v29 = vpack.c.bf16 %v179_v23, %v176_v18  ;;  %v458_v30 = vpack.c.bf16 %v211_v25, %v208_v19 }
  0xfa   :  { %475 = vst [vmem:[%s662_s2 + $0x8] sm:$0xff] %v443_v22   ;;  %479 = vst [vmem:[%s662_s2 + $0x28] sm:$0xff] %v463_v24   ;;  %v270_v2 = vmul.f32 %v211_v25, %v211_v25 }
  0xfb   :  { %v240_v32 = vadd.f32 %v516_v16, %v239_v27  ;;  %v277_v33 = vadd.f32 %v262_v28, %v261_v26  ;;  %439 = vst [vmem:[%s662_s2] sm:$0xff] %v438_v29   ;;  %478 = vst [vmem:[%s662_s2 + $0x20] sm:$0xff] %v458_v30  }
  0xfd   :  { %v278_v35 = vadd.f32 %v277_v33, %v263_v31  ;;  %v520_v36 = vpop.f32.mrb[4].mxu0  ;;  %v241_v37 = vadd.f32 %v517_v20, %v240_v32  ;;  %v528_v38 = vpop.f32.mrb[4].mxu1 }
  0xfe   :  { %v192_v39 = vpop.f32.mrb[5].mxu0  ;;  %v224_v40 = vpop.f32.mrb[5].mxu1  ;;  %v267_v55 = vmul.f32 %v520_v36, %v520_v36  ;;  %v275_v15 = vmul.f32 %v528_v38, %v528_v38 }
  0xff   :  { %v242_v41 = vadd.f32 %v241_v37, %v192_v39  ;;  %v265_v42 = vmul.f32 %v192_v39, %v192_v39  ;;  %v279_v43 = vadd.f32 %v278_v35, %v264_v34  ;;  %v521_v44 = vpop.f32.mrb[6].mxu0  ;;  %v529_v45 = vpop.f32.mrb[6].mxu1  ;;  %v273_v9 = vmul.f32 %v224_v40, %v224_v40 }
 0x100   :  { %v453_v46 = vpack.c.bf16 %v521_v44, %v520_v36  ;;  %v195_v47 = vpop.f32.mrb[7].mxu0  ;;  %v473_v48 = vpack.c.bf16 %v529_v45, %v528_v38  ;;  %v227_v49 = vpop.f32.mrb[7].mxu1  ;;  %v268_v58 = vmul.f32 %v521_v44, %v521_v44 }
 0x101   :  { %v280_v50 = vadd.f32 %v279_v43, %v265_v42  ;;  %v243_v51 = vadd.f32 %v242_v41, %v195_v47  ;;  %v266_v52 = vmul.f32 %v195_v47, %v195_v47  ;;  %v448_v53 = vpack.c.bf16 %v195_v47, %v192_v39 }
 0x102   :  { %477 = vst [vmem:[%s662_s2 + $0x18] sm:$0xff] %v453_v46   ;;  %481 = vst [vmem:[%s662_s2 + $0x38] sm:$0xff] %v473_v48   ;;  %v468_v54 = vpack.c.bf16 %v227_v49, %v224_v40  ;;  %v274_v14 = vmul.f32 %v227_v49, %v227_v49 }
 0x103   :  { %v244_v56 = vadd.f32 %v520_v36, %v243_v51  ;;  %v281_v57 = vadd.f32 %v280_v50, %v266_v52  ;;  %476 = vst [vmem:[%s662_s2 + $0x10] sm:$0xff] %v448_v53  }
 0x104   :  { %480 = vst [vmem:[%s662_s2 + $0x30] sm:$0xff] %v468_v54  }
 0x105   :  { %v282_v59 = vadd.f32 %v281_v57, %v267_v55  ;;  %v245_v60 = vadd.f32 %v521_v44, %v244_v56 }
 0x107   :  { %v246_v62 = vadd.f32 %v245_v60, %v208_v19  ;;  %v283_v63 = vadd.f32 %v282_v59, %v268_v58  ;;  %v276_v19 = vmul.f32 %v529_v45, %v529_v45 }
 0x109   :  { %v284_v0 = vadd.f32 %v283_v63, %v269_v61  ;;  %v247_v1 = vadd.f32 %v246_v62, %v211_v25 }
 0x10b   :  { %v248_v4 = vadd.f32 %v524_v17, %v247_v1  ;;  %v285_v5 = vadd.f32 %v284_v0, %v270_v2 }
 0x10d   :  { %v286_v7 = vadd.f32 %v285_v5, %v271_v3  ;;  %v249_v8 = vadd.f32 %v525_v21, %v248_v4 }
 0x10f   :  { %v250_v10 = vadd.f32 %v249_v8, %v224_v40  ;;  %v287_v11 = vadd.f32 %v286_v7, %v272_v6 }
 0x111   :  { %v288_v12 = vadd.f32 %v287_v11, %v273_v9  ;;  %v251_v13 = vadd.f32 %v250_v10, %v227_v49 }
 0x113   :  { %v252_v16 = vadd.f32 %v528_v38, %v251_v13  ;;  %v289_v18 = vadd.f32 %v288_v12, %v274_v14 }
 0x115   :  { %v253_v20 = vadd.f32 %v529_v45, %v252_v16  ;;  %v290_v22 = vadd.f32 %v289_v18, %v275_v15 }
 0x117   :  { %v254_v23 = vrot.slane %v253_v20, 4  ;;  %v291_v24 = vadd.f32 %v290_v22, %v276_v19 }
 0x119   :  { %v255_v25 = vadd.f32 %v254_v23, %v253_v20  ;;  %v292_v17 = vrot.slane %v291_v24, 4 }
 0x11b   :  { %v256_v26 = vrot.slane %v255_v25, 2  ;;  %v293_v27 = vadd.f32 %v292_v17, %v291_v24 }
 0x11d   :  { %v257_v28 = vadd.f32 %v256_v26, %v255_v25  ;;  %v294_v21 = vrot.slane %v293_v27, 2 }
 0x11f   :  { %v258_v29 = vrot.slane %v257_v28, 1  ;;  %v295_v30 = vadd.f32 %v294_v21, %v293_v27 }
 0x121   :  { %v259_v31 = vadd.f32 %v258_v29, %v257_v28  ;;  %v296_v32 = vrot.slane %v295_v30, 1 }
 0x123   :  { %260 = vst [vmem:[%s663_s3] sm:$0x1] %v259_v31  ;;  %v297_v33 = vadd.f32 %v296_v32, %v295_v30 }
 0x125   :  { %298 = vst [vmem:[%s663_s3 + $0x1] sm:$0x1] %v297_v33 }

// kernel: down_block_forward.9
= control target key start
LH: loop header
LB: loop body
LE: loop exit
PB: predicated region body
PF: predicated region fallthrough
CT: control target
= control target key end

     0   :  { %s647_s0 = inlined_call_operand.vmem [shape: bf16[128,128], index: 0, kind: input, shape index: {}]   ;;  %s648_s1 = inlined_call_operand.vmem [shape: f32[1,128], index: 1, kind: input, shape index: {}]   ;;  %s649_s2 = inlined_call_operand.vmem [shape: f32[1,128], index: 2, kind: input, shape index: {}]   ;;  %s650_s3 = inlined_call_operand.vmem [shape: bf16[128,128], index: 3, kind: input, shape index: {}]   ;;  %s651_s4 = inlined_call_operand.vmem [shape: f32[1,128], index: 4, kind: input, shape index: {}]   ;;  %s652_s5 = inlined_call_operand.vmem [shape: f32[1,128], index: 5, kind: input, shape index: {}]   ;;  %s653_s6 = inlined_call_operand.vmem [shape: bf16[128,128], index: 6, kind: output, shape index: {}]  }
   0x1   :  { %v332_v0 = vld [vmem:[%s647_s0] sm:$0xff]   ;;  %v435_v9 = vld [vmem:[%s647_s0 + $0x8] sm:$0xff]   ;;  %v436_v24 = vld [vmem:[%s647_s0 + $0x10] sm:$0xff]  }
   0x2   :  { %v497_v1 = vld [vmem:[%s648_s1] ss:$0 sm:$0xff]  ;;  %v333_v2 = vunpack.c.l.bf16 %v332_v0  ;;  %v334_v3 = vunpack.c.h.bf16 %v332_v0  ;;  %v442_v10 = vld [vmem:[%s650_s3 + $0x8] sm:$0xff]   ;;  %v337_v14 = vunpack.c.l.bf16 %v435_v9  ;;  %v338_v15 = vunpack.c.h.bf16 %v435_v9  ;;  %v443_v33 = vld [vmem:[%s650_s3 + $0x10] sm:$0xff]  }
   0x3   :  { %v364_v4 = vld [vmem:[%s650_s3] sm:$0xff]   ;;  %v369_v18 = vunpack.c.l.bf16 %v442_v10  ;;  %v370_v19 = vunpack.c.h.bf16 %v442_v10  ;;  %v341_v36 = vunpack.c.l.bf16 %v436_v24  ;;  %v342_v37 = vunpack.c.h.bf16 %v436_v24  ;;  %v437_v38 = vld [vmem:[%s647_s0 + $0x18] sm:$0xff]  }
   0x4   :  { %v505_v5 = vld [vmem:[%s651_s4] ss:$0 sm:$0xff]  ;;  %v365_v7 = vunpack.c.l.bf16 %v364_v4  ;;  %v366_v8 = vunpack.c.h.bf16 %v364_v4  ;;  %v62_v11 = vmul.f32 %v333_v2, %v497_v1  ;;  %v63_v12 = vmul.f32 %v334_v3, %v497_v1  ;;  %v444_v47 = vld [vmem:[%s650_s3 + $0x18] sm:$0xff]  }
   0x5   :  { %v510_v6 = vld [vmem:[%s649_s2] ss:$0 sm:$0xff]  ;;  %v64_v22 = vmul.f32 %v337_v14, %v497_v1  ;;  %v65_v23 = vmul.f32 %v338_v15, %v497_v1  ;;  %v158_v27 = vmul.f32 %v369_v18, %v505_v5  ;;  %v159_v28 = vmul.f32 %v370_v19, %v505_v5  ;;  %v439_v18 = vld [vmem:[%s647_s0 + $0x28] sm:$0xff]  }
   0x6   :  { %v523_v13 = vld [vmem:[%s652_s5] ss:$0 sm:$0xff]  ;;  %v156_v16 = vmul.f32 %v365_v7, %v505_v5  ;;  %v157_v17 = vmul.f32 %v366_v8, %v505_v5  ;;  %v85_v20 = vadd.f32 %v510_v6, %v62_v11  ;;  %v86_v21 = vadd.f32 %v510_v6, %v63_v12 }
   0x7   :  { %v87_v31 = vadd.f32 %v510_v6, %v64_v22  ;;  %v88_v32 = vadd.f32 %v510_v6, %v65_v23  ;;  %v181_v34 = vadd.f32 %v523_v13, %v158_v27  ;;  %v182_v35 = vadd.f32 %v523_v13, %v159_v28  ;;  %v438_v60 = vld [vmem:[%s647_s0 + $0x20] sm:$0xff]   ;;  %v446_v23 = vld [vmem:[%s650_s3 + $0x28] sm:$0xff]  }
   0x8   :  { %v179_v25 = vadd.f32 %v523_v13, %v156_v16  ;;  %v180_v26 = vadd.f32 %v523_v13, %v157_v17  ;;  %v101_v29 = vmax.f32 %v85_v20, 0.0  ;;  %v102_v30 = vmax.f32 %v86_v21, 0.0  ;;  %v445_v8 = vld [vmem:[%s650_s3 + $0x20] sm:$0xff]  }
   0x9   :  { %v103_v41 = vmax.f32 %v87_v31, 0.0  ;;  %v104_v42 = vmax.f32 %v88_v32, 0.0  ;;  %v66_v43 = vmul.f32 %v341_v36, %v497_v1  ;;  %v67_v44 = vmul.f32 %v342_v37, %v497_v1  ;;  %v440_v36 = vld [vmem:[%s647_s0 + $0x30] sm:$0xff]  }
   0xa   :  { %v195_v39 = vadd.f32 %v179_v25, %v101_v29  ;;  %v196_v40 = vadd.f32 %v180_v26, %v102_v30  ;;  %v373_v45 = vunpack.c.l.bf16 %v443_v33  ;;  %v374_v46 = vunpack.c.h.bf16 %v443_v33 }
   0xb   :  { %v197_v49 = vadd.f32 %v181_v34, %v103_v41  ;;  %v198_v50 = vadd.f32 %v182_v35, %v104_v42  ;;  %v345_v51 = vunpack.c.l.bf16 %v437_v38  ;;  %v89_v52 = vadd.f32 %v510_v6, %v66_v43 }
   0xc   :  { %v398_v48 = vpack.c.bf16 %v196_v40, %v195_v39  ;;  %v90_v53 = vadd.f32 %v510_v6, %v67_v44  ;;  %v160_v54 = vmul.f32 %v373_v45, %v505_v5  ;;  %v161_v55 = vmul.f32 %v374_v46, %v505_v5  ;;  %v447_v45 = vld [vmem:[%s650_s3 + $0x30] sm:$0xff]  }
   0xd   :  { %v403_v56 = vpack.c.bf16 %v198_v50, %v197_v49  ;;  %v346_v57 = vunpack.c.h.bf16 %v437_v38  ;;  %v68_v58 = vmul.f32 %v345_v51, %v497_v1  ;;  %v377_v59 = vunpack.c.l.bf16 %v444_v47 }
   0xe   :  { %399 = vst [vmem:[%s653_s6] sm:$0xff] %v398_v48   ;;  %v105_v61 = vmax.f32 %v89_v52, 0.0  ;;  %v106_v62 = vmax.f32 %v90_v53, 0.0  ;;  %v183_v63 = vadd.f32 %v523_v13, %v160_v54  ;;  %v184_v0 = vadd.f32 %v523_v13, %v161_v55 }
   0xf   :  { %449 = vst [vmem:[%s653_s6 + $0x8] sm:$0xff] %v403_v56   ;;  %v69_v2 = vmul.f32 %v346_v57, %v497_v1  ;;  %v91_v3 = vadd.f32 %v510_v6, %v68_v58  ;;  %v378_v4 = vunpack.c.h.bf16 %v444_v47  ;;  %v162_v7 = vmul.f32 %v377_v59, %v505_v5  ;;  %v441_v58 = vld [vmem:[%s647_s0 + $0x38] sm:$0xff]  }
  0x10   :  { %v199_v9 = vadd.f32 %v183_v63, %v105_v61  ;;  %v200_v10 = vadd.f32 %v184_v0, %v106_v62  ;;  %v349_v11 = vunpack.c.l.bf16 %v438_v60  ;;  %v350_v12 = vunpack.c.h.bf16 %v438_v60  ;;  %v448_v63 = vld [vmem:[%s650_s3 + $0x38] sm:$0xff]  }
  0x11   :  { %v92_v14 = vadd.f32 %v510_v6, %v69_v2  ;;  %v107_v15 = vmax.f32 %v91_v3, 0.0  ;;  %v163_v16 = vmul.f32 %v378_v4, %v505_v5  ;;  %v185_v17 = vadd.f32 %v523_v13, %v162_v7 }
  0x12   :  { %v408_v19 = vpack.c.bf16 %v200_v10, %v199_v9  ;;  %v70_v20 = vmul.f32 %v349_v11, %v497_v1  ;;  %v71_v21 = vmul.f32 %v350_v12, %v497_v1  ;;  %v381_v22 = vunpack.c.l.bf16 %v445_v8 }
  0x13   :  { %v108_v24 = vmax.f32 %v92_v14, 0.0  ;;  %v186_v25 = vadd.f32 %v523_v13, %v163_v16  ;;  %v201_v26 = vadd.f32 %v185_v17, %v107_v15  ;;  %v382_v27 = vunpack.c.h.bf16 %v445_v8 }
  0x14   :  { %450 = vst [vmem:[%s653_s6 + $0x10] sm:$0xff] %v408_v19   ;;  %v93_v28 = vadd.f32 %v510_v6, %v70_v20  ;;  %v94_v29 = vadd.f32 %v510_v6, %v71_v21  ;;  %v164_v30 = vmul.f32 %v381_v22, %v505_v5  ;;  %v353_v31 = vunpack.c.l.bf16 %v439_v18 }
  0x15   :  { %v202_v32 = vadd.f32 %v186_v25, %v108_v24  ;;  %v165_v33 = vmul.f32 %v382_v27, %v505_v5  ;;  %v354_v34 = vunpack.c.h.bf16 %v439_v18  ;;  %v385_v35 = vunpack.c.l.bf16 %v446_v23 }
  0x16   :  { %v109_v37 = vmax.f32 %v93_v28, 0.0  ;;  %v110_v38 = vmax.f32 %v94_v29, 0.0  ;;  %v187_v39 = vadd.f32 %v523_v13, %v164_v30  ;;  %v72_v40 = vmul.f32 %v353_v31, %v497_v1 }
  0x17   :  { %v413_v41 = vpack.c.bf16 %v202_v32, %v201_v26  ;;  %v188_v42 = vadd.f32 %v523_v13, %v165_v33  ;;  %v73_v43 = vmul.f32 %v354_v34, %v497_v1  ;;  %v386_v44 = vunpack.c.h.bf16 %v446_v23 }
  0x18   :  { %v203_v46 = vadd.f32 %v187_v39, %v109_v37  ;;  %v95_v47 = vadd.f32 %v510_v6, %v72_v40  ;;  %v166_v48 = vmul.f32 %v385_v35, %v505_v5  ;;  %v357_v49 = vunpack.c.l.bf16 %v440_v36 }
  0x19   :  { %451 = vst [vmem:[%s653_s6 + $0x18] sm:$0xff] %v413_v41   ;;  %v204_v50 = vadd.f32 %v188_v42, %v110_v38  ;;  %v96_v51 = vadd.f32 %v510_v6, %v73_v43  ;;  %v167_v52 = vmul.f32 %v386_v44, %v505_v5  ;;  %v358_v53 = vunpack.c.h.bf16 %v440_v36 }
  0x1a   :  { %v111_v54 = vmax.f32 %v95_v47, 0.0  ;;  %v189_v55 = vadd.f32 %v523_v13, %v166_v48  ;;  %v74_v56 = vmul.f32 %v357_v49, %v497_v1  ;;  %v389_v57 = vunpack.c.l.bf16 %v447_v45 }
  0x1b   :  { %v418_v59 = vpack.c.bf16 %v204_v50, %v203_v46  ;;  %v112_v60 = vmax.f32 %v96_v51, 0.0  ;;  %v190_v61 = vadd.f32 %v523_v13, %v167_v52  ;;  %v75_v62 = vmul.f32 %v358_v53, %v497_v1 }
  0x1c   :  { %v205_v0 = vadd.f32 %v189_v55, %v111_v54  ;;  %v97_v2 = vadd.f32 %v510_v6, %v74_v56  ;;  %v390_v3 = vunpack.c.h.bf16 %v447_v45  ;;  %v168_v4 = vmul.f32 %v389_v57, %v505_v5 }
  0x1d   :  { %452 = vst [vmem:[%s653_s6 + $0x20] sm:$0xff] %v418_v59   ;;  %v206_v7 = vadd.f32 %v190_v61, %v112_v60  ;;  %v98_v8 = vadd.f32 %v510_v6, %v75_v62  ;;  %v361_v9 = vunpack.c.l.bf16 %v441_v58  ;;  %v362_v10 = vunpack.c.h.bf16 %v441_v58 }
  0x1e   :  { %v113_v11 = vmax.f32 %v97_v2, 0.0  ;;  %v169_v12 = vmul.f32 %v390_v3, %v505_v5  ;;  %v191_v14 = vadd.f32 %v523_v13, %v168_v4  ;;  %v393_v15 = vunpack.c.l.bf16 %v448_v63 }
  0x1f   :  { %v423_v16 = vpack.c.bf16 %v206_v7, %v205_v0  ;;  %v114_v17 = vmax.f32 %v98_v8, 0.0  ;;  %v76_v18 = vmul.f32 %v361_v9, %v497_v1  ;;  %v77_v19 = vmul.f32 %v362_v10, %v497_v1 }
  0x20   :  { %v192_v20 = vadd.f32 %v523_v13, %v169_v12  ;;  %v207_v21 = vadd.f32 %v191_v14, %v113_v11  ;;  %v394_v22 = vunpack.c.h.bf16 %v448_v63  ;;  %v170_v23 = vmul.f32 %v393_v15, %v505_v5 }
  0x21   :  { %453 = vst [vmem:[%s653_s6 + $0x28] sm:$0xff] %v423_v16   ;;  %v99_v24 = vadd.f32 %v510_v6, %v76_v18  ;;  %v100_v25 = vadd.f32 %v510_v6, %v77_v19 }
  0x22   :  { %v208_v26 = vadd.f32 %v192_v20, %v114_v17  ;;  %v171_v27 = vmul.f32 %v394_v22, %v505_v5  ;;  %v193_v28 = vadd.f32 %v523_v13, %v170_v23 }
  0x23   :  { %v115_v1 = vmax.f32 %v99_v24, 0.0  ;;  %v116_v29 = vmax.f32 %v100_v25, 0.0 }
  0x24   :  { %v428_v30 = vpack.c.bf16 %v208_v26, %v207_v21  ;;  %v194_v31 = vadd.f32 %v523_v13, %v171_v27 }
  0x25   :  { %v209_v32 = vadd.f32 %v193_v28, %v115_v1 }
  0x26   :  { %454 = vst [vmem:[%s653_s6 + $0x30] sm:$0xff] %v428_v30   ;;  %v210_v33 = vadd.f32 %v194_v31, %v116_v29 }
  0x28   :  { %v433_v34 = vpack.c.bf16 %v210_v33, %v209_v32 }
  0x2a   :  { %455 = vst [vmem:[%s653_s6 + $0x38] sm:$0xff] %v433_v34  }

</bundles_post_ra>
